<compile_context>
chip_gen: v7x
topology: tpu7x:2x2x1
jax: 0.10.0
libtpu: 0.0.40
codegen_flags: <defaults>
</compile_context>

<pallas_src>
import functools

import jax
import jax.numpy as jnp
from jax.experimental import pallas as pl
from jax.experimental.pallas import tpu as pltpu


# v1 is placed at this tile-aligned offset inside the zeroed scratch canvas so
# that the shifted taps (i-1, j-1) are still non-negative offsets.
_ROW0 = 8     # multiple of 8   (sublane-tile aligned)
_COL0 = 128   # multiple of 128 (lane-tile aligned)


def _make_fused_kernel(C, H, W, slope):
    Ho, Wo = H + 1, W + 1

    def kernel(x_ref, wc_ref, bc_ref, wt_ref, bt_ref, o_ref, pad_ref):
        # x_ref:   (1, C, H, W) VMEM
        # wc_ref:  (C,)  SMEM   1x1-conv weights (one scalar per input channel)
        # bc_ref:  (1,)  SMEM   1x1-conv bias
        # wt_ref:  (4,)  SMEM   [k00, k01, k10, k11] of the 2x2 transposed conv
        # bt_ref:  (1,)  SMEM   transposed-conv bias
        # o_ref:   (1, 1, Ho, Wo) VMEM output
        # pad_ref: (rows, cols) VMEM zero canvas holding v1 at (_ROW0, _COL0)

        # ---- zero the canvas (only the 1-wide border around v1 must be zero,
        #      but a full clear is just a handful of vector stores) ----
        pad_ref[...] = jnp.zeros_like(pad_ref)

        # ---- 1x1 conv: VPU broadcast-FMA reduction over the C channels,
        #      directly in (H, W) layout. Four partial accumulators break the
        #      serial add dependency chain. ----
        accs = [jnp.zeros((H, W), jnp.float32) for _ in range(4)]
        for c in range(C):                       # fully unrolled, static indices
            accs[c % 4] = accs[c % 4] + x_ref[0, c, :, :] * wc_ref[c]
        v1 = (accs[0] + accs[1]) + (accs[2] + accs[3]) + bc_ref[0]

        # ---- place v1 into the zero canvas at a tile-aligned offset ----
        pad_ref[_ROW0:_ROW0 + H, _COL0:_COL0 + W] = v1

        # ---- ConvTranspose2d(1, 1, 2, stride=1):
        #      out[i,j] = k00*v1[i,j] + k01*v1[i,j-1]
        #               + k10*v1[i-1,j] + k11*v1[i-1,j-1] + b_t
        #      realised as four shifted reads of the zero-padded canvas. ----
        t00 = pad_ref[_ROW0:_ROW0 + Ho, _COL0:_COL0 + Wo]
        t01 = pad_ref[_ROW0:_ROW0 + Ho, _COL0 - 1:_COL0 - 1 + Wo]
        t10 = pad_ref[_ROW0 - 1:_ROW0 - 1 + Ho, _COL0:_COL0 + Wo]
        t11 = pad_ref[_ROW0 - 1:_ROW0 - 1 + Ho, _COL0 - 1:_COL0 - 1 + Wo]
        v3 = (wt_ref[0] * t00 + wt_ref[1] * t01
              + wt_ref[2] * t10 + wt_ref[3] * t11 + bt_ref[0])

        # ---- leaky relu; 19-wide output -> masked stores (3 vregs, accepted) --
        o_ref[0, 0, :, :] = jnp.where(v3 >= 0.0, v3, v3 * slope)

    return kernel


@functools.partial(jax.jit, static_argnames=("negative_slope",))
def model_forward(x, w_conv, b_conv, w_t, b_t, negative_slope=None):
    """x: (1, C, H, W) f32. Weights follow PyTorch shapes. Returns (1,1,H+1,W+1)."""
    N, C, H, W = x.shape
    assert N == 1, "kernel written for batch=1 (matches the reference module)"

    # Intentionally mirrors the module's `self.negative_slope if self.negative_slope
    # else 0.01` (falsy values, incl. 0.0, fall back to 0.01).
    slope = float(negative_slope) if negative_slope else 0.01

    rows = ((_ROW0 + H + 1 + 7) // 8) * 8          # canvas must cover row _ROW0+H
    cols = ((_COL0 + W + 1 + 127) // 128) * 128    # and column _COL0+W

    kernel = _make_fused_kernel(C, H, W, slope)

    out = pl.pallas_call(
        kernel,
        out_shape=jax.ShapeDtypeStruct((1, 1, H + 1, W + 1), jnp.float32),
        in_specs=[
            pl.BlockSpec(memory_space=pltpu.MemorySpace.VMEM),   # x (1,C,H,W)
            pl.BlockSpec(memory_space=pltpu.MemorySpace.SMEM),   # w_conv (C,)
            pl.BlockSpec(memory_space=pltpu.MemorySpace.SMEM),   # b_conv (1,)
            pl.BlockSpec(memory_space=pltpu.MemorySpace.SMEM),   # w_t    (4,)
            pl.BlockSpec(memory_space=pltpu.MemorySpace.SMEM),   # b_t    (1,)
        ],
        out_specs=pl.BlockSpec(memory_space=pltpu.MemorySpace.VMEM),
        scratch_shapes=[pltpu.VMEM((rows, cols), jnp.float32)],
    )(
        x.astype(jnp.float32),
        w_conv.reshape(C).astype(jnp.float32),
        b_conv.astype(jnp.float32),
        w_t.reshape(4).astype(jnp.float32),
        b_t.astype(jnp.float32),
    )
    return out


def _reference(x, w_conv, b_conv, w_t, b_t, slope=0.01):
    """Independent pure-JAX reference built on lax convolutions (not the kernel's
    shift-MAD formula). ConvTranspose2d(stride=1, padding=0) == full-padding
    correlation with the spatially flipped kernel."""
    v1 = jax.lax.conv_general_dilated(
        x, w_conv, window_strides=(1, 1), padding="VALID",
        dimension_numbers=("NCHW", "OIHW", "NCHW"),
        precision=jax.lax.Precision.HIGHEST,
    ) + b_conv.reshape(1, 1, 1, 1)
    v3 = jax.lax.conv_general_dilated(
        v1, jnp.flip(w_t, axis=(2, 3)), window_strides=(1, 1),
        padding=((1, 1), (1, 1)),
        dimension_numbers=("NCHW", "OIHW", "NCHW"),
        precision=jax.lax.Precision.HIGHEST,
    ) + b_t.reshape(1, 1, 1, 1)
    return jnp.where(v3 >= 0, v3, v3 * slope)


if __name__ == "__main__":
    key = jax.random.PRNGKey(0)
    kx, kw1, kb1, kw2, kb2 = jax.random.split(key, 5)

    N, C, H, W = 1, 123, 18, 18
    x = jax.random.normal(kx, (N, C, H, W), dtype=jnp.float32)

    # Conv2d(123, 1, 1): weight (1, 123, 1, 1), bias (1,)
    w_conv = jax.random.normal(kw1, (1, C, 1, 1), dtype=jnp.float32) * 0.1
    b_conv = jax.random.normal(kb1, (1,), dtype=jnp.float32) * 0.1
    # ConvTranspose2d(1, 1, 2): weight (1, 1, 2, 2), bias (1,)
    w_t = jax.random.normal(kw2, (1, 1, 2, 2), dtype=jnp.float32) * 0.1
    b_t = jax.random.normal(kb2, (1,), dtype=jnp.float32) * 0.1

    out = jax.block_until_ready(model_forward(x, w_conv, b_conv, w_t, b_t))

    ref = _reference(x, w_conv, b_conv, w_t, b_t)
    assert out.shape == (1, 1, H + 1, W + 1), out.shape
    assert jnp.allclose(out, ref, atol=1e-4, rtol=1e-4), "mismatch vs reference"

    print("KERNEL_OK")
</pallas_src>

<mosaic_0001>
module attributes {stable_mosaic.version = 11 : i64} {
  func.func @kernel(%arg0: memref<1x123x18x18xf32, #tpu.memory_space<vmem>>, %arg1: memref<123xf32, #tpu.memory_space<smem>>, %arg2: memref<1xf32, #tpu.memory_space<smem>>, %arg3: memref<4xf32, #tpu.memory_space<smem>>, %arg4: memref<1xf32, #tpu.memory_space<smem>>, %arg5: memref<1x1x19x19xf32, #tpu.memory_space<vmem>>, %arg6: memref<32x256xf32, #tpu.memory_space<vmem>>) attributes {dimension_semantics = [], scalar_prefetch = 0 : i64, scratch_operands = 1 : i64, tpu.core_type = #tpu.core_type<tc>} {
    %cst = arith.constant 0.000000e+00 : f32
    %0 = vector.broadcast %cst : f32 to vector<32x256xf32>
    %c0 = arith.constant 0 : index
    %c0_0 = arith.constant 0 : index
    %1 = vector.load %arg6[%c0, %c0_0] : memref<32x256xf32, #tpu.memory_space<vmem>>, vector<32x256xf32>
    tpu.vector_store %arg6[%c0, %c0_0], %0 {strides = array<i32>} : memref<32x256xf32, #tpu.memory_space<vmem>>, vector<32x256xf32>,
    %cst_1 = arith.constant 0.000000e+00 : f32
    %2 = vector.broadcast %cst_1 : f32 to vector<18x18xf32>
    %cst_2 = arith.constant 0.000000e+00 : f32
    %3 = vector.broadcast %cst_2 : f32 to vector<18x18xf32>
    %cst_3 = arith.constant 0.000000e+00 : f32
    %4 = vector.broadcast %cst_3 : f32 to vector<18x18xf32>
    %cst_4 = arith.constant 0.000000e+00 : f32
    %5 = vector.broadcast %cst_4 : f32 to vector<18x18xf32>
    %c0_5 = arith.constant 0 : index
    %c0_6 = arith.constant 0 : index
    %c0_7 = arith.constant 0 : index
    %c0_8 = arith.constant 0 : index
    %6 = vector.load %arg0[%c0_5, %c0_6, %c0_7, %c0_8] : memref<1x123x18x18xf32, #tpu.memory_space<vmem>>, vector<1x1x18x18xf32>
    %7 = vector.shape_cast %6 : vector<1x1x18x18xf32> to vector<18x18xf32>
    %c0_9 = arith.constant 0 : index
    %8 = memref.load %arg1[%c0_9] : memref<123xf32, #tpu.memory_space<smem>>
    %9 = vector.broadcast %8 : f32 to vector<18x18xf32>
    %10 = arith.mulf %7, %9 : vector<18x18xf32>
    %11 = arith.addf %2, %10 : vector<18x18xf32>
    %c0_10 = arith.constant 0 : index
    %c1 = arith.constant 1 : index
    %c0_11 = arith.constant 0 : index
    %c0_12 = arith.constant 0 : index
    %12 = vector.load %arg0[%c0_10, %c1, %c0_11, %c0_12] : memref<1x123x18x18xf32, #tpu.memory_space<vmem>>, vector<1x1x18x18xf32>
    %13 = vector.shape_cast %12 : vector<1x1x18x18xf32> to vector<18x18xf32>
    %c1_13 = arith.constant 1 : index
    %14 = memref.load %arg1[%c1_13] : memref<123xf32, #tpu.memory_space<smem>>
    %15 = vector.broadcast %14 : f32 to vector<18x18xf32>
    %16 = arith.mulf %13, %15 : vector<18x18xf32>
    %17 = arith.addf %3, %16 : vector<18x18xf32>
    %c0_14 = arith.constant 0 : index
    %c2 = arith.constant 2 : index
    %c0_15 = arith.constant 0 : index
    %c0_16 = arith.constant 0 : index
    %18 = vector.load %arg0[%c0_14, %c2, %c0_15, %c0_16] : memref<1x123x18x18xf32, #tpu.memory_space<vmem>>, vector<1x1x18x18xf32>
    %19 = vector.shape_cast %18 : vector<1x1x18x18xf32> to vector<18x18xf32>
    %c2_17 = arith.constant 2 : index
    %20 = memref.load %arg1[%c2_17] : memref<123xf32, #tpu.memory_space<smem>>
    %21 = vector.broadcast %20 : f32 to vector<18x18xf32>
    %22 = arith.mulf %19, %21 : vector<18x18xf32>
    %23 = arith.addf %4, %22 : vector<18x18xf32>
    %c0_18 = arith.constant 0 : index
    %c3 = arith.constant 3 : index
    %c0_19 = arith.constant 0 : index
    %c0_20 = arith.constant 0 : index
    %24 = vector.load %arg0[%c0_18, %c3, %c0_19, %c0_20] : memref<1x123x18x18xf32, #tpu.memory_space<vmem>>, vector<1x1x18x18xf32>
    %25 = vector.shape_cast %24 : vector<1x1x18x18xf32> to vector<18x18xf32>
    %c3_21 = arith.constant 3 : index
    %26 = memref.load %arg1[%c3_21] : memref<123xf32, #tpu.memory_space<smem>>
    %27 = vector.broadcast %26 : f32 to vector<18x18xf32>
    %28 = arith.mulf %25, %27 : vector<18x18xf32>
    %29 = arith.addf %5, %28 : vector<18x18xf32>
    %c0_22 = arith.constant 0 : index
    %c4 = arith.constant 4 : index
    %c0_23 = arith.constant 0 : index
    %c0_24 = arith.constant 0 : index
    %30 = vector.load %arg0[%c0_22, %c4, %c0_23, %c0_24] : memref<1x123x18x18xf32, #tpu.memory_space<vmem>>, vector<1x1x18x18xf32>
    %31 = vector.shape_cast %30 : vector<1x1x18x18xf32> to vector<18x18xf32>
    %c4_25 = arith.constant 4 : index
    %32 = memref.load %arg1[%c4_25] : memref<123xf32, #tpu.memory_space<smem>>
    %33 = vector.broadcast %32 : f32 to vector<18x18xf32>
    %34 = arith.mulf %31, %33 : vector<18x18xf32>
    %35 = arith.addf %11, %34 : vector<18x18xf32>
    %c0_26 = arith.constant 0 : index
    %c5 = arith.constant 5 : index
    %c0_27 = arith.constant 0 : index
    %c0_28 = arith.constant 0 : index
    %36 = vector.load %arg0[%c0_26, %c5, %c0_27, %c0_28] : memref<1x123x18x18xf32, #tpu.memory_space<vmem>>, vector<1x1x18x18xf32>
    %37 = vector.shape_cast %36 : vector<1x1x18x18xf32> to vector<18x18xf32>
    %c5_29 = arith.constant 5 : index
    %38 = memref.load %arg1[%c5_29] : memref<123xf32, #tpu.memory_space<smem>>
    %39 = vector.broadcast %38 : f32 to vector<18x18xf32>
    %40 = arith.mulf %37, %39 : vector<18x18xf32>
    %41 = arith.addf %17, %40 : vector<18x18xf32>
    %c0_30 = arith.constant 0 : index
    %c6 = arith.constant 6 : index
    %c0_31 = arith.constant 0 : index
    %c0_32 = arith.constant 0 : index
    %42 = vector.load %arg0[%c0_30, %c6, %c0_31, %c0_32] : memref<1x123x18x18xf32, #tpu.memory_space<vmem>>, vector<1x1x18x18xf32>
    %43 = vector.shape_cast %42 : vector<1x1x18x18xf32> to vector<18x18xf32>
    %c6_33 = arith.constant 6 : index
    %44 = memref.load %arg1[%c6_33] : memref<123xf32, #tpu.memory_space<smem>>
    %45 = vector.broadcast %44 : f32 to vector<18x18xf32>
    %46 = arith.mulf %43, %45 : vector<18x18xf32>
    %47 = arith.addf %23, %46 : vector<18x18xf32>
    %c0_34 = arith.constant 0 : index
    %c7 = arith.constant 7 : index
    %c0_35 = arith.constant 0 : index
    %c0_36 = arith.constant 0 : index
    %48 = vector.load %arg0[%c0_34, %c7, %c0_35, %c0_36] : memref<1x123x18x18xf32, #tpu.memory_space<vmem>>, vector<1x1x18x18xf32>
    %49 = vector.shape_cast %48 : vector<1x1x18x18xf32> to vector<18x18xf32>
    %c7_37 = arith.constant 7 : index
    %50 = memref.load %arg1[%c7_37] : memref<123xf32, #tpu.memory_space<smem>>
    %51 = vector.broadcast %50 : f32 to vector<18x18xf32>
    %52 = arith.mulf %49, %51 : vector<18x18xf32>
    %53 = arith.addf %29, %52 : vector<18x18xf32>
    %c0_38 = arith.constant 0 : index
    %c8 = arith.constant 8 : index
    %c0_39 = arith.constant 0 : index
    %c0_40 = arith.constant 0 : index
    %54 = vector.load %arg0[%c0_38, %c8, %c0_39, %c0_40] : memref<1x123x18x18xf32, #tpu.memory_space<vmem>>, vector<1x1x18x18xf32>
    %55 = vector.shape_cast %54 : vector<1x1x18x18xf32> to vector<18x18xf32>
    %c8_41 = arith.constant 8 : index
    %56 = memref.load %arg1[%c8_41] : memref<123xf32, #tpu.memory_space<smem>>
    %57 = vector.broadcast %56 : f32 to vector<18x18xf32>
    %58 = arith.mulf %55, %57 : vector<18x18xf32>
    %59 = arith.addf %35, %58 : vector<18x18xf32>
    %c0_42 = arith.constant 0 : index
    %c9 = arith.constant 9 : index
    %c0_43 = arith.constant 0 : index
    %c0_44 = arith.constant 0 : index
    %60 = vector.load %arg0[%c0_42, %c9, %c0_43, %c0_44] : memref<1x123x18x18xf32, #tpu.memory_space<vmem>>, vector<1x1x18x18xf32>
    %61 = vector.shape_cast %60 : vector<1x1x18x18xf32> to vector<18x18xf32>
    %c9_45 = arith.constant 9 : index
    %62 = memref.load %arg1[%c9_45] : memref<123xf32, #tpu.memory_space<smem>>
    %63 = vector.broadcast %62 : f32 to vector<18x18xf32>
    %64 = arith.mulf %61, %63 : vector<18x18xf32>
    %65 = arith.addf %41, %64 : vector<18x18xf32>
    %c0_46 = arith.constant 0 : index
    %c10 = arith.constant 10 : index
    %c0_47 = arith.constant 0 : index
    %c0_48 = arith.constant 0 : index
    %66 = vector.load %arg0[%c0_46, %c10, %c0_47, %c0_48] : memref<1x123x18x18xf32, #tpu.memory_space<vmem>>, vector<1x1x18x18xf32>
    %67 = vector.shape_cast %66 : vector<1x1x18x18xf32> to vector<18x18xf32>
    %c10_49 = arith.constant 10 : index
    %68 = memref.load %arg1[%c10_49] : memref<123xf32, #tpu.memory_space<smem>>
    %69 = vector.broadcast %68 : f32 to vector<18x18xf32>
    %70 = arith.mulf %67, %69 : vector<18x18xf32>
    %71 = arith.addf %47, %70 : vector<18x18xf32>
    %c0_50 = arith.constant 0 : index
    %c11 = arith.constant 11 : index
    %c0_51 = arith.constant 0 : index
    %c0_52 = arith.constant 0 : index
    %72 = vector.load %arg0[%c0_50, %c11, %c0_51, %c0_52] : memref<1x123x18x18xf32, #tpu.memory_space<vmem>>, vector<1x1x18x18xf32>
    %73 = vector.shape_cast %72 : vector<1x1x18x18xf32> to vector<18x18xf32>
    %c11_53 = arith.constant 11 : index
    %74 = memref.load %arg1[%c11_53] : memref<123xf32, #tpu.memory_space<smem>>
    %75 = vector.broadcast %74 : f32 to vector<18x18xf32>
    %76 = arith.mulf %73, %75 : vector<18x18xf32>
    %77 = arith.addf %53, %76 : vector<18x18xf32>
    %c0_54 = arith.constant 0 : index
    %c12 = arith.constant 12 : index
    %c0_55 = arith.constant 0 : index
    %c0_56 = arith.constant 0 : index
    %78 = vector.load %arg0[%c0_54, %c12, %c0_55, %c0_56] : memref<1x123x18x18xf32, #tpu.memory_space<vmem>>, vector<1x1x18x18xf32>
    %79 = vector.shape_cast %78 : vector<1x1x18x18xf32> to vector<18x18xf32>
    %c12_57 = arith.constant 12 : index
    %80 = memref.load %arg1[%c12_57] : memref<123xf32, #tpu.memory_space<smem>>
    %81 = vector.broadcast %80 : f32 to vector<18x18xf32>
    %82 = arith.mulf %79, %81 : vector<18x18xf32>
    %83 = arith.addf %59, %82 : vector<18x18xf32>
    %c0_58 = arith.constant 0 : index
    %c13 = arith.constant 13 : index
    %c0_59 = arith.constant 0 : index
    %c0_60 = arith.constant 0 : index
    %84 = vector.load %arg0[%c0_58, %c13, %c0_59, %c0_60] : memref<1x123x18x18xf32, #tpu.memory_space<vmem>>, vector<1x1x18x18xf32>
    %85 = vector.shape_cast %84 : vector<1x1x18x18xf32> to vector<18x18xf32>
    %c13_61 = arith.constant 13 : index
    %86 = memref.load %arg1[%c13_61] : memref<123xf32, #tpu.memory_space<smem>>
    %87 = vector.broadcast %86 : f32 to vector<18x18xf32>
    %88 = arith.mulf %85, %87 : vector<18x18xf32>
    %89 = arith.addf %65, %88 : vector<18x18xf32>
    %c0_62 = arith.constant 0 : index
    %c14 = arith.constant 14 : index
    %c0_63 = arith.constant 0 : index
    %c0_64 = arith.constant 0 : index
    %90 = vector.load %arg0[%c0_62, %c14, %c0_63, %c0_64] : memref<1x123x18x18xf32, #tpu.memory_space<vmem>>, vector<1x1x18x18xf32>
    %91 = vector.shape_cast %90 : vector<1x1x18x18xf32> to vector<18x18xf32>
    %c14_65 = arith.constant 14 : index
    %92 = memref.load %arg1[%c14_65] : memref<123xf32, #tpu.memory_space<smem>>
    %93 = vector.broadcast %92 : f32 to vector<18x18xf32>
    %94 = arith.mulf %91, %93 : vector<18x18xf32>
    %95 = arith.addf %71, %94 : vector<18x18xf32>
    %c0_66 = arith.constant 0 : index
    %c15 = arith.constant 15 : index
    %c0_67 = arith.constant 0 : index
    %c0_68 = arith.constant 0 : index
    %96 = vector.load %arg0[%c0_66, %c15, %c0_67, %c0_68] : memref<1x123x18x18xf32, #tpu.memory_space<vmem>>, vector<1x1x18x18xf32>
    %97 = vector.shape_cast %96 : vector<1x1x18x18xf32> to vector<18x18xf32>
    %c15_69 = arith.constant 15 : index
    %98 = memref.load %arg1[%c15_69] : memref<123xf32, #tpu.memory_space<smem>>
    %99 = vector.broadcast %98 : f32 to vector<18x18xf32>
    %100 = arith.mulf %97, %99 : vector<18x18xf32>
    %101 = arith.addf %77, %100 : vector<18x18xf32>
    %c0_70 = arith.constant 0 : index
    %c16 = arith.constant 16 : index
    %c0_71 = arith.constant 0 : index
    %c0_72 = arith.constant 0 : index
    %102 = vector.load %arg0[%c0_70, %c16, %c0_71, %c0_72] : memref<1x123x18x18xf32, #tpu.memory_space<vmem>>, vector<1x1x18x18xf32>
    %103 = vector.shape_cast %102 : vector<1x1x18x18xf32> to vector<18x18xf32>
    %c16_73 = arith.constant 16 : index
    %104 = memref.load %arg1[%c16_73] : memref<123xf32, #tpu.memory_space<smem>>
    %105 = vector.broadcast %104 : f32 to vector<18x18xf32>
    %106 = arith.mulf %103, %105 : vector<18x18xf32>
    %107 = arith.addf %83, %106 : vector<18x18xf32>
    %c0_74 = arith.constant 0 : index
    %c17 = arith.constant 17 : index
    %c0_75 = arith.constant 0 : index
    %c0_76 = arith.constant 0 : index
    %108 = vector.load %arg0[%c0_74, %c17, %c0_75, %c0_76] : memref<1x123x18x18xf32, #tpu.memory_space<vmem>>, vector<1x1x18x18xf32>
    %109 = vector.shape_cast %108 : vector<1x1x18x18xf32> to vector<18x18xf32>
    %c17_77 = arith.constant 17 : index
    %110 = memref.load %arg1[%c17_77] : memref<123xf32, #tpu.memory_space<smem>>
    %111 = vector.broadcast %110 : f32 to vector<18x18xf32>
    %112 = arith.mulf %109, %111 : vector<18x18xf32>
    %113 = arith.addf %89, %112 : vector<18x18xf32>
    %c0_78 = arith.constant 0 : index
    %c18 = arith.constant 18 : index
    %c0_79 = arith.constant 0 : index
    %c0_80 = arith.constant 0 : index
    %114 = vector.load %arg0[%c0_78, %c18, %c0_79, %c0_80] : memref<1x123x18x18xf32, #tpu.memory_space<vmem>>, vector<1x1x18x18xf32>
    %115 = vector.shape_cast %114 : vector<1x1x18x18xf32> to vector<18x18xf32>
    %c18_81 = arith.constant 18 : index
    %116 = memref.load %arg1[%c18_81] : memref<123xf32, #tpu.memory_space<smem>>
    %117 = vector.broadcast %116 : f32 to vector<18x18xf32>
    %118 = arith.mulf %115, %117 : vector<18x18xf32>
    %119 = arith.addf %95, %118 : vector<18x18xf32>
    %c0_82 = arith.constant 0 : index
    %c19 = arith.constant 19 : index
    %c0_83 = arith.constant 0 : index
    %c0_84 = arith.constant 0 : index
    %120 = vector.load %arg0[%c0_82, %c19, %c0_83, %c0_84] : memref<1x123x18x18xf32, #tpu.memory_space<vmem>>, vector<1x1x18x18xf32>
    %121 = vector.shape_cast %120 : vector<1x1x18x18xf32> to vector<18x18xf32>
    %c19_85 = arith.constant 19 : index
    %122 = memref.load %arg1[%c19_85] : memref<123xf32, #tpu.memory_space<smem>>
    %123 = vector.broadcast %122 : f32 to vector<18x18xf32>
    %124 = arith.mulf %121, %123 : vector<18x18xf32>
    %125 = arith.addf %101, %124 : vector<18x18xf32>
    %c0_86 = arith.constant 0 : index
    %c20 = arith.constant 20 : index
    %c0_87 = arith.constant 0 : index
    %c0_88 = arith.constant 0 : index
    %126 = vector.load %arg0[%c0_86, %c20, %c0_87, %c0_88] : memref<1x123x18x18xf32, #tpu.memory_space<vmem>>, vector<1x1x18x18xf32>
    %127 = vector.shape_cast %126 : vector<1x1x18x18xf32> to vector<18x18xf32>
    %c20_89 = arith.constant 20 : index
    %128 = memref.load %arg1[%c20_89] : memref<123xf32, #tpu.memory_space<smem>>
    %129 = vector.broadcast %128 : f32 to vector<18x18xf32>
    %130 = arith.mulf %127, %129 : vector<18x18xf32>
    %131 = arith.addf %107, %130 : vector<18x18xf32>
    %c0_90 = arith.constant 0 : index
    %c21 = arith.constant 21 : index
    %c0_91 = arith.constant 0 : index
    %c0_92 = arith.constant 0 : index
    %132 = vector.load %arg0[%c0_90, %c21, %c0_91, %c0_92] : memref<1x123x18x18xf32, #tpu.memory_space<vmem>>, vector<1x1x18x18xf32>
    %133 = vector.shape_cast %132 : vector<1x1x18x18xf32> to vector<18x18xf32>
    %c21_93 = arith.constant 21 : index
    %134 = memref.load %arg1[%c21_93] : memref<123xf32, #tpu.memory_space<smem>>
    %135 = vector.broadcast %134 : f32 to vector<18x18xf32>
    %136 = arith.mulf %133, %135 : vector<18x18xf32>
    %137 = arith.addf %113, %136 : vector<18x18xf32>
    %c0_94 = arith.constant 0 : index
    %c22 = arith.constant 22 : index
    %c0_95 = arith.constant 0 : index
    %c0_96 = arith.constant 0 : index
    %138 = vector.load %arg0[%c0_94, %c22, %c0_95, %c0_96] : memref<1x123x18x18xf32, #tpu.memory_space<vmem>>, vector<1x1x18x18xf32>
    %139 = vector.shape_cast %138 : vector<1x1x18x18xf32> to vector<18x18xf32>
    %c22_97 = arith.constant 22 : index
    %140 = memref.load %arg1[%c22_97] : memref<123xf32, #tpu.memory_space<smem>>
    %141 = vector.broadcast %140 : f32 to vector<18x18xf32>
    %142 = arith.mulf %139, %141 : vector<18x18xf32>
    %143 = arith.addf %119, %142 : vector<18x18xf32>
    %c0_98 = arith.constant 0 : index
    %c23 = arith.constant 23 : index
    %c0_99 = arith.constant 0 : index
    %c0_100 = arith.constant 0 : index
    %144 = vector.load %arg0[%c0_98, %c23, %c0_99, %c0_100] : memref<1x123x18x18xf32, #tpu.memory_space<vmem>>, vector<1x1x18x18xf32>
    %145 = vector.shape_cast %144 : vector<1x1x18x18xf32> to vector<18x18xf32>
    %c23_101 = arith.constant 23 : index
    %146 = memref.load %arg1[%c23_101] : memref<123xf32, #tpu.memory_space<smem>>
    %147 = vector.broadcast %146 : f32 to vector<18x18xf32>
    %148 = arith.mulf %145, %147 : vector<18x18xf32>
    %149 = arith.addf %125, %148 : vector<18x18xf32>
    %c0_102 = arith.constant 0 : index
    %c24 = arith.constant 24 : index
    %c0_103 = arith.constant 0 : index
    %c0_104 = arith.constant 0 : index
    %150 = vector.load %arg0[%c0_102, %c24, %c0_103, %c0_104] : memref<1x123x18x18xf32, #tpu.memory_space<vmem>>, vector<1x1x18x18xf32>
    %151 = vector.shape_cast %150 : vector<1x1x18x18xf32> to vector<18x18xf32>
    %c24_105 = arith.constant 24 : index
    %152 = memref.load %arg1[%c24_105] : memref<123xf32, #tpu.memory_space<smem>>
    %153 = vector.broadcast %152 : f32 to vector<18x18xf32>
    %154 = arith.mulf %151, %153 : vector<18x18xf32>
    %155 = arith.addf %131, %154 : vector<18x18xf32>
    %c0_106 = arith.constant 0 : index
    %c25 = arith.constant 25 : index
    %c0_107 = arith.constant 0 : index
    %c0_108 = arith.constant 0 : index
    %156 = vector.load %arg0[%c0_106, %c25, %c0_107, %c0_108] : memref<1x123x18x18xf32, #tpu.memory_space<vmem>>, vector<1x1x18x18xf32>
    %157 = vector.shape_cast %156 : vector<1x1x18x18xf32> to vector<18x18xf32>
    %c25_109 = arith.constant 25 : index
    %158 = memref.load %arg1[%c25_109] : memref<123xf32, #tpu.memory_space<smem>>
    %159 = vector.broadcast %158 : f32 to vector<18x18xf32>
    %160 = arith.mulf %157, %159 : vector<18x18xf32>
    %161 = arith.addf %137, %160 : vector<18x18xf32>
    %c0_110 = arith.constant 0 : index
    %c26 = arith.constant 26 : index
    %c0_111 = arith.constant 0 : index
    %c0_112 = arith.constant 0 : index
    %162 = vector.load %arg0[%c0_110, %c26, %c0_111, %c0_112] : memref<1x123x18x18xf32, #tpu.memory_space<vmem>>, vector<1x1x18x18xf32>
    %163 = vector.shape_cast %162 : vector<1x1x18x18xf32> to vector<18x18xf32>
    %c26_113 = arith.constant 26 : index
    %164 = memref.load %arg1[%c26_113] : memref<123xf32, #tpu.memory_space<smem>>
    %165 = vector.broadcast %164 : f32 to vector<18x18xf32>
    %166 = arith.mulf %163, %165 : vector<18x18xf32>
    %167 = arith.addf %143, %166 : vector<18x18xf32>
    %c0_114 = arith.constant 0 : index
    %c27 = arith.constant 27 : index
    %c0_115 = arith.constant 0 : index
    %c0_116 = arith.constant 0 : index
    %168 = vector.load %arg0[%c0_114, %c27, %c0_115, %c0_116] : memref<1x123x18x18xf32, #tpu.memory_space<vmem>>, vector<1x1x18x18xf32>
    %169 = vector.shape_cast %168 : vector<1x1x18x18xf32> to vector<18x18xf32>
    %c27_117 = arith.constant 27 : index
    %170 = memref.load %arg1[%c27_117] : memref<123xf32, #tpu.memory_space<smem>>
    %171 = vector.broadcast %170 : f32 to vector<18x18xf32>
    %172 = arith.mulf %169, %171 : vector<18x18xf32>
    %173 = arith.addf %149, %172 : vector<18x18xf32>
    %c0_118 = arith.constant 0 : index
    %c28 = arith.constant 28 : index
    %c0_119 = arith.constant 0 : index
    %c0_120 = arith.constant 0 : index
    %174 = vector.load %arg0[%c0_118, %c28, %c0_119, %c0_120] : memref<1x123x18x18xf32, #tpu.memory_space<vmem>>, vector<1x1x18x18xf32>
    %175 = vector.shape_cast %174 : vector<1x1x18x18xf32> to vector<18x18xf32>
    %c28_121 = arith.constant 28 : index
    %176 = memref.load %arg1[%c28_121] : memref<123xf32, #tpu.memory_space<smem>>
    %177 = vector.broadcast %176 : f32 to vector<18x18xf32>
    %178 = arith.mulf %175, %177 : vector<18x18xf32>
    %179 = arith.addf %155, %178 : vector<18x18xf32>
    %c0_122 = arith.constant 0 : index
    %c29 = arith.constant 29 : index
    %c0_123 = arith.constant 0 : index
    %c0_124 = arith.constant 0 : index
    %180 = vector.load %arg0[%c0_122, %c29, %c0_123, %c0_124] : memref<1x123x18x18xf32, #tpu.memory_space<vmem>>, vector<1x1x18x18xf32>
    %181 = vector.shape_cast %180 : vector<1x1x18x18xf32> to vector<18x18xf32>
    %c29_125 = arith.constant 29 : index
    %182 = memref.load %arg1[%c29_125] : memref<123xf32, #tpu.memory_space<smem>>
    %183 = vector.broadcast %182 : f32 to vector<18x18xf32>
    %184 = arith.mulf %181, %183 : vector<18x18xf32>
    %185 = arith.addf %161, %184 : vector<18x18xf32>
    %c0_126 = arith.constant 0 : index
    %c30 = arith.constant 30 : index
    %c0_127 = arith.constant 0 : index
    %c0_128 = arith.constant 0 : index
    %186 = vector.load %arg0[%c0_126, %c30, %c0_127, %c0_128] : memref<1x123x18x18xf32, #tpu.memory_space<vmem>>, vector<1x1x18x18xf32>
    %187 = vector.shape_cast %186 : vector<1x1x18x18xf32> to vector<18x18xf32>
    %c30_129 = arith.constant 30 : index
    %188 = memref.load %arg1[%c30_129] : memref<123xf32, #tpu.memory_space<smem>>
    %189 = vector.broadcast %188 : f32 to vector<18x18xf32>
    %190 = arith.mulf %187, %189 : vector<18x18xf32>
    %191 = arith.addf %167, %190 : vector<18x18xf32>
    %c0_130 = arith.constant 0 : index
    %c31 = arith.constant 31 : index
    %c0_131 = arith.constant 0 : index
    %c0_132 = arith.constant 0 : index
    %192 = vector.load %arg0[%c0_130, %c31, %c0_131, %c0_132] : memref<1x123x18x18xf32, #tpu.memory_space<vmem>>, vector<1x1x18x18xf32>
    %193 = vector.shape_cast %192 : vector<1x1x18x18xf32> to vector<18x18xf32>
    %c31_133 = arith.constant 31 : index
    %194 = memref.load %arg1[%c31_133] : memref<123xf32, #tpu.memory_space<smem>>
    %195 = vector.broadcast %194 : f32 to vector<18x18xf32>
    %196 = arith.mulf %193, %195 : vector<18x18xf32>
    %197 = arith.addf %173, %196 : vector<18x18xf32>
    %c0_134 = arith.constant 0 : index
    %c32 = arith.constant 32 : index
    %c0_135 = arith.constant 0 : index
    %c0_136 = arith.constant 0 : index
    %198 = vector.load %arg0[%c0_134, %c32, %c0_135, %c0_136] : memref<1x123x18x18xf32, #tpu.memory_space<vmem>>, vector<1x1x18x18xf32>
    %199 = vector.shape_cast %198 : vector<1x1x18x18xf32> to vector<18x18xf32>
    %c32_137 = arith.constant 32 : index
    %200 = memref.load %arg1[%c32_137] : memref<123xf32, #tpu.memory_space<smem>>
    %201 = vector.broadcast %200 : f32 to vector<18x18xf32>
    %202 = arith.mulf %199, %201 : vector<18x18xf32>
    %203 = arith.addf %179, %202 : vector<18x18xf32>
    %c0_138 = arith.constant 0 : index
    %c33 = arith.constant 33 : index
    %c0_139 = arith.constant 0 : index
    %c0_140 = arith.constant 0 : index
    %204 = vector.load %arg0[%c0_138, %c33, %c0_139, %c0_140] : memref<1x123x18x18xf32, #tpu.memory_space<vmem>>, vector<1x1x18x18xf32>
    %205 = vector.shape_cast %204 : vector<1x1x18x18xf32> to vector<18x18xf32>
    %c33_141 = arith.constant 33 : index
    %206 = memref.load %arg1[%c33_141] : memref<123xf32, #tpu.memory_space<smem>>
    %207 = vector.broadcast %206 : f32 to vector<18x18xf32>
    %208 = arith.mulf %205, %207 : vector<18x18xf32>
    %209 = arith.addf %185, %208 : vector<18x18xf32>
    %c0_142 = arith.constant 0 : index
    %c34 = arith.constant 34 : index
    %c0_143 = arith.constant 0 : index
    %c0_144 = arith.constant 0 : index
    %210 = vector.load %arg0[%c0_142, %c34, %c0_143, %c0_144] : memref<1x123x18x18xf32, #tpu.memory_space<vmem>>, vector<1x1x18x18xf32>
    %211 = vector.shape_cast %210 : vector<1x1x18x18xf32> to vector<18x18xf32>
    %c34_145 = arith.constant 34 : index
    %212 = memref.load %arg1[%c34_145] : memref<123xf32, #tpu.memory_space<smem>>
    %213 = vector.broadcast %212 : f32 to vector<18x18xf32>
    %214 = arith.mulf %211, %213 : vector<18x18xf32>
    %215 = arith.addf %191, %214 : vector<18x18xf32>
    %c0_146 = arith.constant 0 : index
    %c35 = arith.constant 35 : index
    %c0_147 = arith.constant 0 : index
    %c0_148 = arith.constant 0 : index
    %216 = vector.load %arg0[%c0_146, %c35, %c0_147, %c0_148] : memref<1x123x18x18xf32, #tpu.memory_space<vmem>>, vector<1x1x18x18xf32>
    %217 = vector.shape_cast %216 : vector<1x1x18x18xf32> to vector<18x18xf32>
    %c35_149 = arith.constant 35 : index
    %218 = memref.load %arg1[%c35_149] : memref<123xf32, #tpu.memory_space<smem>>
    %219 = vector.broadcast %218 : f32 to vector<18x18xf32>
    %220 = arith.mulf %217, %219 : vector<18x18xf32>
    %221 = arith.addf %197, %220 : vector<18x18xf32>
    %c0_150 = arith.constant 0 : index
    %c36 = arith.constant 36 : index
    %c0_151 = arith.constant 0 : index
    %c0_152 = arith.constant 0 : index
    %222 = vector.load %arg0[%c0_150, %c36, %c0_151, %c0_152] : memref<1x123x18x18xf32, #tpu.memory_space<vmem>>, vector<1x1x18x18xf32>
    %223 = vector.shape_cast %222 : vector<1x1x18x18xf32> to vector<18x18xf32>
    %c36_153 = arith.constant 36 : index
    %224 = memref.load %arg1[%c36_153] : memref<123xf32, #tpu.memory_space<smem>>
    %225 = vector.broadcast %224 : f32 to vector<18x18xf32>
    %226 = arith.mulf %223, %225 : vector<18x18xf32>
    %227 = arith.addf %203, %226 : vector<18x18xf32>
    %c0_154 = arith.constant 0 : index
    %c37 = arith.constant 37 : index
    %c0_155 = arith.constant 0 : index
    %c0_156 = arith.constant 0 : index
    %228 = vector.load %arg0[%c0_154, %c37, %c0_155, %c0_156] : memref<1x123x18x18xf32, #tpu.memory_space<vmem>>, vector<1x1x18x18xf32>
    %229 = vector.shape_cast %228 : vector<1x1x18x18xf32> to vector<18x18xf32>
    %c37_157 = arith.constant 37 : index
    %230 = memref.load %arg1[%c37_157] : memref<123xf32, #tpu.memory_space<smem>>
    %231 = vector.broadcast %230 : f32 to vector<18x18xf32>
    %232 = arith.mulf %229, %231 : vector<18x18xf32>
    %233 = arith.addf %209, %232 : vector<18x18xf32>
    %c0_158 = arith.constant 0 : index
    %c38 = arith.constant 38 : index
    %c0_159 = arith.constant 0 : index
    %c0_160 = arith.constant 0 : index
    %234 = vector.load %arg0[%c0_158, %c38, %c0_159, %c0_160] : memref<1x123x18x18xf32, #tpu.memory_space<vmem>>, vector<1x1x18x18xf32>
    %235 = vector.shape_cast %234 : vector<1x1x18x18xf32> to vector<18x18xf32>
    %c38_161 = arith.constant 38 : index
    %236 = memref.load %arg1[%c38_161] : memref<123xf32, #tpu.memory_space<smem>>
    %237 = vector.broadcast %236 : f32 to vector<18x18xf32>
    %238 = arith.mulf %235, %237 : vector<18x18xf32>
    %239 = arith.addf %215, %238 : vector<18x18xf32>
    %c0_162 = arith.constant 0 : index
    %c39 = arith.constant 39 : index
    %c0_163 = arith.constant 0 : index
    %c0_164 = arith.constant 0 : index
    %240 = vector.load %arg0[%c0_162, %c39, %c0_163, %c0_164] : memref<1x123x18x18xf32, #tpu.memory_space<vmem>>, vector<1x1x18x18xf32>
    %241 = vector.shape_cast %240 : vector<1x1x18x18xf32> to vector<18x18xf32>
    %c39_165 = arith.constant 39 : index
    %242 = memref.load %arg1[%c39_165] : memref<123xf32, #tpu.memory_space<smem>>
    %243 = vector.broadcast %242 : f32 to vector<18x18xf32>
    %244 = arith.mulf %241, %243 : vector<18x18xf32>
    %245 = arith.addf %221, %244 : vector<18x18xf32>
    %c0_166 = arith.constant 0 : index
    %c40 = arith.constant 40 : index
    %c0_167 = arith.constant 0 : index
    %c0_168 = arith.constant 0 : index
    %246 = vector.load %arg0[%c0_166, %c40, %c0_167, %c0_168] : memref<1x123x18x18xf32, #tpu.memory_space<vmem>>, vector<1x1x18x18xf32>
    %247 = vector.shape_cast %246 : vector<1x1x18x18xf32> to vector<18x18xf32>
    %c40_169 = arith.constant 40 : index
    %248 = memref.load %arg1[%c40_169] : memref<123xf32, #tpu.memory_space<smem>>
    %249 = vector.broadcast %248 : f32 to vector<18x18xf32>
    %250 = arith.mulf %247, %249 : vector<18x18xf32>
    %251 = arith.addf %227, %250 : vector<18x18xf32>
    %c0_170 = arith.constant 0 : index
    %c41 = arith.constant 41 : index
    %c0_171 = arith.constant 0 : index
    %c0_172 = arith.constant 0 : index
    %252 = vector.load %arg0[%c0_170, %c41, %c0_171, %c0_172] : memref<1x123x18x18xf32, #tpu.memory_space<vmem>>, vector<1x1x18x18xf32>
    %253 = vector.shape_cast %252 : vector<1x1x18x18xf32> to vector<18x18xf32>
    %c41_173 = arith.constant 41 : index
    %254 = memref.load %arg1[%c41_173] : memref<123xf32, #tpu.memory_space<smem>>
    %255 = vector.broadcast %254 : f32 to vector<18x18xf32>
    %256 = arith.mulf %253, %255 : vector<18x18xf32>
    %257 = arith.addf %233, %256 : vector<18x18xf32>
    %c0_174 = arith.constant 0 : index
    %c42 = arith.constant 42 : index
    %c0_175 = arith.constant 0 : index
    %c0_176 = arith.constant 0 : index
    %258 = vector.load %arg0[%c0_174, %c42, %c0_175, %c0_176] : memref<1x123x18x18xf32, #tpu.memory_space<vmem>>, vector<1x1x18x18xf32>
    %259 = vector.shape_cast %258 : vector<1x1x18x18xf32> to vector<18x18xf32>
    %c42_177 = arith.constant 42 : index
    %260 = memref.load %arg1[%c42_177] : memref<123xf32, #tpu.memory_space<smem>>
    %261 = vector.broadcast %260 : f32 to vector<18x18xf32>
    %262 = arith.mulf %259, %261 : vector<18x18xf32>
    %263 = arith.addf %239, %262 : vector<18x18xf32>
    %c0_178 = arith.constant 0 : index
    %c43 = arith.constant 43 : index
    %c0_179 = arith.constant 0 : index
    %c0_180 = arith.constant 0 : index
    %264 = vector.load %arg0[%c0_178, %c43, %c0_179, %c0_180] : memref<1x123x18x18xf32, #tpu.memory_space<vmem>>, vector<1x1x18x18xf32>
    %265 = vector.shape_cast %264 : vector<1x1x18x18xf32> to vector<18x18xf32>
    %c43_181 = arith.constant 43 : index
    %266 = memref.load %arg1[%c43_181] : memref<123xf32, #tpu.memory_space<smem>>
    %267 = vector.broadcast %266 : f32 to vector<18x18xf32>
    %268 = arith.mulf %265, %267 : vector<18x18xf32>
    %269 = arith.addf %245, %268 : vector<18x18xf32>
    %c0_182 = arith.constant 0 : index
    %c44 = arith.constant 44 : index
    %c0_183 = arith.constant 0 : index
    %c0_184 = arith.constant 0 : index
    %270 = vector.load %arg0[%c0_182, %c44, %c0_183, %c0_184] : memref<1x123x18x18xf32, #tpu.memory_space<vmem>>, vector<1x1x18x18xf32>
    %271 = vector.shape_cast %270 : vector<1x1x18x18xf32> to vector<18x18xf32>
    %c44_185 = arith.constant 44 : index
    %272 = memref.load %arg1[%c44_185] : memref<123xf32, #tpu.memory_space<smem>>
    %273 = vector.broadcast %272 : f32 to vector<18x18xf32>
    %274 = arith.mulf %271, %273 : vector<18x18xf32>
    %275 = arith.addf %251, %274 : vector<18x18xf32>
    %c0_186 = arith.constant 0 : index
    %c45 = arith.constant 45 : index
    %c0_187 = arith.constant 0 : index
    %c0_188 = arith.constant 0 : index
    %276 = vector.load %arg0[%c0_186, %c45, %c0_187, %c0_188] : memref<1x123x18x18xf32, #tpu.memory_space<vmem>>, vector<1x1x18x18xf32>
    %277 = vector.shape_cast %276 : vector<1x1x18x18xf32> to vector<18x18xf32>
    %c45_189 = arith.constant 45 : index
    %278 = memref.load %arg1[%c45_189] : memref<123xf32, #tpu.memory_space<smem>>
    %279 = vector.broadcast %278 : f32 to vector<18x18xf32>
    %280 = arith.mulf %277, %279 : vector<18x18xf32>
    %281 = arith.addf %257, %280 : vector<18x18xf32>
    %c0_190 = arith.constant 0 : index
    %c46 = arith.constant 46 : index
    %c0_191 = arith.constant 0 : index
    %c0_192 = arith.constant 0 : index
    %282 = vector.load %arg0[%c0_190, %c46, %c0_191, %c0_192] : memref<1x123x18x18xf32, #tpu.memory_space<vmem>>, vector<1x1x18x18xf32>
    %283 = vector.shape_cast %282 : vector<1x1x18x18xf32> to vector<18x18xf32>
    %c46_193 = arith.constant 46 : index
    %284 = memref.load %arg1[%c46_193] : memref<123xf32, #tpu.memory_space<smem>>
    %285 = vector.broadcast %284 : f32 to vector<18x18xf32>
    %286 = arith.mulf %283, %285 : vector<18x18xf32>
    %287 = arith.addf %263, %286 : vector<18x18xf32>
    %c0_194 = arith.constant 0 : index
    %c47 = arith.constant 47 : index
    %c0_195 = arith.constant 0 : index
    %c0_196 = arith.constant 0 : index
    %288 = vector.load %arg0[%c0_194, %c47, %c0_195, %c0_196] : memref<1x123x18x18xf32, #tpu.memory_space<vmem>>, vector<1x1x18x18xf32>
    %289 = vector.shape_cast %288 : vector<1x1x18x18xf32> to vector<18x18xf32>
    %c47_197 = arith.constant 47 : index
    %290 = memref.load %arg1[%c47_197] : memref<123xf32, #tpu.memory_space<smem>>
    %291 = vector.broadcast %290 : f32 to vector<18x18xf32>
    %292 = arith.mulf %289, %291 : vector<18x18xf32>
    %293 = arith.addf %269, %292 : vector<18x18xf32>
    %c0_198 = arith.constant 0 : index
    %c48 = arith.constant 48 : index
    %c0_199 = arith.constant 0 : index
    %c0_200 = arith.constant 0 : index
    %294 = vector.load %arg0[%c0_198, %c48, %c0_199, %c0_200] : memref<1x123x18x18xf32, #tpu.memory_space<vmem>>, vector<1x1x18x18xf32>
    %295 = vector.shape_cast %294 : vector<1x1x18x18xf32> to vector<18x18xf32>
    %c48_201 = arith.constant 48 : index
    %296 = memref.load %arg1[%c48_201] : memref<123xf32, #tpu.memory_space<smem>>
    %297 = vector.broadcast %296 : f32 to vector<18x18xf32>
    %298 = arith.mulf %295, %297 : vector<18x18xf32>
    %299 = arith.addf %275, %298 : vector<18x18xf32>
    %c0_202 = arith.constant 0 : index
    %c49 = arith.constant 49 : index
    %c0_203 = arith.constant 0 : index
    %c0_204 = arith.constant 0 : index
    %300 = vector.load %arg0[%c0_202, %c49, %c0_203, %c0_204] : memref<1x123x18x18xf32, #tpu.memory_space<vmem>>, vector<1x1x18x18xf32>
    %301 = vector.shape_cast %300 : vector<1x1x18x18xf32> to vector<18x18xf32>
    %c49_205 = arith.constant 49 : index
    %302 = memref.load %arg1[%c49_205] : memref<123xf32, #tpu.memory_space<smem>>
    %303 = vector.broadcast %302 : f32 to vector<18x18xf32>
    %304 = arith.mulf %301, %303 : vector<18x18xf32>
    %305 = arith.addf %281, %304 : vector<18x18xf32>
    %c0_206 = arith.constant 0 : index
    %c50 = arith.constant 50 : index
    %c0_207 = arith.constant 0 : index
    %c0_208 = arith.constant 0 : index
    %306 = vector.load %arg0[%c0_206, %c50, %c0_207, %c0_208] : memref<1x123x18x18xf32, #tpu.memory_space<vmem>>, vector<1x1x18x18xf32>
    %307 = vector.shape_cast %306 : vector<1x1x18x18xf32> to vector<18x18xf32>
    %c50_209 = arith.constant 50 : index
    %308 = memref.load %arg1[%c50_209] : memref<123xf32, #tpu.memory_space<smem>>
    %309 = vector.broadcast %308 : f32 to vector<18x18xf32>
    %310 = arith.mulf %307, %309 : vector<18x18xf32>
    %311 = arith.addf %287, %310 : vector<18x18xf32>
    %c0_210 = arith.constant 0 : index
    %c51 = arith.constant 51 : index
    %c0_211 = arith.constant 0 : index
    %c0_212 = arith.constant 0 : index
    %312 = vector.load %arg0[%c0_210, %c51, %c0_211, %c0_212] : memref<1x123x18x18xf32, #tpu.memory_space<vmem>>, vector<1x1x18x18xf32>
    %313 = vector.shape_cast %312 : vector<1x1x18x18xf32> to vector<18x18xf32>
    %c51_213 = arith.constant 51 : index
    %314 = memref.load %arg1[%c51_213] : memref<123xf32, #tpu.memory_space<smem>>
    %315 = vector.broadcast %314 : f32 to vector<18x18xf32>
    %316 = arith.mulf %313, %315 : vector<18x18xf32>
    %317 = arith.addf %293, %316 : vector<18x18xf32>
    %c0_214 = arith.constant 0 : index
    %c52 = arith.constant 52 : index
    %c0_215 = arith.constant 0 : index
    %c0_216 = arith.constant 0 : index
    %318 = vector.load %arg0[%c0_214, %c52, %c0_215, %c0_216] : memref<1x123x18x18xf32, #tpu.memory_space<vmem>>, vector<1x1x18x18xf32>
    %319 = vector.shape_cast %318 : vector<1x1x18x18xf32> to vector<18x18xf32>
    %c52_217 = arith.constant 52 : index
    %320 = memref.load %arg1[%c52_217] : memref<123xf32, #tpu.memory_space<smem>>
    %321 = vector.broadcast %320 : f32 to vector<18x18xf32>
    %322 = arith.mulf %319, %321 : vector<18x18xf32>
    %323 = arith.addf %299, %322 : vector<18x18xf32>
    %c0_218 = arith.constant 0 : index
    %c53 = arith.constant 53 : index
    %c0_219 = arith.constant 0 : index
    %c0_220 = arith.constant 0 : index
    %324 = vector.load %arg0[%c0_218, %c53, %c0_219, %c0_220] : memref<1x123x18x18xf32, #tpu.memory_space<vmem>>, vector<1x1x18x18xf32>
    %325 = vector.shape_cast %324 : vector<1x1x18x18xf32> to vector<18x18xf32>
    %c53_221 = arith.constant 53 : index
    %326 = memref.load %arg1[%c53_221] : memref<123xf32, #tpu.memory_space<smem>>
    %327 = vector.broadcast %326 : f32 to vector<18x18xf32>
    %328 = arith.mulf %325, %327 : vector<18x18xf32>
    %329 = arith.addf %305, %328 : vector<18x18xf32>
    %c0_222 = arith.constant 0 : index
    %c54 = arith.constant 54 : index
    %c0_223 = arith.constant 0 : index
    %c0_224 = arith.constant 0 : index
    %330 = vector.load %arg0[%c0_222, %c54, %c0_223, %c0_224] : memref<1x123x18x18xf32, #tpu.memory_space<vmem>>, vector<1x1x18x18xf32>
    %331 = vector.shape_cast %330 : vector<1x1x18x18xf32> to vector<18x18xf32>
    %c54_225 = arith.constant 54 : index
    %332 = memref.load %arg1[%c54_225] : memref<123xf32, #tpu.memory_space<smem>>
    %333 = vector.broadcast %332 : f32 to vector<18x18xf32>
    %334 = arith.mulf %331, %333 : vector<18x18xf32>
    %335 = arith.addf %311, %334 : vector<18x18xf32>
    %c0_226 = arith.constant 0 : index
    %c55 = arith.constant 55 : index
    %c0_227 = arith.constant 0 : index
    %c0_228 = arith.constant 0 : index
    %336 = vector.load %arg0[%c0_226, %c55, %c0_227, %c0_228] : memref<1x123x18x18xf32, #tpu.memory_space<vmem>>, vector<1x1x18x18xf32>
    %337 = vector.shape_cast %336 : vector<1x1x18x18xf32> to vector<18x18xf32>
    %c55_229 = arith.constant 55 : index
    %338 = memref.load %arg1[%c55_229] : memref<123xf32, #tpu.memory_space<smem>>
    %339 = vector.broadcast %338 : f32 to vector<18x18xf32>
    %340 = arith.mulf %337, %339 : vector<18x18xf32>
    %341 = arith.addf %317, %340 : vector<18x18xf32>
    %c0_230 = arith.constant 0 : index
    %c56 = arith.constant 56 : index
    %c0_231 = arith.constant 0 : index
    %c0_232 = arith.constant 0 : index
    %342 = vector.load %arg0[%c0_230, %c56, %c0_231, %c0_232] : memref<1x123x18x18xf32, #tpu.memory_space<vmem>>, vector<1x1x18x18xf32>
    %343 = vector.shape_cast %342 : vector<1x1x18x18xf32> to vector<18x18xf32>
    %c56_233 = arith.constant 56 : index
    %344 = memref.load %arg1[%c56_233] : memref<123xf32, #tpu.memory_space<smem>>
    %345 = vector.broadcast %344 : f32 to vector<18x18xf32>
    %346 = arith.mulf %343, %345 : vector<18x18xf32>
    %347 = arith.addf %323, %346 : vector<18x18xf32>
    %c0_234 = arith.constant 0 : index
    %c57 = arith.constant 57 : index
    %c0_235 = arith.constant 0 : index
    %c0_236 = arith.constant 0 : index
    %348 = vector.load %arg0[%c0_234, %c57, %c0_235, %c0_236] : memref<1x123x18x18xf32, #tpu.memory_space<vmem>>, vector<1x1x18x18xf32>
    %349 = vector.shape_cast %348 : vector<1x1x18x18xf32> to vector<18x18xf32>
    %c57_237 = arith.constant 57 : index
    %350 = memref.load %arg1[%c57_237] : memref<123xf32, #tpu.memory_space<smem>>
    %351 = vector.broadcast %350 : f32 to vector<18x18xf32>
    %352 = arith.mulf %349, %351 : vector<18x18xf32>
    %353 = arith.addf %329, %352 : vector<18x18xf32>
    %c0_238 = arith.constant 0 : index
    %c58 = arith.constant 58 : index
    %c0_239 = arith.constant 0 : index
    %c0_240 = arith.constant 0 : index
    %354 = vector.load %arg0[%c0_238, %c58, %c0_239, %c0_240] : memref<1x123x18x18xf32, #tpu.memory_space<vmem>>, vector<1x1x18x18xf32>
    %355 = vector.shape_cast %354 : vector<1x1x18x18xf32> to vector<18x18xf32>
    %c58_241 = arith.constant 58 : index
    %356 = memref.load %arg1[%c58_241] : memref<123xf32, #tpu.memory_space<smem>>
    %357 = vector.broadcast %356 : f32 to vector<18x18xf32>
    %358 = arith.mulf %355, %357 : vector<18x18xf32>
    %359 = arith.addf %335, %358 : vector<18x18xf32>
    %c0_242 = arith.constant 0 : index
    %c59 = arith.constant 59 : index
    %c0_243 = arith.constant 0 : index
    %c0_244 = arith.constant 0 : index
    %360 = vector.load %arg0[%c0_242, %c59, %c0_243, %c0_244] : memref<1x123x18x18xf32, #tpu.memory_space<vmem>>, vector<1x1x18x18xf32>
    %361 = vector.shape_cast %360 : vector<1x1x18x18xf32> to vector<18x18xf32>
    %c59_245 = arith.constant 59 : index
    %362 = memref.load %arg1[%c59_245] : memref<123xf32, #tpu.memory_space<smem>>
    %363 = vector.broadcast %362 : f32 to vector<18x18xf32>
    %364 = arith.mulf %361, %363 : vector<18x18xf32>
    %365 = arith.addf %341, %364 : vector<18x18xf32>
    %c0_246 = arith.constant 0 : index
    %c60 = arith.constant 60 : index
    %c0_247 = arith.constant 0 : index
    %c0_248 = arith.constant 0 : index
    %366 = vector.load %arg0[%c0_246, %c60, %c0_247, %c0_248] : memref<1x123x18x18xf32, #tpu.memory_space<vmem>>, vector<1x1x18x18xf32>
    %367 = vector.shape_cast %366 : vector<1x1x18x18xf32> to vector<18x18xf32>
    %c60_249 = arith.constant 60 : index
    %368 = memref.load %arg1[%c60_249] : memref<123xf32, #tpu.memory_space<smem>>
    %369 = vector.broadcast %368 : f32 to vector<18x18xf32>
    %370 = arith.mulf %367, %369 : vector<18x18xf32>
    %371 = arith.addf %347, %370 : vector<18x18xf32>
    %c0_250 = arith.constant 0 : index
    %c61 = arith.constant 61 : index
    %c0_251 = arith.constant 0 : index
    %c0_252 = arith.constant 0 : index
    %372 = vector.load %arg0[%c0_250, %c61, %c0_251, %c0_252] : memref<1x123x18x18xf32, #tpu.memory_space<vmem>>, vector<1x1x18x18xf32>
    %373 = vector.shape_cast %372 : vector<1x1x18x18xf32> to vector<18x18xf32>
    %c61_253 = arith.constant 61 : index
    %374 = memref.load %arg1[%c61_253] : memref<123xf32, #tpu.memory_space<smem>>
    %375 = vector.broadcast %374 : f32 to vector<18x18xf32>
    %376 = arith.mulf %373, %375 : vector<18x18xf32>
    %377 = arith.addf %353, %376 : vector<18x18xf32>
    %c0_254 = arith.constant 0 : index
    %c62 = arith.constant 62 : index
    %c0_255 = arith.constant 0 : index
    %c0_256 = arith.constant 0 : index
    %378 = vector.load %arg0[%c0_254, %c62, %c0_255, %c0_256] : memref<1x123x18x18xf32, #tpu.memory_space<vmem>>, vector<1x1x18x18xf32>
    %379 = vector.shape_cast %378 : vector<1x1x18x18xf32> to vector<18x18xf32>
    %c62_257 = arith.constant 62 : index
    %380 = memref.load %arg1[%c62_257] : memref<123xf32, #tpu.memory_space<smem>>
    %381 = vector.broadcast %380 : f32 to vector<18x18xf32>
    %382 = arith.mulf %379, %381 : vector<18x18xf32>
    %383 = arith.addf %359, %382 : vector<18x18xf32>
    %c0_258 = arith.constant 0 : index
    %c63 = arith.constant 63 : index
    %c0_259 = arith.constant 0 : index
    %c0_260 = arith.constant 0 : index
    %384 = vector.load %arg0[%c0_258, %c63, %c0_259, %c0_260] : memref<1x123x18x18xf32, #tpu.memory_space<vmem>>, vector<1x1x18x18xf32>
    %385 = vector.shape_cast %384 : vector<1x1x18x18xf32> to vector<18x18xf32>
    %c63_261 = arith.constant 63 : index
    %386 = memref.load %arg1[%c63_261] : memref<123xf32, #tpu.memory_space<smem>>
    %387 = vector.broadcast %386 : f32 to vector<18x18xf32>
    %388 = arith.mulf %385, %387 : vector<18x18xf32>
    %389 = arith.addf %365, %388 : vector<18x18xf32>
    %c0_262 = arith.constant 0 : index
    %c64 = arith.constant 64 : index
    %c0_263 = arith.constant 0 : index
    %c0_264 = arith.constant 0 : index
    %390 = vector.load %arg0[%c0_262, %c64, %c0_263, %c0_264] : memref<1x123x18x18xf32, #tpu.memory_space<vmem>>, vector<1x1x18x18xf32>
    %391 = vector.shape_cast %390 : vector<1x1x18x18xf32> to vector<18x18xf32>
    %c64_265 = arith.constant 64 : index
    %392 = memref.load %arg1[%c64_265] : memref<123xf32, #tpu.memory_space<smem>>
    %393 = vector.broadcast %392 : f32 to vector<18x18xf32>
    %394 = arith.mulf %391, %393 : vector<18x18xf32>
    %395 = arith.addf %371, %394 : vector<18x18xf32>
    %c0_266 = arith.constant 0 : index
    %c65 = arith.constant 65 : index
    %c0_267 = arith.constant 0 : index
    %c0_268 = arith.constant 0 : index
    %396 = vector.load %arg0[%c0_266, %c65, %c0_267, %c0_268] : memref<1x123x18x18xf32, #tpu.memory_space<vmem>>, vector<1x1x18x18xf32>
    %397 = vector.shape_cast %396 : vector<1x1x18x18xf32> to vector<18x18xf32>
    %c65_269 = arith.constant 65 : index
    %398 = memref.load %arg1[%c65_269] : memref<123xf32, #tpu.memory_space<smem>>
    %399 = vector.broadcast %398 : f32 to vector<18x18xf32>
    %400 = arith.mulf %397, %399 : vector<18x18xf32>
    %401 = arith.addf %377, %400 : vector<18x18xf32>
    %c0_270 = arith.constant 0 : index
    %c66 = arith.constant 66 : index
    %c0_271 = arith.constant 0 : index
    %c0_272 = arith.constant 0 : index
    %402 = vector.load %arg0[%c0_270, %c66, %c0_271, %c0_272] : memref<1x123x18x18xf32, #tpu.memory_space<vmem>>, vector<1x1x18x18xf32>
    %403 = vector.shape_cast %402 : vector<1x1x18x18xf32> to vector<18x18xf32>
    %c66_273 = arith.constant 66 : index
    %404 = memref.load %arg1[%c66_273] : memref<123xf32, #tpu.memory_space<smem>>
    %405 = vector.broadcast %404 : f32 to vector<18x18xf32>
    %406 = arith.mulf %403, %405 : vector<18x18xf32>
    %407 = arith.addf %383, %406 : vector<18x18xf32>
    %c0_274 = arith.constant 0 : index
    %c67 = arith.constant 67 : index
    %c0_275 = arith.constant 0 : index
    %c0_276 = arith.constant 0 : index
    %408 = vector.load %arg0[%c0_274, %c67, %c0_275, %c0_276] : memref<1x123x18x18xf32, #tpu.memory_space<vmem>>, vector<1x1x18x18xf32>
    %409 = vector.shape_cast %408 : vector<1x1x18x18xf32> to vector<18x18xf32>
    %c67_277 = arith.constant 67 : index
    %410 = memref.load %arg1[%c67_277] : memref<123xf32, #tpu.memory_space<smem>>
    %411 = vector.broadcast %410 : f32 to vector<18x18xf32>
    %412 = arith.mulf %409, %411 : vector<18x18xf32>
    %413 = arith.addf %389, %412 : vector<18x18xf32>
    %c0_278 = arith.constant 0 : index
    %c68 = arith.constant 68 : index
    %c0_279 = arith.constant 0 : index
    %c0_280 = arith.constant 0 : index
    %414 = vector.load %arg0[%c0_278, %c68, %c0_279, %c0_280] : memref<1x123x18x18xf32, #tpu.memory_space<vmem>>, vector<1x1x18x18xf32>
    %415 = vector.shape_cast %414 : vector<1x1x18x18xf32> to vector<18x18xf32>
    %c68_281 = arith.constant 68 : index
    %416 = memref.load %arg1[%c68_281] : memref<123xf32, #tpu.memory_space<smem>>
    %417 = vector.broadcast %416 : f32 to vector<18x18xf32>
    %418 = arith.mulf %415, %417 : vector<18x18xf32>
    %419 = arith.addf %395, %418 : vector<18x18xf32>
    %c0_282 = arith.constant 0 : index
    %c69 = arith.constant 69 : index
    %c0_283 = arith.constant 0 : index
    %c0_284 = arith.constant 0 : index
    %420 = vector.load %arg0[%c0_282, %c69, %c0_283, %c0_284] : memref<1x123x18x18xf32, #tpu.memory_space<vmem>>, vector<1x1x18x18xf32>
    %421 = vector.shape_cast %420 : vector<1x1x18x18xf32> to vector<18x18xf32>
    %c69_285 = arith.constant 69 : index
    %422 = memref.load %arg1[%c69_285] : memref<123xf32, #tpu.memory_space<smem>>
    %423 = vector.broadcast %422 : f32 to vector<18x18xf32>
    %424 = arith.mulf %421, %423 : vector<18x18xf32>
    %425 = arith.addf %401, %424 : vector<18x18xf32>
    %c0_286 = arith.constant 0 : index
    %c70 = arith.constant 70 : index
    %c0_287 = arith.constant 0 : index
    %c0_288 = arith.constant 0 : index
    %426 = vector.load %arg0[%c0_286, %c70, %c0_287, %c0_288] : memref<1x123x18x18xf32, #tpu.memory_space<vmem>>, vector<1x1x18x18xf32>
    %427 = vector.shape_cast %426 : vector<1x1x18x18xf32> to vector<18x18xf32>
    %c70_289 = arith.constant 70 : index
    %428 = memref.load %arg1[%c70_289] : memref<123xf32, #tpu.memory_space<smem>>
    %429 = vector.broadcast %428 : f32 to vector<18x18xf32>
    %430 = arith.mulf %427, %429 : vector<18x18xf32>
    %431 = arith.addf %407, %430 : vector<18x18xf32>
    %c0_290 = arith.constant 0 : index
    %c71 = arith.constant 71 : index
    %c0_291 = arith.constant 0 : index
    %c0_292 = arith.constant 0 : index
    %432 = vector.load %arg0[%c0_290, %c71, %c0_291, %c0_292] : memref<1x123x18x18xf32, #tpu.memory_space<vmem>>, vector<1x1x18x18xf32>
    %433 = vector.shape_cast %432 : vector<1x1x18x18xf32> to vector<18x18xf32>
    %c71_293 = arith.constant 71 : index
    %434 = memref.load %arg1[%c71_293] : memref<123xf32, #tpu.memory_space<smem>>
    %435 = vector.broadcast %434 : f32 to vector<18x18xf32>
    %436 = arith.mulf %433, %435 : vector<18x18xf32>
    %437 = arith.addf %413, %436 : vector<18x18xf32>
    %c0_294 = arith.constant 0 : index
    %c72 = arith.constant 72 : index
    %c0_295 = arith.constant 0 : index
    %c0_296 = arith.constant 0 : index
    %438 = vector.load %arg0[%c0_294, %c72, %c0_295, %c0_296] : memref<1x123x18x18xf32, #tpu.memory_space<vmem>>, vector<1x1x18x18xf32>
    %439 = vector.shape_cast %438 : vector<1x1x18x18xf32> to vector<18x18xf32>
    %c72_297 = arith.constant 72 : index
    %440 = memref.load %arg1[%c72_297] : memref<123xf32, #tpu.memory_space<smem>>
    %441 = vector.broadcast %440 : f32 to vector<18x18xf32>
    %442 = arith.mulf %439, %441 : vector<18x18xf32>
    %443 = arith.addf %419, %442 : vector<18x18xf32>
    %c0_298 = arith.constant 0 : index
    %c73 = arith.constant 73 : index
    %c0_299 = arith.constant 0 : index
    %c0_300 = arith.constant 0 : index
    %444 = vector.load %arg0[%c0_298, %c73, %c0_299, %c0_300] : memref<1x123x18x18xf32, #tpu.memory_space<vmem>>, vector<1x1x18x18xf32>
    %445 = vector.shape_cast %444 : vector<1x1x18x18xf32> to vector<18x18xf32>
    %c73_301 = arith.constant 73 : index
    %446 = memref.load %arg1[%c73_301] : memref<123xf32, #tpu.memory_space<smem>>
    %447 = vector.broadcast %446 : f32 to vector<18x18xf32>
    %448 = arith.mulf %445, %447 : vector<18x18xf32>
    %449 = arith.addf %425, %448 : vector<18x18xf32>
    %c0_302 = arith.constant 0 : index
    %c74 = arith.constant 74 : index
    %c0_303 = arith.constant 0 : index
    %c0_304 = arith.constant 0 : index
    %450 = vector.load %arg0[%c0_302, %c74, %c0_303, %c0_304] : memref<1x123x18x18xf32, #tpu.memory_space<vmem>>, vector<1x1x18x18xf32>
    %451 = vector.shape_cast %450 : vector<1x1x18x18xf32> to vector<18x18xf32>
    %c74_305 = arith.constant 74 : index
    %452 = memref.load %arg1[%c74_305] : memref<123xf32, #tpu.memory_space<smem>>
    %453 = vector.broadcast %452 : f32 to vector<18x18xf32>
    %454 = arith.mulf %451, %453 : vector<18x18xf32>
    %455 = arith.addf %431, %454 : vector<18x18xf32>
    %c0_306 = arith.constant 0 : index
    %c75 = arith.constant 75 : index
    %c0_307 = arith.constant 0 : index
    %c0_308 = arith.constant 0 : index
    %456 = vector.load %arg0[%c0_306, %c75, %c0_307, %c0_308] : memref<1x123x18x18xf32, #tpu.memory_space<vmem>>, vector<1x1x18x18xf32>
    %457 = vector.shape_cast %456 : vector<1x1x18x18xf32> to vector<18x18xf32>
    %c75_309 = arith.constant 75 : index
    %458 = memref.load %arg1[%c75_309] : memref<123xf32, #tpu.memory_space<smem>>
    %459 = vector.broadcast %458 : f32 to vector<18x18xf32>
    %460 = arith.mulf %457, %459 : vector<18x18xf32>
    %461 = arith.addf %437, %460 : vector<18x18xf32>
    %c0_310 = arith.constant 0 : index
    %c76 = arith.constant 76 : index
    %c0_311 = arith.constant 0 : index
    %c0_312 = arith.constant 0 : index
    %462 = vector.load %arg0[%c0_310, %c76, %c0_311, %c0_312] : memref<1x123x18x18xf32, #tpu.memory_space<vmem>>, vector<1x1x18x18xf32>
    %463 = vector.shape_cast %462 : vector<1x1x18x18xf32> to vector<18x18xf32>
    %c76_313 = arith.constant 76 : index
    %464 = memref.load %arg1[%c76_313] : memref<123xf32, #tpu.memory_space<smem>>
    %465 = vector.broadcast %464 : f32 to vector<18x18xf32>
    %466 = arith.mulf %463, %465 : vector<18x18xf32>
    %467 = arith.addf %443, %466 : vector<18x18xf32>
    %c0_314 = arith.constant 0 : index
    %c77 = arith.constant 77 : index
    %c0_315 = arith.constant 0 : index
    %c0_316 = arith.constant 0 : index
    %468 = vector.load %arg0[%c0_314, %c77, %c0_315, %c0_316] : memref<1x123x18x18xf32, #tpu.memory_space<vmem>>, vector<1x1x18x18xf32>
    %469 = vector.shape_cast %468 : vector<1x1x18x18xf32> to vector<18x18xf32>
    %c77_317 = arith.constant 77 : index
    %470 = memref.load %arg1[%c77_317] : memref<123xf32, #tpu.memory_space<smem>>
    %471 = vector.broadcast %470 : f32 to vector<18x18xf32>
    %472 = arith.mulf %469, %471 : vector<18x18xf32>
    %473 = arith.addf %449, %472 : vector<18x18xf32>
    %c0_318 = arith.constant 0 : index
    %c78 = arith.constant 78 : index
    %c0_319 = arith.constant 0 : index
    %c0_320 = arith.constant 0 : index
    %474 = vector.load %arg0[%c0_318, %c78, %c0_319, %c0_320] : memref<1x123x18x18xf32, #tpu.memory_space<vmem>>, vector<1x1x18x18xf32>
    %475 = vector.shape_cast %474 : vector<1x1x18x18xf32> to vector<18x18xf32>
    %c78_321 = arith.constant 78 : index
    %476 = memref.load %arg1[%c78_321] : memref<123xf32, #tpu.memory_space<smem>>
    %477 = vector.broadcast %476 : f32 to vector<18x18xf32>
    %478 = arith.mulf %475, %477 : vector<18x18xf32>
    %479 = arith.addf %455, %478 : vector<18x18xf32>
    %c0_322 = arith.constant 0 : index
    %c79 = arith.constant 79 : index
    %c0_323 = arith.constant 0 : index
    %c0_324 = arith.constant 0 : index
    %480 = vector.load %arg0[%c0_322, %c79, %c0_323, %c0_324] : memref<1x123x18x18xf32, #tpu.memory_space<vmem>>, vector<1x1x18x18xf32>
    %481 = vector.shape_cast %480 : vector<1x1x18x18xf32> to vector<18x18xf32>
    %c79_325 = arith.constant 79 : index
    %482 = memref.load %arg1[%c79_325] : memref<123xf32, #tpu.memory_space<smem>>
    %483 = vector.broadcast %482 : f32 to vector<18x18xf32>
    %484 = arith.mulf %481, %483 : vector<18x18xf32>
    %485 = arith.addf %461, %484 : vector<18x18xf32>
    %c0_326 = arith.constant 0 : index
    %c80 = arith.constant 80 : index
    %c0_327 = arith.constant 0 : index
    %c0_328 = arith.constant 0 : index
    %486 = vector.load %arg0[%c0_326, %c80, %c0_327, %c0_328] : memref<1x123x18x18xf32, #tpu.memory_space<vmem>>, vector<1x1x18x18xf32>
    %487 = vector.shape_cast %486 : vector<1x1x18x18xf32> to vector<18x18xf32>
    %c80_329 = arith.constant 80 : index
    %488 = memref.load %arg1[%c80_329] : memref<123xf32, #tpu.memory_space<smem>>
    %489 = vector.broadcast %488 : f32 to vector<18x18xf32>
    %490 = arith.mulf %487, %489 : vector<18x18xf32>
    %491 = arith.addf %467, %490 : vector<18x18xf32>
    %c0_330 = arith.constant 0 : index
    %c81 = arith.constant 81 : index
    %c0_331 = arith.constant 0 : index
    %c0_332 = arith.constant 0 : index
    %492 = vector.load %arg0[%c0_330, %c81, %c0_331, %c0_332] : memref<1x123x18x18xf32, #tpu.memory_space<vmem>>, vector<1x1x18x18xf32>
    %493 = vector.shape_cast %492 : vector<1x1x18x18xf32> to vector<18x18xf32>
    %c81_333 = arith.constant 81 : index
    %494 = memref.load %arg1[%c81_333] : memref<123xf32, #tpu.memory_space<smem>>
    %495 = vector.broadcast %494 : f32 to vector<18x18xf32>
    %496 = arith.mulf %493, %495 : vector<18x18xf32>
    %497 = arith.addf %473, %496 : vector<18x18xf32>
    %c0_334 = arith.constant 0 : index
    %c82 = arith.constant 82 : index
    %c0_335 = arith.constant 0 : index
    %c0_336 = arith.constant 0 : index
    %498 = vector.load %arg0[%c0_334, %c82, %c0_335, %c0_336] : memref<1x123x18x18xf32, #tpu.memory_space<vmem>>, vector<1x1x18x18xf32>
    %499 = vector.shape_cast %498 : vector<1x1x18x18xf32> to vector<18x18xf32>
    %c82_337 = arith.constant 82 : index
    %500 = memref.load %arg1[%c82_337] : memref<123xf32, #tpu.memory_space<smem>>
    %501 = vector.broadcast %500 : f32 to vector<18x18xf32>
    %502 = arith.mulf %499, %501 : vector<18x18xf32>
    %503 = arith.addf %479, %502 : vector<18x18xf32>
    %c0_338 = arith.constant 0 : index
    %c83 = arith.constant 83 : index
    %c0_339 = arith.constant 0 : index
    %c0_340 = arith.constant 0 : index
    %504 = vector.load %arg0[%c0_338, %c83, %c0_339, %c0_340] : memref<1x123x18x18xf32, #tpu.memory_space<vmem>>, vector<1x1x18x18xf32>
    %505 = vector.shape_cast %504 : vector<1x1x18x18xf32> to vector<18x18xf32>
    %c83_341 = arith.constant 83 : index
    %506 = memref.load %arg1[%c83_341] : memref<123xf32, #tpu.memory_space<smem>>
    %507 = vector.broadcast %506 : f32 to vector<18x18xf32>
    %508 = arith.mulf %505, %507 : vector<18x18xf32>
    %509 = arith.addf %485, %508 : vector<18x18xf32>
    %c0_342 = arith.constant 0 : index
    %c84 = arith.constant 84 : index
    %c0_343 = arith.constant 0 : index
    %c0_344 = arith.constant 0 : index
    %510 = vector.load %arg0[%c0_342, %c84, %c0_343, %c0_344] : memref<1x123x18x18xf32, #tpu.memory_space<vmem>>, vector<1x1x18x18xf32>
    %511 = vector.shape_cast %510 : vector<1x1x18x18xf32> to vector<18x18xf32>
    %c84_345 = arith.constant 84 : index
    %512 = memref.load %arg1[%c84_345] : memref<123xf32, #tpu.memory_space<smem>>
    %513 = vector.broadcast %512 : f32 to vector<18x18xf32>
    %514 = arith.mulf %511, %513 : vector<18x18xf32>
    %515 = arith.addf %491, %514 : vector<18x18xf32>
    %c0_346 = arith.constant 0 : index
    %c85 = arith.constant 85 : index
    %c0_347 = arith.constant 0 : index
    %c0_348 = arith.constant 0 : index
    %516 = vector.load %arg0[%c0_346, %c85, %c0_347, %c0_348] : memref<1x123x18x18xf32, #tpu.memory_space<vmem>>, vector<1x1x18x18xf32>
    %517 = vector.shape_cast %516 : vector<1x1x18x18xf32> to vector<18x18xf32>
    %c85_349 = arith.constant 85 : index
    %518 = memref.load %arg1[%c85_349] : memref<123xf32, #tpu.memory_space<smem>>
    %519 = vector.broadcast %518 : f32 to vector<18x18xf32>
    %520 = arith.mulf %517, %519 : vector<18x18xf32>
    %521 = arith.addf %497, %520 : vector<18x18xf32>
    %c0_350 = arith.constant 0 : index
    %c86 = arith.constant 86 : index
    %c0_351 = arith.constant 0 : index
    %c0_352 = arith.constant 0 : index
    %522 = vector.load %arg0[%c0_350, %c86, %c0_351, %c0_352] : memref<1x123x18x18xf32, #tpu.memory_space<vmem>>, vector<1x1x18x18xf32>
    %523 = vector.shape_cast %522 : vector<1x1x18x18xf32> to vector<18x18xf32>
    %c86_353 = arith.constant 86 : index
    %524 = memref.load %arg1[%c86_353] : memref<123xf32, #tpu.memory_space<smem>>
    %525 = vector.broadcast %524 : f32 to vector<18x18xf32>
    %526 = arith.mulf %523, %525 : vector<18x18xf32>
    %527 = arith.addf %503, %526 : vector<18x18xf32>
    %c0_354 = arith.constant 0 : index
    %c87 = arith.constant 87 : index
    %c0_355 = arith.constant 0 : index
    %c0_356 = arith.constant 0 : index
    %528 = vector.load %arg0[%c0_354, %c87, %c0_355, %c0_356] : memref<1x123x18x18xf32, #tpu.memory_space<vmem>>, vector<1x1x18x18xf32>
    %529 = vector.shape_cast %528 : vector<1x1x18x18xf32> to vector<18x18xf32>
    %c87_357 = arith.constant 87 : index
    %530 = memref.load %arg1[%c87_357] : memref<123xf32, #tpu.memory_space<smem>>
    %531 = vector.broadcast %530 : f32 to vector<18x18xf32>
    %532 = arith.mulf %529, %531 : vector<18x18xf32>
    %533 = arith.addf %509, %532 : vector<18x18xf32>
    %c0_358 = arith.constant 0 : index
    %c88 = arith.constant 88 : index
    %c0_359 = arith.constant 0 : index
    %c0_360 = arith.constant 0 : index
    %534 = vector.load %arg0[%c0_358, %c88, %c0_359, %c0_360] : memref<1x123x18x18xf32, #tpu.memory_space<vmem>>, vector<1x1x18x18xf32>
    %535 = vector.shape_cast %534 : vector<1x1x18x18xf32> to vector<18x18xf32>
    %c88_361 = arith.constant 88 : index
    %536 = memref.load %arg1[%c88_361] : memref<123xf32, #tpu.memory_space<smem>>
    %537 = vector.broadcast %536 : f32 to vector<18x18xf32>
    %538 = arith.mulf %535, %537 : vector<18x18xf32>
    %539 = arith.addf %515, %538 : vector<18x18xf32>
    %c0_362 = arith.constant 0 : index
    %c89 = arith.constant 89 : index
    %c0_363 = arith.constant 0 : index
    %c0_364 = arith.constant 0 : index
    %540 = vector.load %arg0[%c0_362, %c89, %c0_363, %c0_364] : memref<1x123x18x18xf32, #tpu.memory_space<vmem>>, vector<1x1x18x18xf32>
    %541 = vector.shape_cast %540 : vector<1x1x18x18xf32> to vector<18x18xf32>
    %c89_365 = arith.constant 89 : index
    %542 = memref.load %arg1[%c89_365] : memref<123xf32, #tpu.memory_space<smem>>
    %543 = vector.broadcast %542 : f32 to vector<18x18xf32>
    %544 = arith.mulf %541, %543 : vector<18x18xf32>
    %545 = arith.addf %521, %544 : vector<18x18xf32>
    %c0_366 = arith.constant 0 : index
    %c90 = arith.constant 90 : index
    %c0_367 = arith.constant 0 : index
    %c0_368 = arith.constant 0 : index
    %546 = vector.load %arg0[%c0_366, %c90, %c0_367, %c0_368] : memref<1x123x18x18xf32, #tpu.memory_space<vmem>>, vector<1x1x18x18xf32>
    %547 = vector.shape_cast %546 : vector<1x1x18x18xf32> to vector<18x18xf32>
    %c90_369 = arith.constant 90 : index
    %548 = memref.load %arg1[%c90_369] : memref<123xf32, #tpu.memory_space<smem>>
    %549 = vector.broadcast %548 : f32 to vector<18x18xf32>
    %550 = arith.mulf %547, %549 : vector<18x18xf32>
    %551 = arith.addf %527, %550 : vector<18x18xf32>
    %c0_370 = arith.constant 0 : index
    %c91 = arith.constant 91 : index
    %c0_371 = arith.constant 0 : index
    %c0_372 = arith.constant 0 : index
    %552 = vector.load %arg0[%c0_370, %c91, %c0_371, %c0_372] : memref<1x123x18x18xf32, #tpu.memory_space<vmem>>, vector<1x1x18x18xf32>
    %553 = vector.shape_cast %552 : vector<1x1x18x18xf32> to vector<18x18xf32>
    %c91_373 = arith.constant 91 : index
    %554 = memref.load %arg1[%c91_373] : memref<123xf32, #tpu.memory_space<smem>>
    %555 = vector.broadcast %554 : f32 to vector<18x18xf32>
    %556 = arith.mulf %553, %555 : vector<18x18xf32>
    %557 = arith.addf %533, %556 : vector<18x18xf32>
    %c0_374 = arith.constant 0 : index
    %c92 = arith.constant 92 : index
    %c0_375 = arith.constant 0 : index
    %c0_376 = arith.constant 0 : index
    %558 = vector.load %arg0[%c0_374, %c92, %c0_375, %c0_376] : memref<1x123x18x18xf32, #tpu.memory_space<vmem>>, vector<1x1x18x18xf32>
    %559 = vector.shape_cast %558 : vector<1x1x18x18xf32> to vector<18x18xf32>
    %c92_377 = arith.constant 92 : index
    %560 = memref.load %arg1[%c92_377] : memref<123xf32, #tpu.memory_space<smem>>
    %561 = vector.broadcast %560 : f32 to vector<18x18xf32>
    %562 = arith.mulf %559, %561 : vector<18x18xf32>
    %563 = arith.addf %539, %562 : vector<18x18xf32>
    %c0_378 = arith.constant 0 : index
    %c93 = arith.constant 93 : index
    %c0_379 = arith.constant 0 : index
    %c0_380 = arith.constant 0 : index
    %564 = vector.load %arg0[%c0_378, %c93, %c0_379, %c0_380] : memref<1x123x18x18xf32, #tpu.memory_space<vmem>>, vector<1x1x18x18xf32>
    %565 = vector.shape_cast %564 : vector<1x1x18x18xf32> to vector<18x18xf32>
    %c93_381 = arith.constant 93 : index
    %566 = memref.load %arg1[%c93_381] : memref<123xf32, #tpu.memory_space<smem>>
    %567 = vector.broadcast %566 : f32 to vector<18x18xf32>
    %568 = arith.mulf %565, %567 : vector<18x18xf32>
    %569 = arith.addf %545, %568 : vector<18x18xf32>
    %c0_382 = arith.constant 0 : index
    %c94 = arith.constant 94 : index
    %c0_383 = arith.constant 0 : index
    %c0_384 = arith.constant 0 : index
    %570 = vector.load %arg0[%c0_382, %c94, %c0_383, %c0_384] : memref<1x123x18x18xf32, #tpu.memory_space<vmem>>, vector<1x1x18x18xf32>
    %571 = vector.shape_cast %570 : vector<1x1x18x18xf32> to vector<18x18xf32>
    %c94_385 = arith.constant 94 : index
    %572 = memref.load %arg1[%c94_385] : memref<123xf32, #tpu.memory_space<smem>>
    %573 = vector.broadcast %572 : f32 to vector<18x18xf32>
    %574 = arith.mulf %571, %573 : vector<18x18xf32>
    %575 = arith.addf %551, %574 : vector<18x18xf32>
    %c0_386 = arith.constant 0 : index
    %c95 = arith.constant 95 : index
    %c0_387 = arith.constant 0 : index
    %c0_388 = arith.constant 0 : index
    %576 = vector.load %arg0[%c0_386, %c95, %c0_387, %c0_388] : memref<1x123x18x18xf32, #tpu.memory_space<vmem>>, vector<1x1x18x18xf32>
    %577 = vector.shape_cast %576 : vector<1x1x18x18xf32> to vector<18x18xf32>
    %c95_389 = arith.constant 95 : index
    %578 = memref.load %arg1[%c95_389] : memref<123xf32, #tpu.memory_space<smem>>
    %579 = vector.broadcast %578 : f32 to vector<18x18xf32>
    %580 = arith.mulf %577, %579 : vector<18x18xf32>
    %581 = arith.addf %557, %580 : vector<18x18xf32>
    %c0_390 = arith.constant 0 : index
    %c96 = arith.constant 96 : index
    %c0_391 = arith.constant 0 : index
    %c0_392 = arith.constant 0 : index
    %582 = vector.load %arg0[%c0_390, %c96, %c0_391, %c0_392] : memref<1x123x18x18xf32, #tpu.memory_space<vmem>>, vector<1x1x18x18xf32>
    %583 = vector.shape_cast %582 : vector<1x1x18x18xf32> to vector<18x18xf32>
    %c96_393 = arith.constant 96 : index
    %584 = memref.load %arg1[%c96_393] : memref<123xf32, #tpu.memory_space<smem>>
    %585 = vector.broadcast %584 : f32 to vector<18x18xf32>
    %586 = arith.mulf %583, %585 : vector<18x18xf32>
    %587 = arith.addf %563, %586 : vector<18x18xf32>
    %c0_394 = arith.constant 0 : index
    %c97 = arith.constant 97 : index
    %c0_395 = arith.constant 0 : index
    %c0_396 = arith.constant 0 : index
    %588 = vector.load %arg0[%c0_394, %c97, %c0_395, %c0_396] : memref<1x123x18x18xf32, #tpu.memory_space<vmem>>, vector<1x1x18x18xf32>
    %589 = vector.shape_cast %588 : vector<1x1x18x18xf32> to vector<18x18xf32>
    %c97_397 = arith.constant 97 : index
    %590 = memref.load %arg1[%c97_397] : memref<123xf32, #tpu.memory_space<smem>>
    %591 = vector.broadcast %590 : f32 to vector<18x18xf32>
    %592 = arith.mulf %589, %591 : vector<18x18xf32>
    %593 = arith.addf %569, %592 : vector<18x18xf32>
    %c0_398 = arith.constant 0 : index
    %c98 = arith.constant 98 : index
    %c0_399 = arith.constant 0 : index
    %c0_400 = arith.constant 0 : index
    %594 = vector.load %arg0[%c0_398, %c98, %c0_399, %c0_400] : memref<1x123x18x18xf32, #tpu.memory_space<vmem>>, vector<1x1x18x18xf32>
    %595 = vector.shape_cast %594 : vector<1x1x18x18xf32> to vector<18x18xf32>
    %c98_401 = arith.constant 98 : index
    %596 = memref.load %arg1[%c98_401] : memref<123xf32, #tpu.memory_space<smem>>
    %597 = vector.broadcast %596 : f32 to vector<18x18xf32>
    %598 = arith.mulf %595, %597 : vector<18x18xf32>
    %599 = arith.addf %575, %598 : vector<18x18xf32>
    %c0_402 = arith.constant 0 : index
    %c99 = arith.constant 99 : index
    %c0_403 = arith.constant 0 : index
    %c0_404 = arith.constant 0 : index
    %600 = vector.load %arg0[%c0_402, %c99, %c0_403, %c0_404] : memref<1x123x18x18xf32, #tpu.memory_space<vmem>>, vector<1x1x18x18xf32>
    %601 = vector.shape_cast %600 : vector<1x1x18x18xf32> to vector<18x18xf32>
    %c99_405 = arith.constant 99 : index
    %602 = memref.load %arg1[%c99_405] : memref<123xf32, #tpu.memory_space<smem>>
    %603 = vector.broadcast %602 : f32 to vector<18x18xf32>
    %604 = arith.mulf %601, %603 : vector<18x18xf32>
    %605 = arith.addf %581, %604 : vector<18x18xf32>
    %c0_406 = arith.constant 0 : index
    %c100 = arith.constant 100 : index
    %c0_407 = arith.constant 0 : index
    %c0_408 = arith.constant 0 : index
    %606 = vector.load %arg0[%c0_406, %c100, %c0_407, %c0_408] : memref<1x123x18x18xf32, #tpu.memory_space<vmem>>, vector<1x1x18x18xf32>
    %607 = vector.shape_cast %606 : vector<1x1x18x18xf32> to vector<18x18xf32>
    %c100_409 = arith.constant 100 : index
    %608 = memref.load %arg1[%c100_409] : memref<123xf32, #tpu.memory_space<smem>>
    %609 = vector.broadcast %608 : f32 to vector<18x18xf32>
    %610 = arith.mulf %607, %609 : vector<18x18xf32>
    %611 = arith.addf %587, %610 : vector<18x18xf32>
    %c0_410 = arith.constant 0 : index
    %c101 = arith.constant 101 : index
    %c0_411 = arith.constant 0 : index
    %c0_412 = arith.constant 0 : index
    %612 = vector.load %arg0[%c0_410, %c101, %c0_411, %c0_412] : memref<1x123x18x18xf32, #tpu.memory_space<vmem>>, vector<1x1x18x18xf32>
    %613 = vector.shape_cast %612 : vector<1x1x18x18xf32> to vector<18x18xf32>
    %c101_413 = arith.constant 101 : index
    %614 = memref.load %arg1[%c101_413] : memref<123xf32, #tpu.memory_space<smem>>
    %615 = vector.broadcast %614 : f32 to vector<18x18xf32>
    %616 = arith.mulf %613, %615 : vector<18x18xf32>
    %617 = arith.addf %593, %616 : vector<18x18xf32>
    %c0_414 = arith.constant 0 : index
    %c102 = arith.constant 102 : index
    %c0_415 = arith.constant 0 : index
    %c0_416 = arith.constant 0 : index
    %618 = vector.load %arg0[%c0_414, %c102, %c0_415, %c0_416] : memref<1x123x18x18xf32, #tpu.memory_space<vmem>>, vector<1x1x18x18xf32>
    %619 = vector.shape_cast %618 : vector<1x1x18x18xf32> to vector<18x18xf32>
    %c102_417 = arith.constant 102 : index
    %620 = memref.load %arg1[%c102_417] : memref<123xf32, #tpu.memory_space<smem>>
    %621 = vector.broadcast %620 : f32 to vector<18x18xf32>
    %622 = arith.mulf %619, %621 : vector<18x18xf32>
    %623 = arith.addf %599, %622 : vector<18x18xf32>
    %c0_418 = arith.constant 0 : index
    %c103 = arith.constant 103 : index
    %c0_419 = arith.constant 0 : index
    %c0_420 = arith.constant 0 : index
    %624 = vector.load %arg0[%c0_418, %c103, %c0_419, %c0_420] : memref<1x123x18x18xf32, #tpu.memory_space<vmem>>, vector<1x1x18x18xf32>
    %625 = vector.shape_cast %624 : vector<1x1x18x18xf32> to vector<18x18xf32>
    %c103_421 = arith.constant 103 : index
    %626 = memref.load %arg1[%c103_421] : memref<123xf32, #tpu.memory_space<smem>>
    %627 = vector.broadcast %626 : f32 to vector<18x18xf32>
    %628 = arith.mulf %625, %627 : vector<18x18xf32>
    %629 = arith.addf %605, %628 : vector<18x18xf32>
    %c0_422 = arith.constant 0 : index
    %c104 = arith.constant 104 : index
    %c0_423 = arith.constant 0 : index
    %c0_424 = arith.constant 0 : index
    %630 = vector.load %arg0[%c0_422, %c104, %c0_423, %c0_424] : memref<1x123x18x18xf32, #tpu.memory_space<vmem>>, vector<1x1x18x18xf32>
    %631 = vector.shape_cast %630 : vector<1x1x18x18xf32> to vector<18x18xf32>
    %c104_425 = arith.constant 104 : index
    %632 = memref.load %arg1[%c104_425] : memref<123xf32, #tpu.memory_space<smem>>
    %633 = vector.broadcast %632 : f32 to vector<18x18xf32>
    %634 = arith.mulf %631, %633 : vector<18x18xf32>
    %635 = arith.addf %611, %634 : vector<18x18xf32>
    %c0_426 = arith.constant 0 : index
    %c105 = arith.constant 105 : index
    %c0_427 = arith.constant 0 : index
    %c0_428 = arith.constant 0 : index
    %636 = vector.load %arg0[%c0_426, %c105, %c0_427, %c0_428] : memref<1x123x18x18xf32, #tpu.memory_space<vmem>>, vector<1x1x18x18xf32>
    %637 = vector.shape_cast %636 : vector<1x1x18x18xf32> to vector<18x18xf32>
    %c105_429 = arith.constant 105 : index
    %638 = memref.load %arg1[%c105_429] : memref<123xf32, #tpu.memory_space<smem>>
    %639 = vector.broadcast %638 : f32 to vector<18x18xf32>
    %640 = arith.mulf %637, %639 : vector<18x18xf32>
    %641 = arith.addf %617, %640 : vector<18x18xf32>
    %c0_430 = arith.constant 0 : index
    %c106 = arith.constant 106 : index
    %c0_431 = arith.constant 0 : index
    %c0_432 = arith.constant 0 : index
    %642 = vector.load %arg0[%c0_430, %c106, %c0_431, %c0_432] : memref<1x123x18x18xf32, #tpu.memory_space<vmem>>, vector<1x1x18x18xf32>
    %643 = vector.shape_cast %642 : vector<1x1x18x18xf32> to vector<18x18xf32>
    %c106_433 = arith.constant 106 : index
    %644 = memref.load %arg1[%c106_433] : memref<123xf32, #tpu.memory_space<smem>>
    %645 = vector.broadcast %644 : f32 to vector<18x18xf32>
    %646 = arith.mulf %643, %645 : vector<18x18xf32>
    %647 = arith.addf %623, %646 : vector<18x18xf32>
    %c0_434 = arith.constant 0 : index
    %c107 = arith.constant 107 : index
    %c0_435 = arith.constant 0 : index
    %c0_436 = arith.constant 0 : index
    %648 = vector.load %arg0[%c0_434, %c107, %c0_435, %c0_436] : memref<1x123x18x18xf32, #tpu.memory_space<vmem>>, vector<1x1x18x18xf32>
    %649 = vector.shape_cast %648 : vector<1x1x18x18xf32> to vector<18x18xf32>
    %c107_437 = arith.constant 107 : index
    %650 = memref.load %arg1[%c107_437] : memref<123xf32, #tpu.memory_space<smem>>
    %651 = vector.broadcast %650 : f32 to vector<18x18xf32>
    %652 = arith.mulf %649, %651 : vector<18x18xf32>
    %653 = arith.addf %629, %652 : vector<18x18xf32>
    %c0_438 = arith.constant 0 : index
    %c108 = arith.constant 108 : index
    %c0_439 = arith.constant 0 : index
    %c0_440 = arith.constant 0 : index
    %654 = vector.load %arg0[%c0_438, %c108, %c0_439, %c0_440] : memref<1x123x18x18xf32, #tpu.memory_space<vmem>>, vector<1x1x18x18xf32>
    %655 = vector.shape_cast %654 : vector<1x1x18x18xf32> to vector<18x18xf32>
    %c108_441 = arith.constant 108 : index
    %656 = memref.load %arg1[%c108_441] : memref<123xf32, #tpu.memory_space<smem>>
    %657 = vector.broadcast %656 : f32 to vector<18x18xf32>
    %658 = arith.mulf %655, %657 : vector<18x18xf32>
    %659 = arith.addf %635, %658 : vector<18x18xf32>
    %c0_442 = arith.constant 0 : index
    %c109 = arith.constant 109 : index
    %c0_443 = arith.constant 0 : index
    %c0_444 = arith.constant 0 : index
    %660 = vector.load %arg0[%c0_442, %c109, %c0_443, %c0_444] : memref<1x123x18x18xf32, #tpu.memory_space<vmem>>, vector<1x1x18x18xf32>
    %661 = vector.shape_cast %660 : vector<1x1x18x18xf32> to vector<18x18xf32>
    %c109_445 = arith.constant 109 : index
    %662 = memref.load %arg1[%c109_445] : memref<123xf32, #tpu.memory_space<smem>>
    %663 = vector.broadcast %662 : f32 to vector<18x18xf32>
    %664 = arith.mulf %661, %663 : vector<18x18xf32>
    %665 = arith.addf %641, %664 : vector<18x18xf32>
    %c0_446 = arith.constant 0 : index
    %c110 = arith.constant 110 : index
    %c0_447 = arith.constant 0 : index
    %c0_448 = arith.constant 0 : index
    %666 = vector.load %arg0[%c0_446, %c110, %c0_447, %c0_448] : memref<1x123x18x18xf32, #tpu.memory_space<vmem>>, vector<1x1x18x18xf32>
    %667 = vector.shape_cast %666 : vector<1x1x18x18xf32> to vector<18x18xf32>
    %c110_449 = arith.constant 110 : index
    %668 = memref.load %arg1[%c110_449] : memref<123xf32, #tpu.memory_space<smem>>
    %669 = vector.broadcast %668 : f32 to vector<18x18xf32>
    %670 = arith.mulf %667, %669 : vector<18x18xf32>
    %671 = arith.addf %647, %670 : vector<18x18xf32>
    %c0_450 = arith.constant 0 : index
    %c111 = arith.constant 111 : index
    %c0_451 = arith.constant 0 : index
    %c0_452 = arith.constant 0 : index
    %672 = vector.load %arg0[%c0_450, %c111, %c0_451, %c0_452] : memref<1x123x18x18xf32, #tpu.memory_space<vmem>>, vector<1x1x18x18xf32>
    %673 = vector.shape_cast %672 : vector<1x1x18x18xf32> to vector<18x18xf32>
    %c111_453 = arith.constant 111 : index
    %674 = memref.load %arg1[%c111_453] : memref<123xf32, #tpu.memory_space<smem>>
    %675 = vector.broadcast %674 : f32 to vector<18x18xf32>
    %676 = arith.mulf %673, %675 : vector<18x18xf32>
    %677 = arith.addf %653, %676 : vector<18x18xf32>
    %c0_454 = arith.constant 0 : index
    %c112 = arith.constant 112 : index
    %c0_455 = arith.constant 0 : index
    %c0_456 = arith.constant 0 : index
    %678 = vector.load %arg0[%c0_454, %c112, %c0_455, %c0_456] : memref<1x123x18x18xf32, #tpu.memory_space<vmem>>, vector<1x1x18x18xf32>
    %679 = vector.shape_cast %678 : vector<1x1x18x18xf32> to vector<18x18xf32>
    %c112_457 = arith.constant 112 : index
    %680 = memref.load %arg1[%c112_457] : memref<123xf32, #tpu.memory_space<smem>>
    %681 = vector.broadcast %680 : f32 to vector<18x18xf32>
    %682 = arith.mulf %679, %681 : vector<18x18xf32>
    %683 = arith.addf %659, %682 : vector<18x18xf32>
    %c0_458 = arith.constant 0 : index
    %c113 = arith.constant 113 : index
    %c0_459 = arith.constant 0 : index
    %c0_460 = arith.constant 0 : index
    %684 = vector.load %arg0[%c0_458, %c113, %c0_459, %c0_460] : memref<1x123x18x18xf32, #tpu.memory_space<vmem>>, vector<1x1x18x18xf32>
    %685 = vector.shape_cast %684 : vector<1x1x18x18xf32> to vector<18x18xf32>
    %c113_461 = arith.constant 113 : index
    %686 = memref.load %arg1[%c113_461] : memref<123xf32, #tpu.memory_space<smem>>
    %687 = vector.broadcast %686 : f32 to vector<18x18xf32>
    %688 = arith.mulf %685, %687 : vector<18x18xf32>
    %689 = arith.addf %665, %688 : vector<18x18xf32>
    %c0_462 = arith.constant 0 : index
    %c114 = arith.constant 114 : index
    %c0_463 = arith.constant 0 : index
    %c0_464 = arith.constant 0 : index
    %690 = vector.load %arg0[%c0_462, %c114, %c0_463, %c0_464] : memref<1x123x18x18xf32, #tpu.memory_space<vmem>>, vector<1x1x18x18xf32>
    %691 = vector.shape_cast %690 : vector<1x1x18x18xf32> to vector<18x18xf32>
    %c114_465 = arith.constant 114 : index
    %692 = memref.load %arg1[%c114_465] : memref<123xf32, #tpu.memory_space<smem>>
    %693 = vector.broadcast %692 : f32 to vector<18x18xf32>
    %694 = arith.mulf %691, %693 : vector<18x18xf32>
    %695 = arith.addf %671, %694 : vector<18x18xf32>
    %c0_466 = arith.constant 0 : index
    %c115 = arith.constant 115 : index
    %c0_467 = arith.constant 0 : index
    %c0_468 = arith.constant 0 : index
    %696 = vector.load %arg0[%c0_466, %c115, %c0_467, %c0_468] : memref<1x123x18x18xf32, #tpu.memory_space<vmem>>, vector<1x1x18x18xf32>
    %697 = vector.shape_cast %696 : vector<1x1x18x18xf32> to vector<18x18xf32>
    %c115_469 = arith.constant 115 : index
    %698 = memref.load %arg1[%c115_469] : memref<123xf32, #tpu.memory_space<smem>>
    %699 = vector.broadcast %698 : f32 to vector<18x18xf32>
    %700 = arith.mulf %697, %699 : vector<18x18xf32>
    %701 = arith.addf %677, %700 : vector<18x18xf32>
    %c0_470 = arith.constant 0 : index
    %c116 = arith.constant 116 : index
    %c0_471 = arith.constant 0 : index
    %c0_472 = arith.constant 0 : index
    %702 = vector.load %arg0[%c0_470, %c116, %c0_471, %c0_472] : memref<1x123x18x18xf32, #tpu.memory_space<vmem>>, vector<1x1x18x18xf32>
    %703 = vector.shape_cast %702 : vector<1x1x18x18xf32> to vector<18x18xf32>
    %c116_473 = arith.constant 116 : index
    %704 = memref.load %arg1[%c116_473] : memref<123xf32, #tpu.memory_space<smem>>
    %705 = vector.broadcast %704 : f32 to vector<18x18xf32>
    %706 = arith.mulf %703, %705 : vector<18x18xf32>
    %707 = arith.addf %683, %706 : vector<18x18xf32>
    %c0_474 = arith.constant 0 : index
    %c117 = arith.constant 117 : index
    %c0_475 = arith.constant 0 : index
    %c0_476 = arith.constant 0 : index
    %708 = vector.load %arg0[%c0_474, %c117, %c0_475, %c0_476] : memref<1x123x18x18xf32, #tpu.memory_space<vmem>>, vector<1x1x18x18xf32>
    %709 = vector.shape_cast %708 : vector<1x1x18x18xf32> to vector<18x18xf32>
    %c117_477 = arith.constant 117 : index
    %710 = memref.load %arg1[%c117_477] : memref<123xf32, #tpu.memory_space<smem>>
    %711 = vector.broadcast %710 : f32 to vector<18x18xf32>
    %712 = arith.mulf %709, %711 : vector<18x18xf32>
    %713 = arith.addf %689, %712 : vector<18x18xf32>
    %c0_478 = arith.constant 0 : index
    %c118 = arith.constant 118 : index
    %c0_479 = arith.constant 0 : index
    %c0_480 = arith.constant 0 : index
    %714 = vector.load %arg0[%c0_478, %c118, %c0_479, %c0_480] : memref<1x123x18x18xf32, #tpu.memory_space<vmem>>, vector<1x1x18x18xf32>
    %715 = vector.shape_cast %714 : vector<1x1x18x18xf32> to vector<18x18xf32>
    %c118_481 = arith.constant 118 : index
    %716 = memref.load %arg1[%c118_481] : memref<123xf32, #tpu.memory_space<smem>>
    %717 = vector.broadcast %716 : f32 to vector<18x18xf32>
    %718 = arith.mulf %715, %717 : vector<18x18xf32>
    %719 = arith.addf %695, %718 : vector<18x18xf32>
    %c0_482 = arith.constant 0 : index
    %c119 = arith.constant 119 : index
    %c0_483 = arith.constant 0 : index
    %c0_484 = arith.constant 0 : index
    %720 = vector.load %arg0[%c0_482, %c119, %c0_483, %c0_484] : memref<1x123x18x18xf32, #tpu.memory_space<vmem>>, vector<1x1x18x18xf32>
    %721 = vector.shape_cast %720 : vector<1x1x18x18xf32> to vector<18x18xf32>
    %c119_485 = arith.constant 119 : index
    %722 = memref.load %arg1[%c119_485] : memref<123xf32, #tpu.memory_space<smem>>
    %723 = vector.broadcast %722 : f32 to vector<18x18xf32>
    %724 = arith.mulf %721, %723 : vector<18x18xf32>
    %725 = arith.addf %701, %724 : vector<18x18xf32>
    %c0_486 = arith.constant 0 : index
    %c120 = arith.constant 120 : index
    %c0_487 = arith.constant 0 : index
    %c0_488 = arith.constant 0 : index
    %726 = vector.load %arg0[%c0_486, %c120, %c0_487, %c0_488] : memref<1x123x18x18xf32, #tpu.memory_space<vmem>>, vector<1x1x18x18xf32>
    %727 = vector.shape_cast %726 : vector<1x1x18x18xf32> to vector<18x18xf32>
    %c120_489 = arith.constant 120 : index
    %728 = memref.load %arg1[%c120_489] : memref<123xf32, #tpu.memory_space<smem>>
    %729 = vector.broadcast %728 : f32 to vector<18x18xf32>
    %730 = arith.mulf %727, %729 : vector<18x18xf32>
    %731 = arith.addf %707, %730 : vector<18x18xf32>
    %c0_490 = arith.constant 0 : index
    %c121 = arith.constant 121 : index
    %c0_491 = arith.constant 0 : index
    %c0_492 = arith.constant 0 : index
    %732 = vector.load %arg0[%c0_490, %c121, %c0_491, %c0_492] : memref<1x123x18x18xf32, #tpu.memory_space<vmem>>, vector<1x1x18x18xf32>
    %733 = vector.shape_cast %732 : vector<1x1x18x18xf32> to vector<18x18xf32>
    %c121_493 = arith.constant 121 : index
    %734 = memref.load %arg1[%c121_493] : memref<123xf32, #tpu.memory_space<smem>>
    %735 = vector.broadcast %734 : f32 to vector<18x18xf32>
    %736 = arith.mulf %733, %735 : vector<18x18xf32>
    %737 = arith.addf %713, %736 : vector<18x18xf32>
    %c0_494 = arith.constant 0 : index
    %c122 = arith.constant 122 : index
    %c0_495 = arith.constant 0 : index
    %c0_496 = arith.constant 0 : index
    %738 = vector.load %arg0[%c0_494, %c122, %c0_495, %c0_496] : memref<1x123x18x18xf32, #tpu.memory_space<vmem>>, vector<1x1x18x18xf32>
    %739 = vector.shape_cast %738 : vector<1x1x18x18xf32> to vector<18x18xf32>
    %c122_497 = arith.constant 122 : index
    %740 = memref.load %arg1[%c122_497] : memref<123xf32, #tpu.memory_space<smem>>
    %741 = vector.broadcast %740 : f32 to vector<18x18xf32>
    %742 = arith.mulf %739, %741 : vector<18x18xf32>
    %743 = arith.addf %719, %742 : vector<18x18xf32>
    %744 = arith.addf %731, %737 : vector<18x18xf32>
    %745 = arith.addf %743, %725 : vector<18x18xf32>
    %746 = arith.addf %744, %745 : vector<18x18xf32>
    %c0_498 = arith.constant 0 : index
    %747 = memref.load %arg2[%c0_498] : memref<1xf32, #tpu.memory_space<smem>>
    %748 = vector.broadcast %747 : f32 to vector<18x18xf32>
    %749 = arith.addf %746, %748 : vector<18x18xf32>
    %c8_499 = arith.constant 8 : index
    %c128 = arith.constant 128 : index
    %750 = vector.load %arg6[%c8_499, %c128] : memref<32x256xf32, #tpu.memory_space<vmem>>, vector<18x18xf32>
    tpu.vector_store %arg6[%c8_499, %c128], %749 {strides = array<i32>} : memref<32x256xf32, #tpu.memory_space<vmem>>, vector<18x18xf32>,
    %c8_500 = arith.constant 8 : index
    %c128_501 = arith.constant 128 : index
    %751 = vector.load %arg6[%c8_500, %c128_501] : memref<32x256xf32, #tpu.memory_space<vmem>>, vector<19x19xf32>
    %c8_502 = arith.constant 8 : index
    %c127 = arith.constant 127 : index
    %752 = vector.load %arg6[%c8_502, %c127] : memref<32x256xf32, #tpu.memory_space<vmem>>, vector<19x19xf32>
    %c7_503 = arith.constant 7 : index
    %c128_504 = arith.constant 128 : index
    %753 = vector.load %arg6[%c7_503, %c128_504] : memref<32x256xf32, #tpu.memory_space<vmem>>, vector<19x19xf32>
    %c7_505 = arith.constant 7 : index
    %c127_506 = arith.constant 127 : index
    %754 = vector.load %arg6[%c7_505, %c127_506] : memref<32x256xf32, #tpu.memory_space<vmem>>, vector<19x19xf32>
    %c0_507 = arith.constant 0 : index
    %755 = memref.load %arg3[%c0_507] : memref<4xf32, #tpu.memory_space<smem>>
    %756 = vector.broadcast %755 : f32 to vector<19x19xf32>
    %757 = arith.mulf %756, %751 : vector<19x19xf32>
    %c1_508 = arith.constant 1 : index
    %758 = memref.load %arg3[%c1_508] : memref<4xf32, #tpu.memory_space<smem>>
    %759 = vector.broadcast %758 : f32 to vector<19x19xf32>
    %760 = arith.mulf %759, %752 : vector<19x19xf32>
    %761 = arith.addf %757, %760 : vector<19x19xf32>
    %c2_509 = arith.constant 2 : index
    %762 = memref.load %arg3[%c2_509] : memref<4xf32, #tpu.memory_space<smem>>
    %763 = vector.broadcast %762 : f32 to vector<19x19xf32>
    %764 = arith.mulf %763, %753 : vector<19x19xf32>
    %765 = arith.addf %761, %764 : vector<19x19xf32>
    %c3_510 = arith.constant 3 : index
    %766 = memref.load %arg3[%c3_510] : memref<4xf32, #tpu.memory_space<smem>>
    %767 = vector.broadcast %766 : f32 to vector<19x19xf32>
    %768 = arith.mulf %767, %754 : vector<19x19xf32>
    %769 = arith.addf %765, %768 : vector<19x19xf32>
    %c0_511 = arith.constant 0 : index
    %770 = memref.load %arg4[%c0_511] : memref<1xf32, #tpu.memory_space<smem>>
    %771 = vector.broadcast %770 : f32 to vector<19x19xf32>
    %772 = arith.addf %769, %771 : vector<19x19xf32>
    %cst_512 = arith.constant 0.000000e+00 : f32
    %773 = vector.broadcast %cst_512 : f32 to vector<19x19xf32>
    %774 = arith.cmpf oge, %772, %773 : vector<19x19xf32>
    %cst_513 = arith.constant 0.00999999977 : f32
    %775 = vector.broadcast %cst_513 : f32 to vector<19x19xf32>
    %776 = arith.mulf %772, %775 : vector<19x19xf32>
    %777 = arith.select %774, %772, %776 : vector<19x19xi1>, vector<19x19xf32>
    %c0_514 = arith.constant 0 : index
    %c0_515 = arith.constant 0 : index
    %c0_516 = arith.constant 0 : index
    %c0_517 = arith.constant 0 : index
    %778 = vector.load %arg5[%c0_514, %c0_515, %c0_516, %c0_517] : memref<1x1x19x19xf32, #tpu.memory_space<vmem>>, vector<1x1x19x19xf32>
    %779 = vector.shape_cast %778 : vector<1x1x19x19xf32> to vector<19x19xf32>
    %780 = vector.shape_cast %777 : vector<19x19xf32> to vector<1x1x19x19xf32>
    tpu.vector_store %arg5[%c0_514, %c0_515, %c0_516, %c0_517], %780 {strides = array<i32>} : memref<1x1x19x19xf32, #tpu.memory_space<vmem>>, vector<1x1x19x19xf32>,
    return
  }
}

</mosaic_0001>

<bundles_post_ra>
// kernel: model_forward.1
= control target key start
LH: loop header
LB: loop body
LE: loop exit
PB: predicated region body
PF: predicated region fallthrough
CT: control target
= control target key end

     0   :  { %12 = vsyncpa [#allocation6], 0  ;;  %s4426_s0 = inlined_call_operand.vmem [shape: f32[1,123,18,18], index: 0, kind: input, shape index: {}]   ;;  %s4427_s1 = inlined_call_operand.vmem [shape: f32[123], index: 1, kind: input, shape index: {}]   ;;  %s4428_s2 = inlined_call_operand.<no memory space> [shape: f32[1], index: 2, kind: input, shape index: {}]   ;;  %s4429_s3 = inlined_call_operand.vmem [shape: f32[4], index: 3, kind: input, shape index: {}]   ;;  %s4430_s4 = inlined_call_operand.<no memory space> [shape: f32[1], index: 4, kind: input, shape index: {}]   ;;  %s4431_s5 = inlined_call_operand.vmem [shape: f32[1,1,19,19], index: 5, kind: output, shape index: {}]  }
   0x1   :  { %s22_s20 = sshll.u32 %s4427_s1, 4  ;;  %s23_s20 = int_to_ptr.vmem [resolvable:$true] %s22_s20 }
   0x2   :  { %13 = vsyncpa [#allocation8], 0  ;;  %s34_s23 = sshll.u32 %s4429_s3, 4  ;;  %s2198_s24 = scalar_lea.vmem %s23_s20, 16  ;;  %s35_s23 = int_to_ptr.vmem [resolvable:$true] %s34_s23 }
   0x3   :  { %p2199_p0 = scmp.ne.s32.totalorder %s23_s20, %s2198_s24  ;;  %p2203_p1 = scmp.lt.s32.totalorder %s23_s20, %s23_s20 }
   0x4   :  { %p2204_p2 = scmp.lt.s32.totalorder %s2198_s24, %s2198_s24 }
   0x6   :  { %p2205_p3 = por %p2204_p2, %p2203_p1 }
   0x8   :  { %p2206_p4 = pnand %p2205_p3, %p2199_p0 }
   0xa   :  { %2209 = shalt.err (!%p2206_p4)
}
   0xb   :  { %s2226_s25 = smov [#allocation5]   ;;  %s2210_s26 = scalar_lea.vmem %s35_s23, 16 }
   0xc   :  { %25 = dma.vmem_to_smem %s23_s20, 16, %s2226_s25, [#allocation6]  }
   0xd   :  { %p2211_p5 = scmp.ne.s32.totalorder %s35_s23, %s2210_s26  ;;  %p2215_p6 = scmp.lt.s32.totalorder %s35_s23, %s35_s23 }
   0xe   :  { %p2216_p7 = scmp.lt.s32.totalorder %s2210_s26, %s2210_s26 }
  0x10   :  { %p2217_p8 = por %p2216_p7, %p2215_p6 }
  0x12   :  { %p2218_p9 = pnand %p2217_p8, %p2211_p5 }
  0x14   :  { %2221 = shalt.err (!%p2218_p9)
}
  0x15   :  { %s2227_s1 = smov [#allocation7]  }
  0x16   :  { %37 = dma.vmem_to_smem %s35_s23, 16, %s2227_s1, [#allocation8]  }
  0x17   :  { %2222 = dma.done.wait [#allocation6], 16  }
  0x18   :  { %2223 = vsyncadd [#allocation6], 4294967280 }
  0x19   :  { %2224 = dma.done.wait [#allocation8], 16  }
  0x1a   :  { %2225 = vsyncadd [#allocation8], 4294967280 }
  0x1b   :  { %46 = sfence }
  0x1c   :  { %s2190_s3 = sld [smem:[#allocation7 + $0x1]]  ;;  %s2192_s27 = sld [smem:[#allocation7 + $0x3]]  ;;  %v2228_v0 = vmov 0.0   ;;  %v56_v1 = vld [vmem:[%s4426_s0 + $0x8] sm:$0xff]  ;;  %v2284_v2 = vstv %s4428_s2  ;;  %vm1610_vm0 = vcmask 1040384   ;;  %v1703_v4 = vld [vmem:[%s4426_s0 + $0x20] sm:$0xff] }
  0x1d   :  { %47 = vst [vmem:[#allocation2] sm:$0xff] %v2228_v0  ;;  %48 = vst [vmem:[#allocation2 + $0x8] sm:$0xff] %v2228_v0  ;;  %s58_s28 = sld [smem:[#allocation5]]  ;;  %s1705_s29 = sld [smem:[#allocation5 + $0x1]]  ;;  %v1707_v5 = vld [vmem:[%s4426_s0 + $0x38] sm:$0xff]  ;;  %v1711_v6 = vld [vmem:[%s4426_s0 + $0x50] sm:$0xff] }
  0x1e   :  { %50 = vst [vmem:[#allocation2 + $0x18] sm:$0xff] %v2228_v0  ;;  %52 = vst [vmem:[#allocation2 + $0x28] sm:$0xff] %v2228_v0  ;;  %s1709_s30 = sld [smem:[#allocation5 + $0x2]]  ;;  %s2266_s6 = sld [smem:[#allocation5 + $0x3]]  ;;  %v1715_v10 = vld [vmem:[%s4426_s0 + $0x68] sm:$0xff]  ;;  %v1719_v11 = vld [vmem:[%s4426_s0 + $0x80] sm:$0xff] }
  0x1f   :  { %53 = vst [vmem:[#allocation2 + $0x30] sm:$0xff] %v2228_v0  ;;  %54 = vst [vmem:[#allocation2 + $0x38] sm:$0xff] %v2228_v0  ;;  %s2268_s7 = sld [smem:[#allocation5 + $0x4]]  ;;  %s2270_s8 = sld [smem:[#allocation5 + $0x5]]  ;;  %v1723_v22 = vld [vmem:[%s4426_s0 + $0x98] sm:$0xff]  ;;  %v1727_v27 = vld [vmem:[%s4426_s0 + $0xb0] sm:$0xff] }
  0x20   :  { %s2272_s9 = sld [smem:[#allocation5 + $0x6]]  ;;  %s2277_s12 = sld [smem:[#allocation5 + $0x7]]  ;;  %v1731_v32 = vld [vmem:[%s4426_s0 + $0xc8] sm:$0xff]  ;;  %v1735_v36 = vld [vmem:[%s4426_s0 + $0xe0] sm:$0xff]  ;;  %v1739_v41 = vld [vmem:[%s4426_s0 + $0xf8] sm:$0xff]  ;;  %vm1544_vm1 = vcmask 146432  }
  0x21   :  { %s2279_s13 = sld [smem:[#allocation5 + $0x8]]  ;;  %s2297_s22 = sld [smem:[#allocation5 + $0x9]]  ;;  %v1743_v42 = vld [vmem:[%s4426_s0 + $0x110] sm:$0xff]  ;;  %v1747_v47 = vld [vmem:[%s4426_s0 + $0x128] sm:$0xff]  ;;  %v1751_v52 = vld [vmem:[%s4426_s0 + $0x140] sm:$0xff]  ;;  %vm1547_vm2 = vcmask 140288  }
  0x22   :  { %v2286_v3 = vstv %s2190_s3  ;;  %v2300_v8 = vstv %s2192_s27  ;;  %s2310_s26 = sld [smem:[#allocation5 + $0xa]]  ;;  %s2312_s1 = sld [smem:[#allocation5 + $0xb]]  ;;  %v1755_v53 = vld [vmem:[%s4426_s0 + $0x158] sm:$0xff]  ;;  %v1759_v58 = vld [vmem:[%s4426_s0 + $0x170] sm:$0xff]  ;;  %vm1590_vm3 = vcmask 7168   ;;  %vm1691_vm4 = vcmask 154624  }
  0x23   :  { %v1566_v7 = vmul.f32 0.0, %v2286_v3  ;;  %4611 = vst [vmem:[#allocation11_spill] sm:$0xff] %v2300_v8  ;;  %v2302_v9 = vstv %s58_s28  ;;  %v1628_v12 = vmul.f32 0.0, %v2300_v8  ;;  %v2316_v16 = vstv %s1705_s29  ;;  %s2320_s3 = sld [smem:[#allocation5 + $0xc]]  ;;  %s2229_s27 = smov 1   ;;  %v1763_v63 = vld [vmem:[%s4426_s0 + $0x188] sm:$0xff] }
  0x24   :  { %4612 = vst [vmem:[#allocation12_spill] sm:$0xff] %v2302_v9  ;;  %v1557_v14 = vld [vmem:[#allocation2] sm:$0x80]  ;;  %v61_v15 = vmul.f32 %v2302_v9, %v56_v1  ;;  %v2318_v17 = vstv %s1709_s30  ;;  %v73_v20 = vmul.f32 %v1703_v4, %v2316_v16  ;;  %v2328_v21 = vstv %s2266_s6  ;;  %s2333_s30 = sld [smem:[#allocation5 + $0xd]]  ;;  %s2335_s10 = sld [smem:[#allocation5 + $0xe]] }
  0x25   :  { %1578 = vrot.lane.b32.xlu0 %v1566_v7, %s2229_s27  ;;  %v1626_v19 = vmul.f32 %v2300_v8, %v1557_v14  ;;  %1582 = vrot.lane.b32.xlu1 %v1566_v7, %s2229_s27  ;;  %v2337_v23 = vrot.slane %v1628_v12, 7  ;;  %v85_v24 = vmul.f32 %v1707_v5, %v2318_v17  ;;  %v97_v25 = vmul.f32 %v1711_v6, %v2328_v21  ;;  %s2347_s14 = sld [smem:[#allocation5 + $0xf]]  ;;  %s2361_s17 = sld [smem:[#allocation5 + $0x11]]  ;;  %v1767_v6 = vld [vmem:[%s4426_s0 + $0x1a0] sm:$0xff]  ;;  %v1771_v7 = vld [vmem:[%s4426_s0 + $0x1b8] sm:$0xff] }
  0x26   :  { %v1554_v13 = vld [vmem:[#allocation2 + $0x30] sm:$0x7]  ;;  %v2342_v26 = vstv %s2268_s7  ;;  %v2351_v30 = vstv %s2270_s8  ;;  %v2354_v31 = vstv %s2272_s9  ;;  %s2359_s7 = sld [smem:[#allocation5 + $0x10]]  ;;  %v2366_v35 = vstv %s2277_s12  ;;  %s2371_s9 = sld [smem:[#allocation5 + $0x12]] }
  0x27   :  { %v1570_v18 = vmul.f32 %v2286_v3, %v1554_v13  ;;  %4613 = vst [vmem:[#allocation13_spill] sm:$0xff] %v2337_v23  ;;  %v1642_v28 = vrot.slane %v1626_v19, 7  ;;  %v109_v29 = vmul.f32 %v1715_v10, %v2342_v26  ;;  %4614 = vst [vmem:[#allocation14_spill] sm:$0xff] %v2354_v31  ;;  %v121_v33 = vmul.f32 %v1719_v11, %v2351_v30  ;;  %s2386_s2 = sld [smem:[#allocation5 + $0x13]]  ;;  %s2388_s23 = sld [smem:[#allocation5 + $0x14]]  ;;  %v1775_v14 = vld [vmem:[%s4426_s0 + $0x1d0] sm:$0xff] }
  0x28   :  { %v133_v34 = vmul.f32 %v1723_v22, %v2354_v31  ;;  %4615 = vst [vmem:[#allocation15_spill] sm:$0xff] %v2366_v35  ;;  %v145_v39 = vmul.f32 %v1727_v27, %v2366_v35  ;;  %v2378_v40 = vstv %s2279_s13  ;;  %v2392_v46 = vstv %s2297_s22  ;;  %s2410_s11 = sld [smem:[#allocation5 + $0x15]]  ;;  %s2412_s6 = sld [smem:[#allocation5 + $0x16]]  ;;  %v1779_v22 = vld [vmem:[%s4426_s0 + $0x1e8] sm:$0xff] }
  0x29   :  { %1586 = vrot.lane.b32.xlu0 %v1570_v18, %s2229_s27  ;;  %v1644_v37 = vsel %vm1610_vm0, %v1642_v28, %v2337_v23  ;;  %v112_v38 = vadd.f32 %v109_v29, %v61_v15  ;;  %v124_v43 = vadd.f32 %v121_v33, %v73_v20  ;;  %v157_v45 = vmul.f32 %v1731_v32, %v2378_v40  ;;  %s2422_s15 = sld [smem:[#allocation5 + $0x17]]  ;;  %s2435_s18 = sld [smem:[#allocation5 + $0x18]] }
  0x2a   :  { %v136_v44 = vadd.f32 %v133_v34, %v85_v24  ;;  %v148_v48 = vadd.f32 %v145_v39, %v97_v25  ;;  %v169_v49 = vmul.f32 %v1735_v36, %v2392_v46  ;;  %v2399_v50 = vstv %s2310_s26  ;;  %s2437_s8 = sld [smem:[#allocation5 + $0x19]]  ;;  %s2447_s20 = sld [smem:[#allocation5 + $0x1a]]  ;;  %v1783_v24 = vld [vmem:[%s4426_s0 + $0x200] sm:$0xff]  ;;  %v1787_v25 = vld [vmem:[%s4426_s0 + $0x218] sm:$0xff] }
  0x2b   :  { %v2402_v51 = vstv %s2312_s1  ;;  %v160_v54 = vadd.f32 %v157_v45, %v112_v38  ;;  %v181_v55 = vmul.f32 %v1739_v41, %v2399_v50  ;;  %v2417_v57 = vstv %s2320_s3  ;;  %s2461_s24 = sld [smem:[#allocation5 + $0x1b]]  ;;  %s2463_s25 = sld [smem:[#allocation5 + $0x1c]] }
  0x2c   :  { %v193_v56 = vmul.f32 %v1743_v42, %v2402_v51  ;;  %v172_v59 = vadd.f32 %v169_v49, %v124_v43  ;;  %v205_v60 = vmul.f32 %v1747_v47, %v2417_v57  ;;  %v2427_v61 = vstv %s2333_s30  ;;  %s2488_s26 = sld [smem:[#allocation5 + $0x1d]]  ;;  %s2490_s1 = sld [smem:[#allocation5 + $0x1e]]  ;;  %v1791_v43 = vld [vmem:[%s4426_s0 + $0x230] sm:$0xff] }
  0x2d   :  { %1656 = vrot.lane.b32.xlu0 %v1644_v37, %s2229_s27  ;;  %v2430_v62 = vstv %s2335_s10  ;;  %v184_v0 = vadd.f32 %v181_v55, %v136_v44  ;;  %v217_v4 = vmul.f32 %v1751_v52, %v2427_v61  ;;  %v2450_v11 = vstv %s2347_s14  ;;  %s2494_s3 = sld [smem:[#allocation5 + $0x1f]]  ;;  %v1795_v44 = vld [vmem:[%s4426_s0 + $0x248] sm:$0xff]  ;;  %s2509_s12 = sld [smem:[#allocation5 + $0x20]] }
  0x2e   :  { %v196_v1 = vadd.f32 %v193_v56, %v148_v48  ;;  %v229_v5 = vmul.f32 %v1755_v53, %v2430_v62  ;;  %v208_v10 = vadd.f32 %v205_v60, %v160_v54  ;;  %v2453_v12 = vstv %s2359_s7  ;;  %s2511_s19 = sld [smem:[#allocation5 + $0x21]]  ;;  %v1799_v52 = vld [vmem:[%s4426_s0 + $0x260] sm:$0xff]  ;;  %v1803_v53 = vld [vmem:[%s4426_s0 + $0x278] sm:$0xff]  ;;  %s2521_s21 = sld [smem:[#allocation5 + $0x22]] }
  0x2f   :  { %v2456_v13 = vstv %s2361_s17  ;;  %v220_v15 = vadd.f32 %v217_v4, %v172_v59  ;;  %v241_v19 = vmul.f32 %v1759_v58, %v2450_v11  ;;  %v253_v20 = vmul.f32 %v1763_v63, %v2453_v12  ;;  %v1807_v59 = vld [vmem:[%s4426_s0 + $0x290] sm:$0xff]  ;;  %s2535_s7 = sld [smem:[#allocation5 + $0x23]]  ;;  %s2537_s17 = sld [smem:[#allocation5 + $0x24]]  ;;  %v1811_v4 = vld [vmem:[%s4426_s0 + $0x2a8] sm:$0xff] }
  0x30   :  { %v232_v18 = vadd.f32 %v229_v5, %v184_v0  ;;  %v265_v27 = vmul.f32 %v1767_v6, %v2456_v13  ;;  %v2480_v28 = vstv %s2371_s9  ;;  %v2483_v29 = vstv %s2386_s2  ;;  %v1815_v5 = vld [vmem:[%s4426_s0 + $0x2c0] sm:$0xff]  ;;  %s2560_s9 = sld [smem:[#allocation5 + $0x25]]  ;;  %s2562_s2 = sld [smem:[#allocation5 + $0x26]] }
  0x31   :  { %1660 = vrot.lane.b32.xlu0 %v2337_v23, %s2229_s27  ;;  %v2486_v32 = vstv %s2388_s23  ;;  %v244_v33 = vadd.f32 %v241_v19, %v196_v1  ;;  %v256_v34 = vadd.f32 %v253_v20, %v208_v10  ;;  %v277_v36 = vmul.f32 %v1771_v7, %v2480_v28  ;;  %s2593_s13 = sld [smem:[#allocation5 + $0x2a]]  ;;  %s2607_s28 = sld [smem:[#allocation5 + $0x2b]] }
  0x32   :  { %v289_v37 = vmul.f32 %v1775_v14, %v2483_v29  ;;  %v268_v38 = vadd.f32 %v265_v27, %v220_v15  ;;  %v301_v39 = vmul.f32 %v1779_v22, %v2486_v32  ;;  %v2498_v41 = vstv %s2410_s11  ;;  %v1819_v15 = vld [vmem:[%s4426_s0 + $0x2d8] sm:$0xff]  ;;  %s2581_s11 = sld [smem:[#allocation5 + $0x28]]  ;;  %s2665_s14 = sld [smem:[#allocation5 + $0x32]] }
  0x33   :  { %v2501_v42 = vstv %s2412_s6  ;;  %v280_v45 = vadd.f32 %v277_v36, %v232_v18  ;;  %v313_v48 = vmul.f32 %v1783_v24, %v2498_v41  ;;  %v2524_v55 = vstv %s2422_s15  ;;  %v1827_v36 = vld [vmem:[%s4426_s0 + $0x308] sm:$0xff]  ;;  %s2583_s6 = sld [smem:[#allocation5 + $0x29]]  ;;  %s2737_s15 = sld [smem:[#allocation5 + $0x3a]] }
  0x34   :  { %v292_v47 = vadd.f32 %v289_v37, %v244_v33  ;;  %v325_v49 = vmul.f32 %v1787_v25, %v2501_v42  ;;  %v304_v54 = vadd.f32 %v301_v39, %v256_v34  ;;  %v2527_v56 = vstv %s2435_s18  ;;  %v1823_v34 = vld [vmem:[%s4426_s0 + $0x2f0] sm:$0xff]  ;;  %s2609_s18 = sld [smem:[#allocation5 + $0x2c]] }
  0x35   :  { %v2530_v58 = vstv %s2437_s8  ;;  %v316_v60 = vadd.f32 %v313_v48, %v268_v38  ;;  %v337_v0 = vmul.f32 %v1791_v43, %v2524_v55  ;;  %v349_v1 = vmul.f32 %v1795_v44, %v2527_v56  ;;  %v1831_v44 = vld [vmem:[%s4426_s0 + $0x320] sm:$0xff]  ;;  %s2679_s8 = sld [smem:[#allocation5 + $0x33]] }
  0x36   :  { %v328_v63 = vadd.f32 %v325_v49, %v280_v45  ;;  %v361_v6 = vmul.f32 %v1799_v52, %v2530_v58  ;;  %v2549_v7 = vstv %s2447_s20  ;;  %v2552_v10 = vstv %s2461_s24  ;;  %s2566_s20 = sld [smem:[#allocation5 + $0x27]]  ;;  %v1835_v45 = vld [vmem:[%s4426_s0 + $0x338] sm:$0xff]  ;;  %s2632_s24 = sld [smem:[#allocation5 + $0x2d]] }
  0x37   :  { %v2555_v14 = vstv %s2463_s25  ;;  %v340_v18 = vadd.f32 %v337_v0, %v292_v47  ;;  %v352_v19 = vadd.f32 %v349_v1, %v304_v54  ;;  %v373_v20 = vmul.f32 %v1803_v53, %v2549_v7  ;;  %v1839_v53 = vld [vmem:[%s4426_s0 + $0x350] sm:$0xff]  ;;  %v1843_v0 = vld [vmem:[%s4426_s0 + $0x368] sm:$0xff]  ;;  %v1847_v1 = vld [vmem:[%s4426_s0 + $0x380] sm:$0xff]  ;;  %s2634_s25 = sld [smem:[#allocation5 + $0x2e]] }
  0x38   :  { %v385_v22 = vmul.f32 %v1807_v59, %v2552_v10  ;;  %v364_v24 = vadd.f32 %v361_v6, %v316_v60  ;;  %v397_v25 = vmul.f32 %v1811_v4, %v2555_v14  ;;  %v2570_v27 = vstv %s2488_s26  ;;  %s2653_s26 = sld [smem:[#allocation5 + $0x30]] }
  0x39   :  { %v2573_v33 = vstv %s2490_s1  ;;  %v376_v37 = vadd.f32 %v373_v20, %v328_v63  ;;  %v409_v39 = vmul.f32 %v1815_v5, %v2570_v27  ;;  %v2596_v48 = vstv %s2494_s3  ;;  %s2655_s1 = sld [smem:[#allocation5 + $0x31]]  ;;  %s2809_s3 = sld [smem:[#allocation5 + $0x42]] }
  0x3a   :  { %v388_v38 = vadd.f32 %v385_v22, %v340_v18  ;;  %v421_v43 = vmul.f32 %v1819_v15, %v2573_v33  ;;  %v400_v47 = vadd.f32 %v397_v25, %v352_v19  ;;  %v2599_v49 = vstv %s2509_s12  ;;  %v1851_v18 = vld [vmem:[%s4426_s0 + $0x398] sm:$0xff]  ;;  %s2681_s12 = sld [smem:[#allocation5 + $0x34]] }
  0x3b   :  { %v2602_v52 = vstv %s2511_s19  ;;  %v412_v54 = vadd.f32 %v409_v39, %v364_v24  ;;  %v433_v60 = vmul.f32 %v1823_v34, %v2596_v48  ;;  %v445_v63 = vmul.f32 %v1827_v36, %v2599_v49  ;;  %v1859_v39 = vld [vmem:[%s4426_s0 + $0x3c8] sm:$0xff]  ;;  %s2751_s19 = sld [smem:[#allocation5 + $0x3b]] }
  0x3c   :  { %v424_v59 = vadd.f32 %v421_v43, %v376_v37  ;;  %v457_v4 = vmul.f32 %v1831_v44, %v2602_v52  ;;  %v2621_v5 = vstv %s2521_s21  ;;  %v2624_v6 = vstv %s2535_s7  ;;  %s2638_s21 = sld [smem:[#allocation5 + $0x2f]]  ;;  %s2704_s7 = sld [smem:[#allocation5 + $0x35]] }
  0x3d   :  { %4616 = vst [vmem:[#allocation16_spill] sm:$0xff] %v2624_v6  ;;  %v2627_v15 = vstv %s2537_s17  ;;  %v436_v19 = vadd.f32 %v433_v60, %v388_v38  ;;  %v448_v20 = vadd.f32 %v445_v63, %v400_v47  ;;  %v469_v22 = vmul.f32 %v1835_v45, %v2621_v5  ;;  %v1855_v38 = vld [vmem:[%s4426_s0 + $0x3b0] sm:$0xff]  ;;  %s2706_s17 = sld [smem:[#allocation5 + $0x36]] }
  0x3e   :  { %4617 = vst [vmem:[#allocation17_spill] sm:$0xff] %v2627_v15  ;;  %v481_v24 = vmul.f32 %v1839_v53, %v2624_v6  ;;  %v460_v25 = vadd.f32 %v457_v4, %v412_v54  ;;  %v493_v34 = vmul.f32 %v1843_v0, %v2627_v15  ;;  %v2642_v36 = vstv %s2560_s9  ;;  %v1863_v53 = vld [vmem:[%s4426_s0 + $0x3e0] sm:$0xff]  ;;  %v1867_v54 = vld [vmem:[%s4426_s0 + $0x3f8] sm:$0xff]  ;;  %s2725_s9 = sld [smem:[#allocation5 + $0x38]] }
  0x3f   :  { %4618 = vst [vmem:[#allocation18_spill] sm:$0xff] %v2642_v36  ;;  %v2645_v37 = vstv %s2562_s2  ;;  %v472_v43 = vadd.f32 %v469_v22, %v424_v59  ;;  %v505_v45 = vmul.f32 %v1847_v1, %v2642_v36  ;;  %v2668_v59 = vstv %s2566_s20  ;;  %v1871_v1 = vld [vmem:[%s4426_s0 + $0x410] sm:$0xff]  ;;  %v1875_v22 = vld [vmem:[%s4426_s0 + $0x428] sm:$0xff]  ;;  %s2727_s2 = sld [smem:[#allocation5 + $0x39]]  ;;  %s2881_s20 = sld [smem:[#allocation5 + $0x4a]] }
  0x40   :  { %4619 = vst [vmem:[#allocation19_spill] sm:$0xff] %v2645_v37  ;;  %v484_v44 = vadd.f32 %v481_v24, %v436_v19  ;;  %v517_v47 = vmul.f32 %v1851_v18, %v2645_v37  ;;  %v496_v60 = vadd.f32 %v493_v34, %v448_v20  ;;  %4620 = vst [vmem:[#allocation20_spill] sm:$0xff] %v2668_v59  ;;  %v2671_v63 = vstv %s2581_s11  ;;  %v1879_v24 = vld [vmem:[%s4426_s0 + $0x440] sm:$0xff]  ;;  %s2753_s11 = sld [smem:[#allocation5 + $0x3c]]  ;;  %v2175_v37 = vld [vmem:[%s4426_s0 + $0xb30] sm:$0xff] }
  0x41   :  { %4621 = vst [vmem:[#allocation21_spill] sm:$0xff] %v2671_v63  ;;  %v2674_v0 = vstv %s2583_s6  ;;  %v508_v4 = vadd.f32 %v505_v45, %v460_v25  ;;  %v529_v19 = vmul.f32 %v1855_v38, %v2668_v59  ;;  %v541_v20 = vmul.f32 %v1859_v39, %v2671_v63  ;;  %v1883_v38 = vld [vmem:[%s4426_s0 + $0x458] sm:$0xff]  ;;  %s2823_s6 = sld [smem:[#allocation5 + $0x43]] }
  0x42   :  { %4622 = vst [vmem:[#allocation22_spill] sm:$0xff] %v2674_v0  ;;  %v520_v18 = vadd.f32 %v517_v47, %v472_v43  ;;  %v553_v34 = vmul.f32 %v1863_v53, %v2674_v0  ;;  %v2693_v23 = vstv %s2593_s13  ;;  %v2696_v25 = vstv %s2607_s28  ;;  %s2710_s13 = sld [smem:[#allocation5 + $0x37]]  ;;  %s2776_s28 = sld [smem:[#allocation5 + $0x3d]] }
  0x43   :  { %4623 = vst [vmem:[#allocation23_spill] sm:$0xff] %v2693_v23  ;;  %4624 = vst [vmem:[#allocation24_spill] sm:$0xff] %v2696_v25  ;;  %v2699_v43 = vstv %s2609_s18  ;;  %v532_v39 = vadd.f32 %v529_v19, %v484_v44  ;;  %v544_v45 = vadd.f32 %v541_v20, %v496_v60  ;;  %v565_v47 = vmul.f32 %v1867_v54, %v2693_v23  ;;  %v1887_v44 = vld [vmem:[%s4426_s0 + $0x470] sm:$0xff]  ;;  %v1891_v54 = vld [vmem:[%s4426_s0 + $0x488] sm:$0xff]  ;;  %s2778_s18 = sld [smem:[#allocation5 + $0x3e]] }
  0x44   :  { %4625 = vst [vmem:[#allocation25_spill] sm:$0xff] %v2699_v43  ;;  %v577_v53 = vmul.f32 %v1871_v1, %v2696_v25  ;;  %v556_v8 = vadd.f32 %v553_v34, %v508_v4  ;;  %v589_v0 = vmul.f32 %v1875_v22, %v2699_v43  ;;  %v2714_v63 = vstv %s2632_s24  ;;  %v1895_v20 = vld [vmem:[%s4426_s0 + $0x4a0] sm:$0xff]  ;;  %v1899_v22 = vld [vmem:[%s4426_s0 + $0x4b8] sm:$0xff]  ;;  %s2797_s24 = sld [smem:[#allocation5 + $0x40]] }
  0x45   :  { %4626 = vst [vmem:[#allocation26_spill] sm:$0xff] %v2714_v63  ;;  %v2717_v59 = vstv %s2634_s25  ;;  %v568_v60 = vadd.f32 %v565_v47, %v520_v18  ;;  %v601_v4 = vmul.f32 %v1879_v24, %v2714_v63  ;;  %v2740_v18 = vstv %s2638_s21  ;;  %v1911_v63 = vld [vmem:[%s4426_s0 + $0x500] sm:$0xff]  ;;  %s2799_s25 = sld [smem:[#allocation5 + $0x41]]  ;;  %s2953_s21 = sld [smem:[#allocation5 + $0x52]] }
  0x46   :  { %4627 = vst [vmem:[#allocation27_spill] sm:$0xff] %v2717_v59  ;;  %v580_v1 = vadd.f32 %v577_v53, %v532_v39  ;;  %v613_v19 = vmul.f32 %v1883_v38, %v2717_v59  ;;  %v592_v34 = vadd.f32 %v589_v0, %v544_v45  ;;  %4628 = vst [vmem:[#allocation28_spill] sm:$0xff] %v2740_v18  ;;  %v2743_v39 = vstv %s2653_s26  ;;  %v1903_v38 = vld [vmem:[%s4426_s0 + $0x4d0] sm:$0xff]  ;;  %v1907_v45 = vld [vmem:[%s4426_s0 + $0x4e8] sm:$0xff]  ;;  %s2825_s26 = sld [smem:[#allocation5 + $0x44]] }
  0x47   :  { %4629 = vst [vmem:[#allocation29_spill] sm:$0xff] %v2743_v39  ;;  %v2746_v24 = vstv %s2655_s1  ;;  %v604_v47 = vadd.f32 %v601_v4, %v556_v8  ;;  %v625_v59 = vmul.f32 %v1887_v44, %v2740_v18  ;;  %v637_v0 = vmul.f32 %v1891_v54, %v2743_v39  ;;  %v1915_v44 = vld [vmem:[%s4426_s0 + $0x518] sm:$0xff]  ;;  %s2895_s1 = sld [smem:[#allocation5 + $0x4b]] }
  0x48   :  { %4630 = vst [vmem:[#allocation30_spill] sm:$0xff] %v2746_v24  ;;  %v616_v53 = vadd.f32 %v613_v19, %v568_v60  ;;  %v649_v43 = vmul.f32 %v1895_v20, %v2746_v24  ;;  %v2765_v25 = vstv %s2665_s14  ;;  %v2768_v8 = vstv %s2679_s8  ;;  %s2782_s14 = sld [smem:[#allocation5 + $0x3f]]  ;;  %s2848_s8 = sld [smem:[#allocation5 + $0x45]] }
  0x49   :  { %4631 = vst [vmem:[#allocation31_spill] sm:$0xff] %v2765_v25  ;;  %4632 = vst [vmem:[#allocation32_spill] sm:$0xff] %v2768_v8  ;;  %v2771_v60 = vstv %s2681_s12  ;;  %v628_v54 = vadd.f32 %v625_v59, %v580_v1  ;;  %v640_v4 = vadd.f32 %v637_v0, %v592_v34  ;;  %v661_v19 = vmul.f32 %v1899_v22, %v2765_v25  ;;  %v1919_v59 = vld [vmem:[%s4426_s0 + $0x530] sm:$0xff]  ;;  %v1923_v1 = vld [vmem:[%s4426_s0 + $0x548] sm:$0xff]  ;;  %s2850_s12 = sld [smem:[#allocation5 + $0x46]] }
  0x4a   :  { %4633 = vst [vmem:[#allocation33_spill] sm:$0xff] %v2771_v60  ;;  %v673_v20 = vmul.f32 %v1903_v38, %v2768_v8  ;;  %v652_v24 = vadd.f32 %v649_v43, %v604_v47  ;;  %v685_v39 = vmul.f32 %v1907_v45, %v2771_v60  ;;  %v2786_v18 = vstv %s2704_s7  ;;  %v1927_v47 = vld [vmem:[%s4426_s0 + $0x560] sm:$0xff]  ;;  %v1931_v0 = vld [vmem:[%s4426_s0 + $0x578] sm:$0xff]  ;;  %s2869_s7 = sld [smem:[#allocation5 + $0x48]] }
  0x4b   :  { %4634 = vst [vmem:[#allocation34_spill] sm:$0xff] %v2786_v18  ;;  %v2789_v23 = vstv %s2706_s17  ;;  %v664_v43 = vadd.f32 %v661_v19, %v616_v53  ;;  %v697_v34 = vmul.f32 %v1911_v63, %v2786_v18  ;;  %v2812_v53 = vstv %s2710_s13  ;;  %v1943_v18 = vld [vmem:[%s4426_s0 + $0x5c0] sm:$0xff]  ;;  %s2871_s17 = sld [smem:[#allocation5 + $0x49]]  ;;  %s3025_s13 = sld [smem:[#allocation5 + $0x5a]] }
  0x4c   :  { %4635 = vst [vmem:[#allocation35_spill] sm:$0xff] %v2789_v23  ;;  %v676_v22 = vadd.f32 %v673_v20, %v628_v54  ;;  %v709_v38 = vmul.f32 %v1915_v44, %v2789_v23  ;;  %v688_v45 = vadd.f32 %v685_v39, %v640_v4  ;;  %4636 = vst [vmem:[#allocation36_spill] sm:$0xff] %v2812_v53  ;;  %v2815_v54 = vstv %s2725_s9  ;;  %v1935_v44 = vld [vmem:[%s4426_s0 + $0x590] sm:$0xff]  ;;  %v1939_v4 = vld [vmem:[%s4426_s0 + $0x5a8] sm:$0xff]  ;;  %s2897_s9 = sld [smem:[#allocation5 + $0x4c]] }
  0x4d   :  { %4637 = vst [vmem:[#allocation37_spill] sm:$0xff] %v2815_v54  ;;  %v2818_v63 = vstv %s2727_s2  ;;  %v700_v19 = vadd.f32 %v697_v34, %v652_v24  ;;  %v721_v23 = vmul.f32 %v1919_v59, %v2812_v53  ;;  %v733_v39 = vmul.f32 %v1923_v1, %v2815_v54  ;;  %v1947_v59 = vld [vmem:[%s4426_s0 + $0x5d8] sm:$0xff]  ;;  %s2967_s2 = sld [smem:[#allocation5 + $0x53]] }
  0x4e   :  { %4638 = vst [vmem:[#allocation38_spill] sm:$0xff] %v2818_v63  ;;  %v712_v20 = vadd.f32 %v709_v38, %v664_v43  ;;  %v745_v60 = vmul.f32 %v1927_v47, %v2818_v63  ;;  %v2837_v8 = vstv %s2737_s15  ;;  %v2840_v24 = vstv %s2751_s19  ;;  %s2854_s15 = sld [smem:[#allocation5 + $0x47]]  ;;  %s2920_s19 = sld [smem:[#allocation5 + $0x4d]] }
  0x4f   :  { %4639 = vst [vmem:[#allocation39_spill] sm:$0xff] %v2837_v8  ;;  %4640 = vst [vmem:[#allocation40_spill] sm:$0xff] %v2840_v24  ;;  %v2843_v43 = vstv %s2753_s11  ;;  %v724_v1 = vadd.f32 %v721_v23, %v676_v22  ;;  %v736_v34 = vadd.f32 %v733_v39, %v688_v45  ;;  %v757_v38 = vmul.f32 %v1931_v0, %v2837_v8  ;;  %v1951_v23 = vld [vmem:[%s4426_s0 + $0x5f0] sm:$0xff]  ;;  %v1955_v22 = vld [vmem:[%s4426_s0 + $0x608] sm:$0xff]  ;;  %s2922_s11 = sld [smem:[#allocation5 + $0x4e]] }
  0x50   :  { %4641 = vst [vmem:[#allocation41_spill] sm:$0xff] %v2843_v43  ;;  %v769_v47 = vmul.f32 %v1935_v44, %v2840_v24  ;;  %v748_v63 = vadd.f32 %v745_v60, %v700_v19  ;;  %v781_v54 = vmul.f32 %v1939_v4, %v2843_v43  ;;  %v2858_v53 = vstv %s2776_s28  ;;  %v1959_v19 = vld [vmem:[%s4426_s0 + $0x620] sm:$0xff]  ;;  %v1963_v39 = vld [vmem:[%s4426_s0 + $0x638] sm:$0xff]  ;;  %s2941_s28 = sld [smem:[#allocation5 + $0x50]] }
  0x51   :  { %4642 = vst [vmem:[#allocation42_spill] sm:$0xff] %v2858_v53  ;;  %v2861_v25 = vstv %s2778_s18  ;;  %v760_v60 = vadd.f32 %v757_v38, %v712_v20  ;;  %v793_v45 = vmul.f32 %v1943_v18, %v2858_v53  ;;  %v2884_v20 = vstv %s2782_s14  ;;  %v1975_v53 = vld [vmem:[%s4426_s0 + $0x680] sm:$0xff]  ;;  %s2943_s18 = sld [smem:[#allocation5 + $0x51]]  ;;  %s3097_s14 = sld [smem:[#allocation5 + $0x62]] }
  0x52   :  { %4643 = vst [vmem:[#allocation43_spill] sm:$0xff] %v2861_v25  ;;  %v772_v0 = vadd.f32 %v769_v47, %v724_v1  ;;  %v805_v44 = vmul.f32 %v1947_v59, %v2861_v25  ;;  %v784_v4 = vadd.f32 %v781_v54, %v736_v34  ;;  %4644 = vst [vmem:[#allocation44_spill] sm:$0xff] %v2884_v20  ;;  %v2887_v1 = vstv %s2797_s24  ;;  %v1967_v59 = vld [vmem:[%s4426_s0 + $0x650] sm:$0xff]  ;;  %v1971_v34 = vld [vmem:[%s4426_s0 + $0x668] sm:$0xff]  ;;  %s2969_s24 = sld [smem:[#allocation5 + $0x54]] }
  0x53   :  { %4645 = vst [vmem:[#allocation45_spill] sm:$0xff] %v2887_v1  ;;  %v2890_v18 = vstv %s2799_s25  ;;  %v796_v38 = vadd.f32 %v793_v45, %v748_v63  ;;  %v817_v25 = vmul.f32 %v1951_v23, %v2884_v20  ;;  %v829_v54 = vmul.f32 %v1955_v22, %v2887_v1  ;;  %v1979_v23 = vld [vmem:[%s4426_s0 + $0x698] sm:$0xff]  ;;  %s3039_s25 = sld [smem:[#allocation5 + $0x5b]] }
  0x54   :  { %4646 = vst [vmem:[#allocation46_spill] sm:$0xff] %v2890_v18  ;;  %v808_v47 = vadd.f32 %v805_v44, %v760_v60  ;;  %v841_v43 = vmul.f32 %v1959_v19, %v2890_v18  ;;  %v2909_v24 = vstv %s2809_s3  ;;  %v2912_v63 = vstv %s2823_s6  ;;  %s2926_s3 = sld [smem:[#allocation5 + $0x4f]]  ;;  %s2992_s6 = sld [smem:[#allocation5 + $0x55]] }
  0x55   :  { %4647 = vst [vmem:[#allocation47_spill] sm:$0xff] %v2909_v24  ;;  %4648 = vst [vmem:[#allocation48_spill] sm:$0xff] %v2912_v63  ;;  %v2915_v60 = vstv %s2825_s26  ;;  %v820_v22 = vadd.f32 %v817_v25, %v772_v0  ;;  %v832_v45 = vadd.f32 %v829_v54, %v784_v4  ;;  %v853_v44 = vmul.f32 %v1963_v39, %v2909_v24  ;;  %v1983_v25 = vld [vmem:[%s4426_s0 + $0x6b0] sm:$0xff]  ;;  %v1987_v0 = vld [vmem:[%s4426_s0 + $0x6c8] sm:$0xff]  ;;  %s2994_s26 = sld [smem:[#allocation5 + $0x56]] }
  0x56   :  { %4649 = vst [vmem:[#allocation49_spill] sm:$0xff] %v2915_v60  ;;  %v865_v19 = vmul.f32 %v1967_v59, %v2912_v63  ;;  %v844_v18 = vadd.f32 %v841_v43, %v796_v38  ;;  %v877_v1 = vmul.f32 %v1971_v34, %v2915_v60  ;;  %v2930_v20 = vstv %s2848_s8  ;;  %v1991_v38 = vld [vmem:[%s4426_s0 + $0x6e0] sm:$0xff]  ;;  %v1995_v54 = vld [vmem:[%s4426_s0 + $0x6f8] sm:$0xff]  ;;  %s3013_s8 = sld [smem:[#allocation5 + $0x58]] }
  0x57   :  { %4650 = vst [vmem:[#allocation50_spill] sm:$0xff] %v2930_v20  ;;  %v2933_v8 = vstv %s2850_s12  ;;  %v856_v43 = vadd.f32 %v853_v44, %v808_v47  ;;  %v889_v4 = vmul.f32 %v1975_v53, %v2930_v20  ;;  %v2956_v47 = vstv %s2854_s15  ;;  %v2007_v20 = vld [vmem:[%s4426_s0 + $0x740] sm:$0xff]  ;;  %s3015_s12 = sld [smem:[#allocation5 + $0x59]]  ;;  %s3169_s15 = sld [smem:[#allocation5 + $0x6a]] }
  0x58   :  { %4651 = vst [vmem:[#allocation51_spill] sm:$0xff] %v2933_v8  ;;  %v868_v39 = vadd.f32 %v865_v19, %v820_v22  ;;  %v901_v59 = vmul.f32 %v1979_v23, %v2933_v8  ;;  %v880_v34 = vadd.f32 %v877_v1, %v832_v45  ;;  %4652 = vst [vmem:[#allocation52_spill] sm:$0xff] %v2956_v47  ;;  %v2959_v22 = vstv %s2869_s7  ;;  %v1999_v23 = vld [vmem:[%s4426_s0 + $0x710] sm:$0xff]  ;;  %v2003_v45 = vld [vmem:[%s4426_s0 + $0x728] sm:$0xff]  ;;  %s3041_s7 = sld [smem:[#allocation5 + $0x5c]] }
  0x59   :  { %4653 = vst [vmem:[#allocation53_spill] sm:$0xff] %v2959_v22  ;;  %v2962_v53 = vstv %s2871_s17  ;;  %v892_v44 = vadd.f32 %v889_v4, %v844_v18  ;;  %v913_v8 = vmul.f32 %v1983_v25, %v2956_v47  ;;  %v925_v1 = vmul.f32 %v1987_v0, %v2959_v22  ;;  %v2011_v25 = vld [vmem:[%s4426_s0 + $0x758] sm:$0xff]  ;;  %s3111_s17 = sld [smem:[#allocation5 + $0x63]] }
  0x5a   :  { %4654 = vst [vmem:[#allocation54_spill] sm:$0xff] %v2962_v53  ;;  %v904_v19 = vadd.f32 %v901_v59, %v856_v43  ;;  %v937_v60 = vmul.f32 %v1991_v38, %v2962_v53  ;;  %v2981_v63 = vstv %s2881_s20  ;;  %v2984_v18 = vstv %s2895_s1  ;;  %s2998_s20 = sld [smem:[#allocation5 + $0x57]]  ;;  %s3064_s1 = sld [smem:[#allocation5 + $0x5d]] }
  0x5b   :  { %4655 = vst [vmem:[#allocation55_spill] sm:$0xff] %v2981_v63  ;;  %4656 = vst [vmem:[#allocation56_spill] sm:$0xff] %v2984_v18  ;;  %v2987_v43 = vstv %s2897_s9  ;;  %v916_v0 = vadd.f32 %v913_v8, %v868_v39  ;;  %v928_v4 = vadd.f32 %v925_v1, %v880_v34  ;;  %v949_v59 = vmul.f32 %v1995_v54, %v2981_v63  ;;  %v2015_v8 = vld [vmem:[%s4426_s0 + $0x770] sm:$0xff]  ;;  %v2019_v39 = vld [vmem:[%s4426_s0 + $0x788] sm:$0xff]  ;;  %s3066_s9 = sld [smem:[#allocation5 + $0x5e]] }
  0x5c   :  { %4657 = vst [vmem:[#allocation57_spill] sm:$0xff] %v2987_v43  ;;  %v961_v38 = vmul.f32 %v1999_v23, %v2984_v18  ;;  %v940_v53 = vadd.f32 %v937_v60, %v892_v44  ;;  %v973_v22 = vmul.f32 %v2003_v45, %v2987_v43  ;;  %v3002_v47 = vstv %s2920_s19  ;;  %v2023_v44 = vld [vmem:[%s4426_s0 + $0x7a0] sm:$0xff]  ;;  %v2027_v1 = vld [vmem:[%s4426_s0 + $0x7b8] sm:$0xff]  ;;  %s3085_s19 = sld [smem:[#allocation5 + $0x60]] }
  0x5d   :  { %4658 = vst [vmem:[#allocation58_spill] sm:$0xff] %v3002_v47  ;;  %v3005_v24 = vstv %s2922_s11  ;;  %v952_v60 = vadd.f32 %v949_v59, %v904_v19  ;;  %v985_v34 = vmul.f32 %v2007_v20, %v3002_v47  ;;  %v3028_v19 = vstv %s2926_s3  ;;  %v2039_v47 = vld [vmem:[%s4426_s0 + $0x800] sm:$0xff]  ;;  %s3087_s11 = sld [smem:[#allocation5 + $0x61]]  ;;  %s3241_s3 = sld [smem:[#allocation5 + $0x72]] }
  0x5e   :  { %4659 = vst [vmem:[#allocation59_spill] sm:$0xff] %v3005_v24  ;;  %v964_v54 = vadd.f32 %v961_v38, %v916_v0  ;;  %v997_v23 = vmul.f32 %v2011_v25, %v3005_v24  ;;  %v976_v45 = vadd.f32 %v973_v22, %v928_v4  ;;  %4660 = vst [vmem:[#allocation60_spill] sm:$0xff] %v3028_v19  ;;  %v3031_v0 = vstv %s2941_s28  ;;  %v2031_v25 = vld [vmem:[%s4426_s0 + $0x7d0] sm:$0xff]  ;;  %v2035_v4 = vld [vmem:[%s4426_s0 + $0x7e8] sm:$0xff]  ;;  %s3113_s28 = sld [smem:[#allocation5 + $0x64]] }
  0x5f   :  { %4661 = vst [vmem:[#allocation61_spill] sm:$0xff] %v3031_v0  ;;  %v3034_v20 = vstv %s2943_s18  ;;  %v988_v59 = vadd.f32 %v985_v34, %v940_v53  ;;  %v1009_v24 = vmul.f32 %v2015_v8, %v3028_v19  ;;  %v1021_v22 = vmul.f32 %v2019_v39, %v3031_v0  ;;  %v2043_v8 = vld [vmem:[%s4426_s0 + $0x818] sm:$0xff]  ;;  %s3183_s18 = sld [smem:[#allocation5 + $0x6b]] }
  0x60   :  { %4662 = vst [vmem:[#allocation62_spill] sm:$0xff] %v3034_v20  ;;  %v1000_v38 = vadd.f32 %v997_v23, %v952_v60  ;;  %v1033_v43 = vmul.f32 %v2023_v44, %v3034_v20  ;;  %v3053_v18 = vstv %s2953_s21  ;;  %v3056_v53 = vstv %s2967_s2  ;;  %s3070_s21 = sld [smem:[#allocation5 + $0x5f]]  ;;  %s3136_s2 = sld [smem:[#allocation5 + $0x65]] }
  0x61   :  { %4663 = vst [vmem:[#allocation63_spill] sm:$0xff] %v3053_v18  ;;  %4664 = vst [vmem:[#allocation64_spill] sm:$0xff] %v3056_v53  ;;  %v3059_v60 = vstv %s2969_s24  ;;  %v1012_v39 = vadd.f32 %v1009_v24, %v964_v54  ;;  %v1024_v34 = vadd.f32 %v1021_v22, %v976_v45  ;;  %v1045_v23 = vmul.f32 %v2027_v1, %v3053_v18  ;;  %v2047_v24 = vld [vmem:[%s4426_s0 + $0x830] sm:$0xff]  ;;  %v2051_v54 = vld [vmem:[%s4426_s0 + $0x848] sm:$0xff]  ;;  %s3138_s24 = sld [smem:[#allocation5 + $0x66]] }
  0x62   :  { %4665 = vst [vmem:[#allocation65_spill] sm:$0xff] %v3059_v60  ;;  %v1057_v44 = vmul.f32 %v2031_v25, %v3056_v53  ;;  %v1036_v20 = vadd.f32 %v1033_v43, %v988_v59  ;;  %v1069_v0 = vmul.f32 %v2035_v4, %v3059_v60  ;;  %v3074_v19 = vstv %s2992_s6  ;;  %v2055_v59 = vld [vmem:[%s4426_s0 + $0x860] sm:$0xff]  ;;  %v2059_v22 = vld [vmem:[%s4426_s0 + $0x878] sm:$0xff]  ;;  %s3157_s6 = sld [smem:[#allocation5 + $0x68]] }
  0x63   :  { %4666 = vst [vmem:[#allocation66_spill] sm:$0xff] %v3074_v19  ;;  %v3077_v63 = vstv %s2994_s26  ;;  %v1048_v43 = vadd.f32 %v1045_v23, %v1000_v38  ;;  %v1081_v45 = vmul.f32 %v2039_v47, %v3074_v19  ;;  %v3100_v38 = vstv %s2998_s20  ;;  %v2071_v19 = vld [vmem:[%s4426_s0 + $0x8c0] sm:$0xff]  ;;  %s3159_s26 = sld [smem:[#allocation5 + $0x69]] }
  0x64   :  { %4667 = vst [vmem:[#allocation67_spill] sm:$0xff] %v3077_v63  ;;  %v1060_v1 = vadd.f32 %v1057_v44, %v1012_v39  ;;  %v1093_v25 = vmul.f32 %v2043_v8, %v3077_v63  ;;  %v1072_v4 = vadd.f32 %v1069_v0, %v1024_v34  ;;  %4668 = vst [vmem:[#allocation68_spill] sm:$0xff] %v3100_v38  ;;  %v3103_v39 = vstv %s3013_s8  ;;  %v2063_v8 = vld [vmem:[%s4426_s0 + $0x890] sm:$0xff]  ;;  %v2067_v34 = vld [vmem:[%s4426_s0 + $0x8a8] sm:$0xff]  ;;  %s3185_s8 = sld [smem:[#allocation5 + $0x6c]] }
  0x65   :  { %4669 = vst [vmem:[#allocation69_spill] sm:$0xff] %v3103_v39  ;;  %v3106_v47 = vstv %s3015_s12  ;;  %v1084_v23 = vadd.f32 %v1081_v45, %v1036_v20  ;;  %v1105_v63 = vmul.f32 %v2047_v24, %v3100_v38  ;;  %v1117_v0 = vmul.f32 %v2051_v54, %v3103_v39  ;;  %v2075_v24 = vld [vmem:[%s4426_s0 + $0x8d8] sm:$0xff]  ;;  %s3255_s12 = sld [smem:[#allocation5 + $0x73]] }
  0x66   :  { %4670 = vst [vmem:[#allocation70_spill] sm:$0xff] %v3106_v47  ;;  %v1096_v44 = vadd.f32 %v1093_v25, %v1048_v43  ;;  %v1129_v60 = vmul.f32 %v2055_v59, %v3106_v47  ;;  %v3125_v53 = vstv %s3025_s13  ;;  %v3128_v20 = vstv %s3039_s25  ;;  %s3142_s13 = sld [smem:[#allocation5 + $0x67]]  ;;  %s3208_s25 = sld [smem:[#allocation5 + $0x6d]] }
  0x67   :  { %4671 = vst [vmem:[#allocation71_spill] sm:$0xff] %v3125_v53  ;;  %4672 = vst [vmem:[#allocation72_spill] sm:$0xff] %v3128_v20  ;;  %v3131_v43 = vstv %s3041_s7  ;;  %v1108_v54 = vadd.f32 %v1105_v63, %v1060_v1  ;;  %v1120_v45 = vadd.f32 %v1117_v0, %v1072_v4  ;;  %v1141_v25 = vmul.f32 %v2059_v22, %v3125_v53  ;;  %v2079_v63 = vld [vmem:[%s4426_s0 + $0x8f0] sm:$0xff]  ;;  %v2083_v1 = vld [vmem:[%s4426_s0 + $0x908] sm:$0xff]  ;;  %s3210_s7 = sld [smem:[#allocation5 + $0x6e]] }
  0x68   :  { %4673 = vst [vmem:[#allocation73_spill] sm:$0xff] %v3131_v43  ;;  %v1153_v59 = vmul.f32 %v2063_v8, %v3128_v20  ;;  %v1132_v47 = vadd.f32 %v1129_v60, %v1084_v23  ;;  %v1165_v39 = vmul.f32 %v2067_v34, %v3131_v43  ;;  %v3146_v38 = vstv %s3064_s1  ;;  %v2087_v23 = vld [vmem:[%s4426_s0 + $0x920] sm:$0xff]  ;;  %v2091_v0 = vld [vmem:[%s4426_s0 + $0x938] sm:$0xff]  ;;  %s3229_s1 = sld [smem:[#allocation5 + $0x70]] }
  0x69   :  { %4674 = vst [vmem:[#allocation74_spill] sm:$0xff] %v3146_v38  ;;  %v3149_v18 = vstv %s3066_s9  ;;  %v1144_v60 = vadd.f32 %v1141_v25, %v1096_v44  ;;  %v1177_v4 = vmul.f32 %v2071_v19, %v3146_v38  ;;  %v3172_v44 = vstv %s3070_s21  ;;  %v2103_v38 = vld [vmem:[%s4426_s0 + $0x980] sm:$0xff]  ;;  %s3231_s9 = sld [smem:[#allocation5 + $0x71]] }
  0x6a   :  { %4675 = vst [vmem:[#allocation75_spill] sm:$0xff] %v3149_v18  ;;  %v1156_v22 = vadd.f32 %v1153_v59, %v1108_v54  ;;  %v1189_v8 = vmul.f32 %v2075_v24, %v3149_v18  ;;  %v1168_v34 = vadd.f32 %v1165_v39, %v1120_v45  ;;  %4676 = vst [vmem:[#allocation76_spill] sm:$0xff] %v3172_v44  ;;  %v3175_v54 = vstv %s3085_s19  ;;  %v2095_v24 = vld [vmem:[%s4426_s0 + $0x950] sm:$0xff]  ;;  %v2099_v45 = vld [vmem:[%s4426_s0 + $0x968] sm:$0xff]  ;;  %s3257_s19 = sld [smem:[#allocation5 + $0x74]] }
  0x6b   :  { %4677 = vst [vmem:[#allocation77_spill] sm:$0xff] %v3175_v54  ;;  %v3178_v19 = vstv %s3087_s11  ;;  %v1180_v25 = vadd.f32 %v1177_v4, %v1132_v47  ;;  %v1201_v18 = vmul.f32 %v2079_v63, %v3172_v44  ;;  %v1213_v39 = vmul.f32 %v2083_v1, %v3175_v54  ;;  %v2107_v63 = vld [vmem:[%s4426_s0 + $0x998] sm:$0xff] }
  0x6c   :  { %4678 = vst [vmem:[#allocation78_spill] sm:$0xff] %v3178_v19  ;;  %v1192_v59 = vadd.f32 %v1189_v8, %v1144_v60  ;;  %v1225_v43 = vmul.f32 %v2087_v23, %v3178_v19  ;;  %v3197_v20 = vstv %s3097_s14  ;;  %v3200_v47 = vstv %s3111_s17  ;;  %s3214_s14 = sld [smem:[#allocation5 + $0x6f]]  ;;  %s3280_s17 = sld [smem:[#allocation5 + $0x75]] }
  0x6d   :  { %4679 = vst [vmem:[#allocation79_spill] sm:$0xff] %v3197_v20  ;;  %4680 = vst [vmem:[#allocation80_spill] sm:$0xff] %v3200_v47  ;;  %v3203_v60 = vstv %s3113_s28  ;;  %v1204_v1 = vadd.f32 %v1201_v18, %v1156_v22  ;;  %v1216_v4 = vadd.f32 %v1213_v39, %v1168_v34  ;;  %v1237_v8 = vmul.f32 %v2091_v0, %v3197_v20  ;;  %v2111_v18 = vld [vmem:[%s4426_s0 + $0x9b0] sm:$0xff]  ;;  %v2115_v22 = vld [vmem:[%s4426_s0 + $0x9c8] sm:$0xff]  ;;  %s3282_s28 = sld [smem:[#allocation5 + $0x76]] }
  0x6e   :  { %4681 = vst [vmem:[#allocation81_spill] sm:$0xff] %v3203_v60  ;;  %v1249_v23 = vmul.f32 %v2095_v24, %v3200_v47  ;;  %v1228_v19 = vadd.f32 %v1225_v43, %v1180_v25  ;;  %v1261_v54 = vmul.f32 %v2099_v45, %v3203_v60  ;;  %v3218_v44 = vstv %s3136_s2  ;;  %v2119_v25 = vld [vmem:[%s4426_s0 + $0x9e0] sm:$0xff]  ;;  %v2123_v39 = vld [vmem:[%s4426_s0 + $0x9f8] sm:$0xff]  ;;  %s3301_s2 = sld [smem:[#allocation5 + $0x78]] }
  0x6f   :  { %4682 = vst [vmem:[#allocation82_spill] sm:$0xff] %v3218_v44  ;;  %v3221_v53 = vstv %s3138_s24  ;;  %v1240_v43 = vadd.f32 %v1237_v8, %v1192_v59  ;;  %v1273_v34 = vmul.f32 %v2103_v38, %v3218_v44  ;;  %v3244_v59 = vstv %s3142_s13  ;;  %v2135_v44 = vld [vmem:[%s4426_s0 + $0xa40] sm:$0xff]  ;;  %s3303_s24 = sld [smem:[#allocation5 + $0x79]]  ;;  %s3325_s13 = sld [smem:[#allocation5 + $0x7a]] }
  0x70   :  { %4683 = vst [vmem:[#allocation83_spill] sm:$0xff] %v3221_v53  ;;  %v1252_v0 = vadd.f32 %v1249_v23, %v1204_v1  ;;  %v1285_v24 = vmul.f32 %v2107_v63, %v3221_v53  ;;  %v1264_v45 = vadd.f32 %v1261_v54, %v1216_v4  ;;  %4684 = vst [vmem:[#allocation84_spill] sm:$0xff] %v3244_v59  ;;  %v3247_v1 = vstv %s3157_s6  ;;  %v2127_v63 = vld [vmem:[%s4426_s0 + $0xa10] sm:$0xff]  ;;  %v2131_v4 = vld [vmem:[%s4426_s0 + $0xa28] sm:$0xff] }
  0x71   :  { %4685 = vst [vmem:[#allocation85_spill] sm:$0xff] %v3247_v1  ;;  %v3250_v38 = vstv %s3159_s26  ;;  %v1276_v8 = vadd.f32 %v1273_v34, %v1228_v19  ;;  %v1297_v53 = vmul.f32 %v2111_v18, %v3244_v59  ;;  %v1309_v54 = vmul.f32 %v2115_v22, %v3247_v1  ;;  %v2139_v18 = vld [vmem:[%s4426_s0 + $0xa58] sm:$0xff] }
  0x72   :  { %4686 = vst [vmem:[#allocation86_spill] sm:$0xff] %v3250_v38  ;;  %v1288_v23 = vadd.f32 %v1285_v24, %v1240_v43  ;;  %v1321_v60 = vmul.f32 %v2119_v25, %v3250_v38  ;;  %v3269_v47 = vstv %s3169_s15  ;;  %v3272_v19 = vstv %s3183_s18  ;;  %s3286_s15 = sld [smem:[#allocation5 + $0x77]] }
  0x73   :  { %4687 = vst [vmem:[#allocation87_spill] sm:$0xff] %v3269_v47  ;;  %4688 = vst [vmem:[#allocation88_spill] sm:$0xff] %v3272_v19  ;;  %v3275_v43 = vstv %s3185_s8  ;;  %v1300_v22 = vadd.f32 %v1297_v53, %v1252_v0  ;;  %v1312_v34 = vadd.f32 %v1309_v54, %v1264_v45  ;;  %v1333_v24 = vmul.f32 %v2123_v39, %v3269_v47  ;;  %v2143_v53 = vld [vmem:[%s4426_s0 + $0xa70] sm:$0xff]  ;;  %v2147_v0 = vld [vmem:[%s4426_s0 + $0xa88] sm:$0xff] }
  0x74   :  { %4689 = vst [vmem:[#allocation89_spill] sm:$0xff] %v3275_v43  ;;  %v1345_v25 = vmul.f32 %v2127_v63, %v3272_v19  ;;  %v1324_v38 = vadd.f32 %v1321_v60, %v1276_v8  ;;  %v1357_v1 = vmul.f32 %v2131_v4, %v3275_v43  ;;  %v3290_v59 = vstv %s3208_s25  ;;  %v2151_v8 = vld [vmem:[%s4426_s0 + $0xaa0] sm:$0xff]  ;;  %v2155_v54 = vld [vmem:[%s4426_s0 + $0xab8] sm:$0xff] }
  0x75   :  { %4690 = vst [vmem:[#allocation90_spill] sm:$0xff] %v3290_v59  ;;  %v3293_v20 = vstv %s3210_s7  ;;  %v1336_v60 = vadd.f32 %v1333_v24, %v1288_v23  ;;  %v1369_v45 = vmul.f32 %v2135_v44, %v3290_v59  ;;  %v3314_v43 = vstv %s3214_s14  ;;  %v2159_v44 = vld [vmem:[%s4426_s0 + $0xad0] sm:$0xff] }
  0x76   :  { %4691 = vst [vmem:[#allocation91_spill] sm:$0xff] %v3293_v20  ;;  %v1348_v39 = vadd.f32 %v1345_v25, %v1300_v22  ;;  %v1381_v63 = vmul.f32 %v2139_v18, %v3293_v20  ;;  %v1360_v4 = vadd.f32 %v1357_v1, %v1312_v34  ;;  %4692 = vst [vmem:[#allocation92_spill] sm:$0xff] %v3314_v43  ;;  %v3317_v23 = vstv %s3229_s1  ;;  %v2163_v34 = vld [vmem:[%s4426_s0 + $0xae8] sm:$0xff]  ;;  %v2167_v20 = vld [vmem:[%s4426_s0 + $0xb00] sm:$0xff] }
  0x77   :  { %4693 = vst [vmem:[#allocation93_spill] sm:$0xff] %v3317_v23  ;;  %v3320_v22 = vstv %s3231_s9  ;;  %v1372_v18 = vadd.f32 %v1369_v45, %v1324_v38  ;;  %v1393_v25 = vmul.f32 %v2143_v53, %v3314_v43  ;;  %v1405_v1 = vmul.f32 %v2147_v0, %v3317_v23  ;;  %v2171_v53 = vld [vmem:[%s4426_s0 + $0xb18] sm:$0xff] }
  0x78   :  { %4694 = vst [vmem:[#allocation94_spill] sm:$0xff] %v3320_v22  ;;  %v1384_v24 = vadd.f32 %v1381_v63, %v1336_v60  ;;  %v1417_v59 = vmul.f32 %v2151_v8, %v3320_v22  ;;  %v3337_v19 = vstv %s3241_s3  ;;  %v3340_v38 = vstv %s3255_s12  ;;  %s4348_s3 = sld [smem:[#allocation7 + $0x2]] }
  0x79   :  { %4695 = vst [vmem:[#allocation95_spill] sm:$0xff] %v3337_v19  ;;  %4696 = vst [vmem:[#allocation96_spill] sm:$0xff] %v3340_v38  ;;  %v3343_v60 = vstv %s3257_s19  ;;  %v1396_v0 = vadd.f32 %v1393_v25, %v1348_v39  ;;  %v1408_v45 = vadd.f32 %v1405_v1, %v1360_v4  ;;  %v1429_v63 = vmul.f32 %v2155_v54, %v3337_v19  ;;  %v2179_v39 = vld [vmem:[%s4426_s0 + $0xb48] sm:$0xff]  ;;  %v2187_v25 = vld [vmem:[%s4426_s0 + $0xb78] sm:$0xff] }
  0x7a   :  { %4697 = vst [vmem:[#allocation97_spill] sm:$0xff] %v3343_v60  ;;  %v1441_v23 = vmul.f32 %v2159_v44, %v3340_v38  ;;  %v1420_v43 = vadd.f32 %v1417_v59, %v1372_v18  ;;  %v1453_v8 = vmul.f32 %v2163_v34, %v3343_v60  ;;  %v3352_v22 = vstv %s3280_s17  ;;  %v2183_v18 = vld [vmem:[%s4426_s0 + $0xb60] sm:$0xff] }
  0x7b   :  { %4698 = vst [vmem:[#allocation98_spill] sm:$0xff] %v3352_v22  ;;  %v3355_v47 = vstv %s3282_s28  ;;  %v1432_v54 = vadd.f32 %v1429_v63, %v1384_v24  ;;  %v1465_v44 = vmul.f32 %v2167_v20, %v3352_v22  ;;  %v55_v1 = vld [vmem:[%s4426_s0] sm:$0xff]  ;;  %v3375_v24 = vstv %s3286_s15 }
  0x7c   :  { %4699 = vst [vmem:[#allocation99_spill] sm:$0xff] %v3355_v47  ;;  %v1444_v4 = vadd.f32 %v1441_v23, %v1396_v0  ;;  %v1477_v59 = vmul.f32 %v2171_v53, %v3355_v47  ;;  %v1456_v34 = vadd.f32 %v1453_v8, %v1408_v45  ;;  %4700 = vst [vmem:[#allocation100_spill] sm:$0xff] %v3375_v24  ;;  %v3378_v23 = vstv %s3301_s2  ;;  %v1702_v53 = vld [vmem:[%s4426_s0 + $0x18] sm:$0xff]  ;;  %v1706_v45 = vld [vmem:[%s4426_s0 + $0x30] sm:$0xff] }
  0x7d   :  { %4701 = vst [vmem:[#allocation101_spill] sm:$0xff] %v3378_v23  ;;  %v3381_v20 = vstv %s3303_s24  ;;  %v1468_v0 = vadd.f32 %v1465_v44, %v1420_v43  ;;  %v1489_v47 = vmul.f32 %v2175_v37, %v3375_v24  ;;  %v1501_v22 = vmul.f32 %v2179_v39, %v3378_v23  ;;  %v1710_v8 = vld [vmem:[%s4426_s0 + $0x48] sm:$0xff]  ;;  %v1714_v60 = vld [vmem:[%s4426_s0 + $0x60] sm:$0xff]  ;;  %v1718_v39 = vld [vmem:[%s4426_s0 + $0x78] sm:$0xff] }
  0x7e   :  { %4702 = vst [vmem:[#allocation102_spill] sm:$0xff] %v3381_v20  ;;  %v1480_v63 = vadd.f32 %v1477_v59, %v1432_v54  ;;  %v1513_v38 = vmul.f32 %v2183_v18, %v3381_v20  ;;  %v3399_v43 = vstv %s3325_s13  ;;  %v60_v37 = vmul.f32 %v2302_v9, %v55_v1  ;;  %v1722_v54 = vld [vmem:[%s4426_s0 + $0x90] sm:$0xff]  ;;  %v1726_v44 = vld [vmem:[%s4426_s0 + $0xa8] sm:$0xff]  ;;  %v1730_v1 = vld [vmem:[%s4426_s0 + $0xc0] sm:$0xff] }
  0x7f   :  { %4703 = vst [vmem:[#allocation103_spill] sm:$0xff] %v3399_v43  ;;  %v1492_v59 = vadd.f32 %v1489_v47, %v1444_v4  ;;  %v1504_v23 = vadd.f32 %v1501_v22, %v1456_v34  ;;  %v1525_v18 = vmul.f32 %v2187_v25, %v3399_v43  ;;  %v72_v20 = vmul.f32 %v1702_v53, %v2316_v16  ;;  %v1734_v9 = vld [vmem:[%s4426_s0 + $0xd8] sm:$0xff]  ;;  %v1738_v53 = vld [vmem:[%s4426_s0 + $0xf0] sm:$0xff] }
  0x80   :  { %v1516_v24 = vadd.f32 %v1513_v38, %v1468_v0  ;;  %v84_v19 = vmul.f32 %v1706_v45, %v2318_v17  ;;  %v96_v36 = vmul.f32 %v1710_v8, %v2328_v21  ;;  %v108_v47 = vmul.f32 %v1714_v60, %v2342_v26  ;;  %v1742_v38 = vld [vmem:[%s4426_s0 + $0x108] sm:$0xff]  ;;  %v1746_v0 = vld [vmem:[%s4426_s0 + $0x120] sm:$0xff] }
  0x81   :  { %v1528_v22 = vadd.f32 %v1525_v18, %v1480_v63  ;;  %v120_v4 = vmul.f32 %v1718_v39, %v2351_v30  ;;  %v132_v25 = vmul.f32 %v1722_v54, %v2354_v31  ;;  %v144_v34 = vmul.f32 %v1726_v44, %v2366_v35  ;;  %v1750_v39 = vld [vmem:[%s4426_s0 + $0x138] sm:$0xff]  ;;  %v1754_v54 = vld [vmem:[%s4426_s0 + $0x150] sm:$0xff] }
  0x82   :  { %v1531_v60 = vadd.f32 %v1516_v24, %v1504_v23  ;;  %v111_v63 = vadd.f32 %v108_v47, %v60_v37  ;;  %v156_v45 = vmul.f32 %v1730_v1, %v2378_v40  ;;  %v168_v8 = vmul.f32 %v1734_v9, %v2392_v46  ;;  %v1758_v24 = vld [vmem:[%s4426_s0 + $0x168] sm:$0xff]  ;;  %v1762_v47 = vld [vmem:[%s4426_s0 + $0x180] sm:$0xff] }
  0x83   :  { %v1534_v44 = vadd.f32 %v1528_v22, %v1492_v59  ;;  %v123_v18 = vadd.f32 %v120_v4, %v72_v20  ;;  %v135_v35 = vadd.f32 %v132_v25, %v84_v19  ;;  %v147_v31 = vadd.f32 %v144_v34, %v96_v36  ;;  %v1766_v19 = vld [vmem:[%s4426_s0 + $0x198] sm:$0xff]  ;;  %v1770_v4 = vld [vmem:[%s4426_s0 + $0x1b0] sm:$0xff]  ;;  %v1774_v25 = vld [vmem:[%s4426_s0 + $0x1c8] sm:$0xff] }
  0x84   :  { %v159_v23 = vadd.f32 %v156_v45, %v111_v63  ;;  %v180_v37 = vmul.f32 %v1738_v53, %v2399_v50  ;;  %v192_v9 = vmul.f32 %v1742_v38, %v2402_v51  ;;  %v204_v1 = vmul.f32 %v1746_v0, %v2417_v57  ;;  %v1782_v63 = vld [vmem:[%s4426_s0 + $0x1f8] sm:$0xff] }
  0x85   :  { %v1537_v36 = vadd.f32 %v1534_v44, %v1531_v60  ;;  %v171_v20 = vadd.f32 %v168_v8, %v123_v18  ;;  %v216_v59 = vmul.f32 %v1750_v39, %v2427_v61  ;;  %v228_v22 = vmul.f32 %v1754_v54, %v2430_v62  ;;  %v1778_v60 = vld [vmem:[%s4426_s0 + $0x1e0] sm:$0xff] }
  0x86   :  { %v183_v34 = vadd.f32 %v180_v37, %v135_v35  ;;  %v195_v53 = vadd.f32 %v192_v9, %v147_v31  ;;  %v207_v38 = vadd.f32 %v204_v1, %v159_v23  ;;  %v240_v0 = vmul.f32 %v1758_v24, %v2450_v11  ;;  %v1786_v31 = vld [vmem:[%s4426_s0 + $0x210] sm:$0xff]  ;;  %v1790_v35 = vld [vmem:[%s4426_s0 + $0x228] sm:$0xff]  ;;  %v1794_v37 = vld [vmem:[%s4426_s0 + $0x240] sm:$0xff] }
  0x87   :  { %v1542_v45 = vadd.f32 %v2284_v2, %v1537_v36  ;;  %v219_v8 = vadd.f32 %v216_v59, %v171_v20  ;;  %v252_v39 = vmul.f32 %v1762_v47, %v2453_v12  ;;  %v264_v54 = vmul.f32 %v1766_v19, %v2456_v13  ;;  %v1798_v9 = vld [vmem:[%s4426_s0 + $0x258] sm:$0xff]  ;;  %v1802_v20 = vld [vmem:[%s4426_s0 + $0x270] sm:$0xff]  ;;  %v1806_v59 = vld [vmem:[%s4426_s0 + $0x288] sm:$0xff] }
  0x88   :  { %v231_v44 = vadd.f32 %v228_v22, %v183_v34  ;;  %v243_v18 = vadd.f32 %v240_v0, %v195_v53  ;;  %v276_v24 = vmul.f32 %v1770_v4, %v2480_v28  ;;  %v288_v23 = vmul.f32 %v1774_v25, %v2483_v29  ;;  %v1810_v53 = vld [vmem:[%s4426_s0 + $0x2a0] sm:$0xff] }
  0x89   :  { %1546 = vst.msk [vmem:[#allocation2 + $0x28] sm:$0xff] %vm1544_vm1, %v1542_v45  ;;  %v255_v1 = vadd.f32 %v252_v39, %v207_v38  ;;  %v267_v47 = vadd.f32 %v264_v54, %v219_v8  ;;  %v300_v19 = vmul.f32 %v1778_v60, %v2486_v32  ;;  %v312_v36 = vmul.f32 %v1782_v63, %v2498_v41  ;;  %v1814_v38 = vld [vmem:[%s4426_s0 + $0x2b8] sm:$0xff]  ;;  %v1818_v8 = vld [vmem:[%s4426_s0 + $0x2d0] sm:$0xff]  ;;  %v1822_v39 = vld [vmem:[%s4426_s0 + $0x2e8] sm:$0xff] }
  0x8a   :  { %v279_v22 = vadd.f32 %v276_v24, %v231_v44  ;;  %v291_v4 = vadd.f32 %v288_v23, %v243_v18  ;;  %v324_v25 = vmul.f32 %v1786_v31, %v2501_v42  ;;  %v336_v34 = vmul.f32 %v1790_v35, %v2524_v55  ;;  %v1826_v18 = vld [vmem:[%s4426_s0 + $0x300] sm:$0xff]  ;;  %v1830_v24 = vld [vmem:[%s4426_s0 + $0x318] sm:$0xff] }
  0x8b   :  { %v303_v0 = vadd.f32 %v300_v19, %v255_v1  ;;  %v315_v60 = vadd.f32 %v312_v36, %v267_v47  ;;  %v348_v63 = vmul.f32 %v1794_v37, %v2527_v56  ;;  %v360_v45 = vmul.f32 %v1798_v9, %v2530_v58  ;;  %v1834_v47 = vld [vmem:[%s4426_s0 + $0x330] sm:$0xff]  ;;  %v1838_v19 = vld [vmem:[%s4426_s0 + $0x348] sm:$0xff] }
  0x8c   :  { %v327_v54 = vadd.f32 %v324_v25, %v279_v22  ;;  %v339_v31 = vadd.f32 %v336_v34, %v291_v4  ;;  %v372_v35 = vmul.f32 %v1802_v20, %v2549_v7  ;;  %v384_v44 = vmul.f32 %v1806_v59, %v2552_v10  ;;  %v1842_v4 = vld [vmem:[%s4426_s0 + $0x360] sm:$0xff] }
  0x8d   :  { %v351_v23 = vadd.f32 %v348_v63, %v303_v0  ;;  %v363_v37 = vadd.f32 %v360_v45, %v315_v60  ;;  %v396_v9 = vmul.f32 %v1810_v53, %v2555_v14  ;;  %v408_v1 = vmul.f32 %v1814_v38, %v2570_v27  ;;  %v1846_v0 = vld [vmem:[%s4426_s0 + $0x378] sm:$0xff]  ;;  %v1850_v60 = vld [vmem:[%s4426_s0 + $0x390] sm:$0xff]  ;;  %v1854_v63 = vld [vmem:[%s4426_s0 + $0x3a8] sm:$0xff] }
  0x8e   :  { %v375_v36 = vadd.f32 %v372_v35, %v327_v54  ;;  %v387_v20 = vadd.f32 %v384_v44, %v339_v31  ;;  %v420_v59 = vmul.f32 %v1818_v8, %v2573_v33  ;;  %v432_v22 = vmul.f32 %v1822_v39, %v2596_v48  ;;  %v1858_v35 = vld [vmem:[%s4426_s0 + $0x3c0] sm:$0xff]  ;;  %v1862_v44 = vld [vmem:[%s4426_s0 + $0x3d8] sm:$0xff] }
  0x8f   :  { %v399_v25 = vadd.f32 %v396_v9, %v351_v23  ;;  %v411_v34 = vadd.f32 %v408_v1, %v363_v37  ;;  %v444_v53 = vmul.f32 %v1826_v18, %v2599_v49  ;;  %v456_v38 = vmul.f32 %v1830_v24, %v2602_v52  ;;  %v1866_v9 = vld [vmem:[%s4426_s0 + $0x3f0] sm:$0xff]  ;;  %v1870_v1 = vld [vmem:[%s4426_s0 + $0x408] sm:$0xff] }
  0x90   :  { %v1550_v45 = vld [vmem:[#allocation2 + $0x28] sm:$0xff]  ;;  %v423_v8 = vadd.f32 %v420_v59, %v375_v36  ;;  %v435_v39 = vadd.f32 %v432_v22, %v387_v20  ;;  %v468_v54 = vmul.f32 %v1834_v47, %v2621_v5  ;;  %v480_v31 = vmul.f32 %v1838_v19, %v2624_v6  ;;  %v4704_v36 = vld [vmem:[#allocation18_spill] sm:$0xff]  ;;  %v4705_v59 = vld [vmem:[#allocation19_spill] sm:$0xff] }
  0x91   :  { %v1569_v18 = vmul.f32 %v2286_v3, %v1550_v45  ;;  %v447_v24 = vadd.f32 %v444_v53, %v399_v25  ;;  %v459_v23 = vadd.f32 %v456_v38, %v411_v34  ;;  %v492_v37 = vmul.f32 %v1842_v4, %v2627_v15  ;;  %v1874_v25 = vld [vmem:[%s4426_s0 + $0x420] sm:$0xff]  ;;  %v1878_v4 = vld [vmem:[%s4426_s0 + $0x438] sm:$0xff]  ;;  %v4706_v53 = vld [vmem:[#allocation20_spill] sm:$0xff] }
  0x92   :  { %v471_v47 = vadd.f32 %v468_v54, %v423_v8  ;;  %v483_v19 = vadd.f32 %v480_v31, %v435_v39  ;;  %v504_v20 = vmul.f32 %v1846_v0, %v4704_v36  ;;  %v516_v22 = vmul.f32 %v1850_v60, %v4705_v59  ;;  %v4707_v45 = vld [vmem:[#allocation21_spill] sm:$0xff]  ;;  %v4708_v39 = vld [vmem:[#allocation22_spill] sm:$0xff]  ;;  %v1886_v60 = vld [vmem:[%s4426_s0 + $0x468] sm:$0xff] }
  0x93   :  { %1584 = vrot.lane.b32.xlu1 %v1569_v18, %s2229_s27  ;;  %v495_v34 = vadd.f32 %v492_v37, %v447_v24  ;;  %v528_v38 = vmul.f32 %v1854_v63, %v4706_v53  ;;  %v540_v8 = vmul.f32 %v1858_v35, %v4707_v45  ;;  %v552_v54 = vmul.f32 %v1862_v44, %v4708_v39  ;;  %v1882_v0 = vld [vmem:[%s4426_s0 + $0x450] sm:$0xff]  ;;  %v4709_v36 = vld [vmem:[#allocation23_spill] sm:$0xff]  ;;  %v4710_v18 = vld [vmem:[#allocation24_spill] sm:$0xff] }
  0x94   :  { %v507_v31 = vadd.f32 %v504_v20, %v459_v23  ;;  %v519_v59 = vadd.f32 %v516_v22, %v471_v47  ;;  %v564_v15 = vmul.f32 %v1866_v9, %v4709_v36  ;;  %v576_v24 = vmul.f32 %v1870_v1, %v4710_v18  ;;  %v1890_v63 = vld [vmem:[%s4426_s0 + $0x480] sm:$0xff]  ;;  %v1894_v35 = vld [vmem:[%s4426_s0 + $0x498] sm:$0xff]  ;;  %v4711_v39 = vld [vmem:[#allocation25_spill] sm:$0xff] }
  0x95   :  { %v531_v44 = vadd.f32 %v528_v38, %v483_v19  ;;  %v543_v37 = vadd.f32 %v540_v8, %v495_v34  ;;  %v588_v45 = vmul.f32 %v1874_v25, %v4711_v39  ;;  %v4712_v53 = vld [vmem:[#allocation26_spill] sm:$0xff]  ;;  %v1898_v23 = vld [vmem:[%s4426_s0 + $0x4b0] sm:$0xff]  ;;  %v1902_v9 = vld [vmem:[%s4426_s0 + $0x4c8] sm:$0xff]  ;;  %vm1694_vm7 = vcmask 149504  }
  0x96   :  { %v600_v6 = vmul.f32 %v1878_v4, %v4712_v53  ;;  %v555_v1 = vadd.f32 %v552_v54, %v507_v31  ;;  %v567_v47 = vadd.f32 %v564_v15, %v519_v59  ;;  %v4713_v20 = vld [vmem:[#allocation27_spill] sm:$0xff]  ;;  %v4714_v18 = vld [vmem:[#allocation28_spill] sm:$0xff]  ;;  %v1910_v25 = vld [vmem:[%s4426_s0 + $0x4f8] sm:$0xff] }
  0x97   :  { %v612_v22 = vmul.f32 %v1882_v0, %v4713_v20  ;;  %v624_v36 = vmul.f32 %v1886_v60, %v4714_v18  ;;  %v1906_v19 = vld [vmem:[%s4426_s0 + $0x4e0] sm:$0xff]  ;;  %v579_v4 = vadd.f32 %v576_v24, %v531_v44  ;;  %v591_v34 = vadd.f32 %v588_v45, %v543_v37  ;;  %v4715_v38 = vld [vmem:[#allocation29_spill] sm:$0xff]  ;;  %v4716_v53 = vld [vmem:[#allocation30_spill] sm:$0xff] }
  0x98   :  { %v636_v8 = vmul.f32 %v1890_v63, %v4715_v38  ;;  %v648_v39 = vmul.f32 %v1894_v35, %v4716_v53  ;;  %v1914_v15 = vld [vmem:[%s4426_s0 + $0x510] sm:$0xff]  ;;  %v1918_v59 = vld [vmem:[%s4426_s0 + $0x528] sm:$0xff]  ;;  %v603_v54 = vadd.f32 %v600_v6, %v555_v1  ;;  %v4717_v60 = vld [vmem:[#allocation31_spill] sm:$0xff] }
  0x99   :  { %v615_v0 = vadd.f32 %v612_v22, %v567_v47  ;;  %v660_v31 = vmul.f32 %v1898_v23, %v4717_v60  ;;  %v4718_v18 = vld [vmem:[#allocation32_spill] sm:$0xff]  ;;  %v1922_v45 = vld [vmem:[%s4426_s0 + $0x540] sm:$0xff]  ;;  %v1926_v24 = vld [vmem:[%s4426_s0 + $0x558] sm:$0xff]  ;;  %v627_v63 = vadd.f32 %v624_v36, %v579_v4 }
  0x9a   :  { %v672_v20 = vmul.f32 %v1902_v9, %v4718_v18  ;;  %v639_v35 = vadd.f32 %v636_v8, %v591_v34  ;;  %v4719_v44 = vld [vmem:[#allocation33_spill] sm:$0xff]  ;;  %v4720_v53 = vld [vmem:[#allocation34_spill] sm:$0xff]  ;;  %v1934_v23 = vld [vmem:[%s4426_s0 + $0x588] sm:$0xff]  ;;  %v651_v9 = vadd.f32 %v648_v39, %v603_v54 }
  0x9b   :  { %v684_v37 = vmul.f32 %v1906_v19, %v4719_v44  ;;  %v696_v38 = vmul.f32 %v1910_v25, %v4720_v53  ;;  %v1930_v6 = vld [vmem:[%s4426_s0 + $0x570] sm:$0xff]  ;;  %v663_v1 = vadd.f32 %v660_v31, %v615_v0  ;;  %v4721_v47 = vld [vmem:[#allocation35_spill] sm:$0xff]  ;;  %v4722_v18 = vld [vmem:[#allocation36_spill] sm:$0xff] }
  0x9c   :  { %v708_v22 = vmul.f32 %v1914_v15, %v4721_v47  ;;  %v720_v60 = vmul.f32 %v1918_v59, %v4722_v18  ;;  %v1938_v36 = vld [vmem:[%s4426_s0 + $0x5a0] sm:$0xff]  ;;  %v1942_v19 = vld [vmem:[%s4426_s0 + $0x5b8] sm:$0xff]  ;;  %v675_v25 = vadd.f32 %v672_v20, %v627_v63  ;;  %v4723_v34 = vld [vmem:[#allocation37_spill] sm:$0xff] }
  0x9d   :  { %v687_v4 = vadd.f32 %v684_v37, %v639_v35  ;;  %v732_v8 = vmul.f32 %v1922_v45, %v4723_v34  ;;  %v4724_v53 = vld [vmem:[#allocation38_spill] sm:$0xff]  ;;  %v1946_v39 = vld [vmem:[%s4426_s0 + $0x5d0] sm:$0xff]  ;;  %v1950_v15 = vld [vmem:[%s4426_s0 + $0x5e8] sm:$0xff]  ;;  %v699_v59 = vadd.f32 %v696_v38, %v651_v9 }
  0x9e   :  { %v744_v44 = vmul.f32 %v1926_v24, %v4724_v53  ;;  %v711_v54 = vadd.f32 %v708_v22, %v663_v1  ;;  %v4725_v0 = vld [vmem:[#allocation39_spill] sm:$0xff]  ;;  %v4726_v18 = vld [vmem:[#allocation40_spill] sm:$0xff]  ;;  %v1958_v45 = vld [vmem:[%s4426_s0 + $0x618] sm:$0xff]  ;;  %v723_v24 = vadd.f32 %v720_v60, %v675_v25 }
  0x9f   :  { %v756_v31 = vmul.f32 %v1930_v6, %v4725_v0  ;;  %v768_v47 = vmul.f32 %v1934_v23, %v4726_v18  ;;  %v1954_v20 = vld [vmem:[%s4426_s0 + $0x600] sm:$0xff]  ;;  %v735_v63 = vadd.f32 %v732_v8, %v687_v4  ;;  %v4727_v35 = vld [vmem:[#allocation41_spill] sm:$0xff]  ;;  %v4728_v53 = vld [vmem:[#allocation42_spill] sm:$0xff] }
  0xa0   :  { %v780_v37 = vmul.f32 %v1938_v36, %v4727_v35  ;;  %v792_v34 = vmul.f32 %v1942_v19, %v4728_v53  ;;  %v1962_v38 = vld [vmem:[%s4426_s0 + $0x630] sm:$0xff]  ;;  %v1966_v6 = vld [vmem:[%s4426_s0 + $0x648] sm:$0xff]  ;;  %v747_v23 = vadd.f32 %v744_v44, %v699_v59  ;;  %v4729_v1 = vld [vmem:[#allocation43_spill] sm:$0xff] }
  0xa1   :  { %v759_v9 = vadd.f32 %v756_v31, %v711_v54  ;;  %v804_v22 = vmul.f32 %v1946_v39, %v4729_v1  ;;  %v4730_v18 = vld [vmem:[#allocation44_spill] sm:$0xff]  ;;  %v1970_v60 = vld [vmem:[%s4426_s0 + $0x660] sm:$0xff]  ;;  %v1974_v36 = vld [vmem:[%s4426_s0 + $0x678] sm:$0xff]  ;;  %v771_v19 = vadd.f32 %v768_v47, %v723_v24 }
  0xa2   :  { %v816_v0 = vmul.f32 %v1950_v15, %v4730_v18  ;;  %v783_v25 = vadd.f32 %v780_v37, %v735_v63  ;;  %v4731_v4 = vld [vmem:[#allocation45_spill] sm:$0xff]  ;;  %v4732_v53 = vld [vmem:[#allocation46_spill] sm:$0xff]  ;;  %v1982_v39 = vld [vmem:[%s4426_s0 + $0x6a8] sm:$0xff]  ;;  %v795_v15 = vadd.f32 %v792_v34, %v747_v23 }
  0xa3   :  { %v828_v8 = vmul.f32 %v1954_v20, %v4731_v4  ;;  %v840_v35 = vmul.f32 %v1958_v45, %v4732_v53  ;;  %v1978_v44 = vld [vmem:[%s4426_s0 + $0x690] sm:$0xff]  ;;  %v807_v59 = vadd.f32 %v804_v22, %v759_v9  ;;  %v4733_v54 = vld [vmem:[#allocation47_spill] sm:$0xff]  ;;  %v4734_v18 = vld [vmem:[#allocation48_spill] sm:$0xff] }
  0xa4   :  { %v852_v31 = vmul.f32 %v1962_v38, %v4733_v54  ;;  %v864_v1 = vmul.f32 %v1966_v6, %v4734_v18  ;;  %v1986_v47 = vld [vmem:[%s4426_s0 + $0x6c0] sm:$0xff]  ;;  %v1990_v20 = vld [vmem:[%s4426_s0 + $0x6d8] sm:$0xff]  ;;  %v819_v45 = vadd.f32 %v816_v0, %v771_v19  ;;  %v4735_v63 = vld [vmem:[#allocation49_spill] sm:$0xff] }
  0xa5   :  { %v831_v24 = vadd.f32 %v828_v8, %v783_v25  ;;  %v876_v37 = vmul.f32 %v1970_v60, %v4735_v63  ;;  %v4736_v53 = vld [vmem:[#allocation50_spill] sm:$0xff]  ;;  %v1994_v34 = vld [vmem:[%s4426_s0 + $0x6f0] sm:$0xff]  ;;  %v1998_v38 = vld [vmem:[%s4426_s0 + $0x708] sm:$0xff]  ;;  %v843_v6 = vadd.f32 %v840_v35, %v795_v15 }
  0xa6   :  { %v888_v4 = vmul.f32 %v1974_v36, %v4736_v53  ;;  %v855_v23 = vadd.f32 %v852_v31, %v807_v59  ;;  %v4737_v9 = vld [vmem:[#allocation51_spill] sm:$0xff]  ;;  %v4738_v18 = vld [vmem:[#allocation52_spill] sm:$0xff]  ;;  %v2006_v60 = vld [vmem:[%s4426_s0 + $0x738] sm:$0xff]  ;;  %v867_v36 = vadd.f32 %v864_v1, %v819_v45 }
  0xa7   :  { %v900_v22 = vmul.f32 %v1978_v44, %v4737_v9  ;;  %v912_v54 = vmul.f32 %v1982_v39, %v4738_v18  ;;  %v2002_v0 = vld [vmem:[%s4426_s0 + $0x720] sm:$0xff]  ;;  %v879_v19 = vadd.f32 %v876_v37, %v831_v24  ;;  %v4739_v25 = vld [vmem:[#allocation53_spill] sm:$0xff]  ;;  %v4740_v53 = vld [vmem:[#allocation54_spill] sm:$0xff] }
  0xa8   :  { %v924_v8 = vmul.f32 %v1986_v47, %v4739_v25  ;;  %v936_v63 = vmul.f32 %v1990_v20, %v4740_v53  ;;  %v2010_v35 = vld [vmem:[%s4426_s0 + $0x750] sm:$0xff]  ;;  %v2014_v44 = vld [vmem:[%s4426_s0 + $0x768] sm:$0xff]  ;;  %v891_v39 = vadd.f32 %v888_v4, %v843_v6  ;;  %v4741_v59 = vld [vmem:[#allocation55_spill] sm:$0xff] }
  0xa9   :  { %v903_v15 = vadd.f32 %v900_v22, %v855_v23  ;;  %v948_v31 = vmul.f32 %v1994_v34, %v4741_v59  ;;  %v4742_v18 = vld [vmem:[#allocation56_spill] sm:$0xff]  ;;  %v2018_v1 = vld [vmem:[%s4426_s0 + $0x780] sm:$0xff]  ;;  %v2022_v47 = vld [vmem:[%s4426_s0 + $0x798] sm:$0xff]  ;;  %v915_v20 = vadd.f32 %v912_v54, %v867_v36 }
  0xaa   :  { %v960_v9 = vmul.f32 %v1998_v38, %v4742_v18  ;;  %v927_v45 = vadd.f32 %v924_v8, %v879_v19  ;;  %v4743_v24 = vld [vmem:[#allocation57_spill] sm:$0xff]  ;;  %v4744_v53 = vld [vmem:[#allocation58_spill] sm:$0xff]  ;;  %v2030_v34 = vld [vmem:[%s4426_s0 + $0x7c8] sm:$0xff]  ;;  %v939_v38 = vadd.f32 %v936_v63, %v891_v39 }
  0xab   :  { %v972_v37 = vmul.f32 %v2002_v0, %v4743_v24  ;;  %v984_v25 = vmul.f32 %v2006_v60, %v4744_v53  ;;  %v2026_v4 = vld [vmem:[%s4426_s0 + $0x7b0] sm:$0xff]  ;;  %v951_v6 = vadd.f32 %v948_v31, %v903_v15  ;;  %v4745_v23 = vld [vmem:[#allocation59_spill] sm:$0xff]  ;;  %v4746_v18 = vld [vmem:[#allocation60_spill] sm:$0xff] }
  0xac   :  { %v996_v22 = vmul.f32 %v2010_v35, %v4745_v23  ;;  %v1008_v59 = vmul.f32 %v2014_v44, %v4746_v18  ;;  %v2034_v54 = vld [vmem:[%s4426_s0 + $0x7e0] sm:$0xff]  ;;  %v2038_v0 = vld [vmem:[%s4426_s0 + $0x7f8] sm:$0xff]  ;;  %v963_v60 = vadd.f32 %v960_v9, %v915_v20  ;;  %v4747_v19 = vld [vmem:[#allocation61_spill] sm:$0xff] }
  0xad   :  { %v975_v36 = vadd.f32 %v972_v37, %v927_v45  ;;  %v1020_v8 = vmul.f32 %v2018_v1, %v4747_v19  ;;  %v4748_v53 = vld [vmem:[#allocation62_spill] sm:$0xff]  ;;  %v2042_v63 = vld [vmem:[%s4426_s0 + $0x810] sm:$0xff]  ;;  %v2046_v35 = vld [vmem:[%s4426_s0 + $0x828] sm:$0xff]  ;;  %v987_v44 = vadd.f32 %v984_v25, %v939_v38 }
  0xae   :  { %v1032_v24 = vmul.f32 %v2022_v47, %v4748_v53  ;;  %v999_v39 = vadd.f32 %v996_v22, %v951_v6  ;;  %v4749_v15 = vld [vmem:[#allocation63_spill] sm:$0xff]  ;;  %v4750_v18 = vld [vmem:[#allocation64_spill] sm:$0xff]  ;;  %v2054_v1 = vld [vmem:[%s4426_s0 + $0x858] sm:$0xff]  ;;  %v1011_v47 = vadd.f32 %v1008_v59, %v963_v60 }
  0xaf   :  { %v1044_v31 = vmul.f32 %v2026_v4, %v4749_v15  ;;  %v1056_v23 = vmul.f32 %v2030_v34, %v4750_v18  ;;  %v2050_v9 = vld [vmem:[%s4426_s0 + $0x840] sm:$0xff]  ;;  %v1023_v20 = vadd.f32 %v1020_v8, %v975_v36  ;;  %v4751_v45 = vld [vmem:[#allocation65_spill] sm:$0xff]  ;;  %v4752_v53 = vld [vmem:[#allocation66_spill] sm:$0xff] }
  0xb0   :  { %v1068_v37 = vmul.f32 %v2034_v54, %v4751_v45  ;;  %v1080_v19 = vmul.f32 %v2038_v0, %v4752_v53  ;;  %v2058_v25 = vld [vmem:[%s4426_s0 + $0x870] sm:$0xff]  ;;  %v2062_v4 = vld [vmem:[%s4426_s0 + $0x888] sm:$0xff]  ;;  %v1035_v34 = vadd.f32 %v1032_v24, %v987_v44  ;;  %v4753_v6 = vld [vmem:[#allocation67_spill] sm:$0xff] }
  0xb1   :  { %v1047_v38 = vadd.f32 %v1044_v31, %v999_v39  ;;  %v1092_v22 = vmul.f32 %v2042_v63, %v4753_v6  ;;  %v4754_v18 = vld [vmem:[#allocation68_spill] sm:$0xff]  ;;  %v2066_v59 = vld [vmem:[%s4426_s0 + $0x8a0] sm:$0xff]  ;;  %v2070_v54 = vld [vmem:[%s4426_s0 + $0x8b8] sm:$0xff]  ;;  %v1059_v0 = vadd.f32 %v1056_v23, %v1011_v47 }
  0xb2   :  { %v1104_v15 = vmul.f32 %v2046_v35, %v4754_v18  ;;  %v1071_v60 = vadd.f32 %v1068_v37, %v1023_v20  ;;  %v4755_v36 = vld [vmem:[#allocation69_spill] sm:$0xff]  ;;  %v4756_v53 = vld [vmem:[#allocation70_spill] sm:$0xff]  ;;  %v2078_v63 = vld [vmem:[%s4426_s0 + $0x8e8] sm:$0xff]  ;;  %v1083_v35 = vadd.f32 %v1080_v19, %v1035_v34 }
  0xb3   :  { %v1116_v8 = vmul.f32 %v2050_v9, %v4755_v36  ;;  %v1128_v45 = vmul.f32 %v2054_v1, %v4756_v53  ;;  %v2074_v24 = vld [vmem:[%s4426_s0 + $0x8d0] sm:$0xff]  ;;  %v1095_v44 = vadd.f32 %v1092_v22, %v1047_v38  ;;  %v4757_v39 = vld [vmem:[#allocation71_spill] sm:$0xff]  ;;  %v4758_v18 = vld [vmem:[#allocation72_spill] sm:$0xff] }
  0xb4   :  { %v1140_v31 = vmul.f32 %v2058_v25, %v4757_v39  ;;  %v1152_v6 = vmul.f32 %v2062_v4, %v4758_v18  ;;  %v2082_v23 = vld [vmem:[%s4426_s0 + $0x900] sm:$0xff]  ;;  %v2086_v9 = vld [vmem:[%s4426_s0 + $0x918] sm:$0xff]  ;;  %v1107_v1 = vadd.f32 %v1104_v15, %v1059_v0  ;;  %v4759_v20 = vld [vmem:[#allocation73_spill] sm:$0xff] }
  0xb5   :  { %v1119_v47 = vadd.f32 %v1116_v8, %v1071_v60  ;;  %v1164_v37 = vmul.f32 %v2066_v59, %v4759_v20  ;;  %v4760_v53 = vld [vmem:[#allocation74_spill] sm:$0xff]  ;;  %v2090_v19 = vld [vmem:[%s4426_s0 + $0x930] sm:$0xff]  ;;  %v2094_v25 = vld [vmem:[%s4426_s0 + $0x948] sm:$0xff]  ;;  %v1131_v4 = vadd.f32 %v1128_v45, %v1083_v35 }
  0xb6   :  { %v1176_v36 = vmul.f32 %v2070_v54, %v4760_v53  ;;  %v1143_v34 = vadd.f32 %v1140_v31, %v1095_v44  ;;  %v4761_v38 = vld [vmem:[#allocation75_spill] sm:$0xff]  ;;  %v4762_v18 = vld [vmem:[#allocation76_spill] sm:$0xff]  ;;  %v2102_v59 = vld [vmem:[%s4426_s0 + $0x978] sm:$0xff]  ;;  %v1155_v54 = vadd.f32 %v1152_v6, %v1107_v1 }
  0xb7   :  { %v1188_v22 = vmul.f32 %v2074_v24, %v4761_v38  ;;  %v1200_v39 = vmul.f32 %v2078_v63, %v4762_v18  ;;  %v2098_v15 = vld [vmem:[%s4426_s0 + $0x960] sm:$0xff]  ;;  %v1167_v0 = vadd.f32 %v1164_v37, %v1119_v47  ;;  %v4763_v60 = vld [vmem:[#allocation77_spill] sm:$0xff]  ;;  %v4764_v53 = vld [vmem:[#allocation78_spill] sm:$0xff] }
  0xb8   :  { %v1212_v8 = vmul.f32 %v2082_v23, %v4763_v60  ;;  %v1224_v20 = vmul.f32 %v2086_v9, %v4764_v53  ;;  %v2106_v45 = vld [vmem:[%s4426_s0 + $0x990] sm:$0xff]  ;;  %v2110_v24 = vld [vmem:[%s4426_s0 + $0x9a8] sm:$0xff]  ;;  %v1179_v63 = vadd.f32 %v1176_v36, %v1131_v4  ;;  %v4765_v44 = vld [vmem:[#allocation79_spill] sm:$0xff] }
  0xb9   :  { %v1191_v35 = vadd.f32 %v1188_v22, %v1143_v34  ;;  %v1236_v31 = vmul.f32 %v2090_v19, %v4765_v44  ;;  %v4766_v18 = vld [vmem:[#allocation80_spill] sm:$0xff]  ;;  %v2114_v6 = vld [vmem:[%s4426_s0 + $0x9c0] sm:$0xff]  ;;  %v2118_v23 = vld [vmem:[%s4426_s0 + $0x9d8] sm:$0xff]  ;;  %v1203_v9 = vadd.f32 %v1200_v39, %v1155_v54 }
  0xba   :  { %v1248_v38 = vmul.f32 %v2094_v25, %v4766_v18  ;;  %v1215_v1 = vadd.f32 %v1212_v8, %v1167_v0  ;;  %v4767_v47 = vld [vmem:[#allocation81_spill] sm:$0xff]  ;;  %v4768_v53 = vld [vmem:[#allocation82_spill] sm:$0xff]  ;;  %v2126_v19 = vld [vmem:[%s4426_s0 + $0xa08] sm:$0xff]  ;;  %v1227_v25 = vadd.f32 %v1224_v20, %v1179_v63 }
  0xbb   :  { %v1260_v37 = vmul.f32 %v2098_v15, %v4767_v47  ;;  %v1272_v60 = vmul.f32 %v2102_v59, %v4768_v53  ;;  %v2122_v36 = vld [vmem:[%s4426_s0 + $0x9f0] sm:$0xff]  ;;  %v1239_v4 = vadd.f32 %v1236_v31, %v1191_v35  ;;  %v4769_v34 = vld [vmem:[#allocation83_spill] sm:$0xff]  ;;  %v4770_v18 = vld [vmem:[#allocation84_spill] sm:$0xff] }
  0xbc   :  { %v1284_v22 = vmul.f32 %v2106_v45, %v4769_v34  ;;  %v1296_v44 = vmul.f32 %v2110_v24, %v4770_v18  ;;  %v2130_v39 = vld [vmem:[%s4426_s0 + $0xa20] sm:$0xff]  ;;  %v2134_v15 = vld [vmem:[%s4426_s0 + $0xa38] sm:$0xff]  ;;  %v1251_v59 = vadd.f32 %v1248_v38, %v1203_v9  ;;  %v4771_v0 = vld [vmem:[#allocation85_spill] sm:$0xff] }
  0xbd   :  { %v1263_v54 = vadd.f32 %v1260_v37, %v1215_v1  ;;  %v1308_v8 = vmul.f32 %v2114_v6, %v4771_v0  ;;  %v4772_v53 = vld [vmem:[#allocation86_spill] sm:$0xff]  ;;  %v2138_v20 = vld [vmem:[%s4426_s0 + $0xa50] sm:$0xff]  ;;  %v2142_v45 = vld [vmem:[%s4426_s0 + $0xa68] sm:$0xff]  ;;  %v1275_v24 = vadd.f32 %v1272_v60, %v1227_v25 }
  0xbe   :  { %v1320_v47 = vmul.f32 %v2118_v23, %v4772_v53  ;;  %v1287_v63 = vadd.f32 %v1284_v22, %v1239_v4  ;;  %v4773_v35 = vld [vmem:[#allocation87_spill] sm:$0xff]  ;;  %v4774_v18 = vld [vmem:[#allocation88_spill] sm:$0xff]  ;;  %v2150_v6 = vld [vmem:[%s4426_s0 + $0xa98] sm:$0xff]  ;;  %v1299_v23 = vadd.f32 %v1296_v44, %v1251_v59 }
  0xbf   :  { %v1332_v31 = vmul.f32 %v2122_v36, %v4773_v35  ;;  %v1344_v34 = vmul.f32 %v2126_v19, %v4774_v18  ;;  %v2146_v38 = vld [vmem:[%s4426_s0 + $0xa80] sm:$0xff]  ;;  %v1311_v9 = vadd.f32 %v1308_v8, %v1263_v54  ;;  %v4775_v1 = vld [vmem:[#allocation89_spill] sm:$0xff]  ;;  %v4776_v53 = vld [vmem:[#allocation90_spill] sm:$0xff] }
  0xc0   :  { %v1356_v37 = vmul.f32 %v2130_v39, %v4775_v1  ;;  %v1368_v0 = vmul.f32 %v2134_v15, %v4776_v53  ;;  %v2154_v60 = vld [vmem:[%s4426_s0 + $0xab0] sm:$0xff]  ;;  %v2158_v36 = vld [vmem:[%s4426_s0 + $0xac8] sm:$0xff]  ;;  %v1323_v19 = vadd.f32 %v1320_v47, %v1275_v24  ;;  %v4777_v4 = vld [vmem:[#allocation91_spill] sm:$0xff] }
  0xc1   :  { %v1335_v25 = vadd.f32 %v1332_v31, %v1287_v63  ;;  %v1380_v22 = vmul.f32 %v2138_v20, %v4777_v4  ;;  %v4778_v18 = vld [vmem:[#allocation92_spill] sm:$0xff]  ;;  %v2162_v44 = vld [vmem:[%s4426_s0 + $0xae0] sm:$0xff]  ;;  %v2166_v39 = vld [vmem:[%s4426_s0 + $0xaf8] sm:$0xff]  ;;  %v1347_v15 = vadd.f32 %v1344_v34, %v1299_v23 }
  0xc2   :  { %v1392_v35 = vmul.f32 %v2142_v45, %v4778_v18  ;;  %v1359_v59 = vadd.f32 %v1356_v37, %v1311_v9  ;;  %v4779_v54 = vld [vmem:[#allocation93_spill] sm:$0xff]  ;;  %v4780_v53 = vld [vmem:[#allocation94_spill] sm:$0xff]  ;;  %v2174_v20 = vld [vmem:[%s4426_s0 + $0xb28] sm:$0xff]  ;;  %v1371_v45 = vadd.f32 %v1368_v0, %v1323_v19 }
  0xc3   :  { %v1404_v8 = vmul.f32 %v2146_v38, %v4779_v54  ;;  %v1416_v1 = vmul.f32 %v2150_v6, %v4780_v53  ;;  %v2170_v47 = vld [vmem:[%s4426_s0 + $0xb10] sm:$0xff]  ;;  %v1383_v24 = vadd.f32 %v1380_v22, %v1335_v25  ;;  %v4781_v63 = vld [vmem:[#allocation95_spill] sm:$0xff]  ;;  %v4782_v18 = vld [vmem:[#allocation96_spill] sm:$0xff] }
  0xc4   :  { %v1428_v31 = vmul.f32 %v2154_v60, %v4781_v63  ;;  %v1440_v4 = vmul.f32 %v2158_v36, %v4782_v18  ;;  %v2178_v34 = vld [vmem:[%s4426_s0 + $0xb40] sm:$0xff]  ;;  %v2182_v38 = vld [vmem:[%s4426_s0 + $0xb58] sm:$0xff]  ;;  %v1395_v6 = vadd.f32 %v1392_v35, %v1347_v15  ;;  %v4783_v9 = vld [vmem:[#allocation97_spill] sm:$0xff] }
  0xc5   :  { %v1407_v23 = vadd.f32 %v1404_v8, %v1359_v59  ;;  %v1452_v37 = vmul.f32 %v2162_v44, %v4783_v9  ;;  %v4784_v53 = vld [vmem:[#allocation98_spill] sm:$0xff]  ;;  %v2186_v0 = vld [vmem:[%s4426_s0 + $0xb70] sm:$0xff]  ;;  %v1419_v36 = vadd.f32 %v1416_v1, %v1371_v45  ;;  %v4785_v25 = vld [vmem:[#allocation99_spill] sm:$0xff] }
  0xc6   :  { %v1464_v54 = vmul.f32 %v2166_v39, %v4784_v53  ;;  %v57_v60 = vld [vmem:[%s4426_s0 + $0x10] sm:$0x3]  ;;  %v1431_v19 = vadd.f32 %v1428_v31, %v1383_v24  ;;  %v1476_v22 = vmul.f32 %v2170_v47, %v4785_v25  ;;  %v4786_v18 = vld [vmem:[#allocation100_spill] sm:$0xff]  ;;  %v1708_v44 = vld [vmem:[%s4426_s0 + $0x40] sm:$0x3]  ;;  %v1443_v39 = vadd.f32 %v1440_v4, %v1395_v6 }
  0xc7   :  { %v1488_v63 = vmul.f32 %v2174_v20, %v4786_v18  ;;  %v1704_v35 = vld [vmem:[%s4426_s0 + $0x28] sm:$0x3]  ;;  %v1455_v15 = vadd.f32 %v1452_v37, %v1407_v23  ;;  %v4787_v59 = vld [vmem:[#allocation101_spill] sm:$0xff]  ;;  %v4788_v53 = vld [vmem:[#allocation102_spill] sm:$0xff]  ;;  %v1524_v4 = vmul.f32 %v2186_v0, %v3399_v43  ;;  %v86_v0 = vmul.f32 %v1708_v44, %v2318_v17 }
  0xc8   :  { %v1500_v8 = vmul.f32 %v2178_v34, %v4787_v59  ;;  %v1512_v9 = vmul.f32 %v2182_v38, %v4788_v53  ;;  %v1712_v1 = vld [vmem:[%s4426_s0 + $0x58] sm:$0x3]  ;;  %v1716_v47 = vld [vmem:[%s4426_s0 + $0x70] sm:$0x3]  ;;  %v1720_v20 = vld [vmem:[%s4426_s0 + $0x88] sm:$0x3]  ;;  %v1467_v45 = vadd.f32 %v1464_v54, %v1419_v36  ;;  %v1479_v24 = vadd.f32 %v1476_v22, %v1431_v19 }
  0xc9   :  { %v4789_v31 = vld [vmem:[#allocation12_spill] sm:$0xff]  ;;  %v1724_v38 = vld [vmem:[%s4426_s0 + $0xa0] sm:$0x3]  ;;  %v1728_v6 = vld [vmem:[%s4426_s0 + $0xb8] sm:$0x3]  ;;  %v1491_v37 = vadd.f32 %v1488_v63, %v1443_v39  ;;  %v74_v54 = vmul.f32 %v1704_v35, %v2316_v16  ;;  %v98_v22 = vmul.f32 %v1712_v1, %v2328_v21  ;;  %v122_v63 = vmul.f32 %v1720_v20, %v2351_v30 }
  0xca   :  { %v62_v34 = vmul.f32 %v4789_v31, %v57_v60  ;;  %v1732_v23 = vld [vmem:[%s4426_s0 + $0xd0] sm:$0x3]  ;;  %v1503_v53 = vadd.f32 %v1500_v8, %v1455_v15  ;;  %v1736_v60 = vld [vmem:[%s4426_s0 + $0xe8] sm:$0x3]  ;;  %v1515_v36 = vadd.f32 %v1512_v9, %v1467_v45  ;;  %v1527_v19 = vadd.f32 %v1524_v4, %v1479_v24  ;;  %v1740_v43 = vld [vmem:[%s4426_s0 + $0x100] sm:$0x3] }
  0xcb   :  { %v110_v31 = vmul.f32 %v1716_v47, %v2342_v26  ;;  %v4790_v39 = vld [vmem:[#allocation14_spill] sm:$0xff]  ;;  %v4791_v35 = vld [vmem:[#allocation15_spill] sm:$0xff]  ;;  %v158_v44 = vmul.f32 %v1732_v23, %v2378_v40  ;;  %v1748_v21 = vld [vmem:[%s4426_s0 + $0x130] sm:$0x3]  ;;  %v170_v1 = vmul.f32 %v1736_v60, %v2392_v46  ;;  %v125_v47 = vadd.f32 %v122_v63, %v74_v54 }
  0xcc   :  { %v134_v16 = vmul.f32 %v1724_v38, %v4790_v39  ;;  %v146_v17 = vmul.f32 %v1728_v6, %v4791_v35  ;;  %v1744_v9 = vld [vmem:[%s4426_s0 + $0x118] sm:$0x3]  ;;  %v1530_v26 = vadd.f32 %v1515_v36, %v1503_v53  ;;  %v1533_v15 = vadd.f32 %v1527_v19, %v1491_v37  ;;  %v1752_v30 = vld [vmem:[%s4426_s0 + $0x148] sm:$0x3]  ;;  %v1756_v40 = vld [vmem:[%s4426_s0 + $0x160] sm:$0x3] }
  0xcd   :  { %v113_v8 = vadd.f32 %v110_v31, %v62_v34  ;;  %v182_v24 = vmul.f32 %v1740_v43, %v2399_v50  ;;  %v1760_v53 = vld [vmem:[%s4426_s0 + $0x178] sm:$0x3]  ;;  %v194_v46 = vmul.f32 %v1744_v9, %v2402_v51  ;;  %v206_v38 = vmul.f32 %v1748_v21, %v2417_v57  ;;  %v1764_v6 = vld [vmem:[%s4426_s0 + $0x190] sm:$0x3]  ;;  %v1768_v23 = vld [vmem:[%s4426_s0 + $0x1a8] sm:$0x3] }
  0xce   :  { %v137_v20 = vadd.f32 %v134_v16, %v86_v0  ;;  %v149_v45 = vadd.f32 %v146_v17, %v98_v22  ;;  %v1536_v4 = vadd.f32 %v1533_v15, %v1530_v26  ;;  %v173_v37 = vadd.f32 %v170_v1, %v125_v47  ;;  %v1772_v51 = vld [vmem:[%s4426_s0 + $0x1c0] sm:$0x3]  ;;  %v1776_v57 = vld [vmem:[%s4426_s0 + $0x1d8] sm:$0x3]  ;;  %v1780_v0 = vld [vmem:[%s4426_s0 + $0x1f0] sm:$0x3] }
  0xcf   :  { %v161_v34 = vadd.f32 %v158_v44, %v113_v8  ;;  %v218_v43 = vmul.f32 %v1752_v30, %v2427_v61  ;;  %v230_v54 = vmul.f32 %v1756_v40, %v2430_v62  ;;  %v242_v61 = vmul.f32 %v1760_v53, %v2450_v11  ;;  %v1784_v62 = vld [vmem:[%s4426_s0 + $0x208] sm:$0x3]  ;;  %v1788_v22 = vld [vmem:[%s4426_s0 + $0x220] sm:$0x3]  ;;  %v1792_v35 = vld [vmem:[%s4426_s0 + $0x238] sm:$0x3] }
  0xd0   :  { %v185_v50 = vadd.f32 %v182_v24, %v137_v20  ;;  %v1541_v60 = vadd.f32 %v2284_v2, %v1536_v4  ;;  %v197_v36 = vadd.f32 %v194_v46, %v149_v45  ;;  %v254_v39 = vmul.f32 %v1764_v6, %v2453_v12  ;;  %v1796_v11 = vld [vmem:[%s4426_s0 + $0x250] sm:$0x3]  ;;  %v1800_v12 = vld [vmem:[%s4426_s0 + $0x268] sm:$0x3] }
  0xd1   :  { %v209_v19 = vadd.f32 %v206_v38, %v161_v34  ;;  %v221_v31 = vadd.f32 %v218_v43, %v173_v37  ;;  %v266_v16 = vmul.f32 %v1768_v23, %v2456_v13  ;;  %v278_v44 = vmul.f32 %v1772_v51, %v2480_v28  ;;  %v1804_v13 = vld [vmem:[%s4426_s0 + $0x280] sm:$0x3]  ;;  %v1808_v28 = vld [vmem:[%s4426_s0 + $0x298] sm:$0x3] }
  0xd2   :  { %v233_v63 = vadd.f32 %v230_v54, %v185_v50  ;;  %1545 = vst.msk [vmem:[#allocation2 + $0x18] sm:$0xff] %vm1544_vm1, %v1541_v60  ;;  %v245_v17 = vadd.f32 %v242_v61, %v197_v36  ;;  %v290_v9 = vmul.f32 %v1776_v57, %v2483_v29  ;;  %v302_v21 = vmul.f32 %v1780_v0, %v2486_v32  ;;  %v1812_v29 = vld [vmem:[%s4426_s0 + $0x2b0] sm:$0x3] }
  0xd3   :  { %v257_v26 = vadd.f32 %v254_v39, %v209_v19  ;;  %v269_v15 = vadd.f32 %v266_v16, %v221_v31  ;;  %v314_v8 = vmul.f32 %v1784_v62, %v2498_v41  ;;  %v326_v1 = vmul.f32 %v1788_v22, %v2501_v42  ;;  %v1816_v41 = vld [vmem:[%s4426_s0 + $0x2c8] sm:$0x3]  ;;  %v1820_v42 = vld [vmem:[%s4426_s0 + $0x2e0] sm:$0x3]  ;;  %v1844_v57 = vld [vmem:[%s4426_s0 + $0x370] sm:$0x3] }
  0xd4   :  { %v281_v32 = vadd.f32 %v278_v44, %v233_v63  ;;  %v293_v30 = vadd.f32 %v290_v9, %v245_v17  ;;  %v338_v40 = vmul.f32 %v1792_v35, %v2524_v55  ;;  %v350_v47 = vmul.f32 %v1796_v11, %v2527_v56  ;;  %v1824_v55 = vld [vmem:[%s4426_s0 + $0x2f8] sm:$0x3]  ;;  %v1828_v56 = vld [vmem:[%s4426_s0 + $0x310] sm:$0x3]  ;;  %v4792_v31 = vld [vmem:[#allocation16_spill] sm:$0xff] }
  0xd5   :  { %v305_v20 = vadd.f32 %v302_v21, %v257_v26  ;;  %v317_v45 = vadd.f32 %v314_v8, %v269_v15  ;;  %v362_v24 = vmul.f32 %v1800_v12, %v2530_v58  ;;  %v374_v53 = vmul.f32 %v1804_v13, %v2549_v7  ;;  %v1832_v58 = vld [vmem:[%s4426_s0 + $0x328] sm:$0x3]  ;;  %v1836_v7 = vld [vmem:[%s4426_s0 + $0x340] sm:$0x3]  ;;  %v4793_v35 = vld [vmem:[#allocation17_spill] sm:$0xff] }
  0xd6   :  { %v329_v4 = vadd.f32 %v326_v1, %v281_v32  ;;  %v341_v34 = vadd.f32 %v338_v40, %v293_v30  ;;  %v386_v46 = vmul.f32 %v1808_v28, %v2552_v10  ;;  %v398_v38 = vmul.f32 %v1812_v29, %v2555_v14  ;;  %v1840_v10 = vld [vmem:[%s4426_s0 + $0x358] sm:$0x3]  ;;  %v1868_v9 = vld [vmem:[%s4426_s0 + $0x400] sm:$0x3]  ;;  %v4796_v8 = vld [vmem:[#allocation20_spill] sm:$0xff] }
  0xd7   :  { %v353_v6 = vadd.f32 %v350_v47, %v305_v20  ;;  %v365_v23 = vadd.f32 %v362_v24, %v317_v45  ;;  %v410_v37 = vmul.f32 %v1816_v41, %v2570_v27  ;;  %v422_v50 = vmul.f32 %v1820_v42, %v2573_v33  ;;  %v1848_v27 = vld [vmem:[%s4426_s0 + $0x388] sm:$0x3]  ;;  %v4794_v17 = vld [vmem:[#allocation18_spill] sm:$0xff]  ;;  %v4795_v26 = vld [vmem:[#allocation19_spill] sm:$0xff] }
  0xd8   :  { %v377_v43 = vadd.f32 %v374_v53, %v329_v4  ;;  %v389_v14 = vadd.f32 %v386_v46, %v341_v34  ;;  %v434_v54 = vmul.f32 %v1824_v55, %v2596_v48  ;;  %v446_v51 = vmul.f32 %v1828_v56, %v2599_v49  ;;  %v1852_v48 = vld [vmem:[%s4426_s0 + $0x3a0] sm:$0x3]  ;;  %v1856_v49 = vld [vmem:[%s4426_s0 + $0x3b8] sm:$0x3]  ;;  %v1876_v28 = vld [vmem:[%s4426_s0 + $0x430] sm:$0x3] }
  0xd9   :  { %v4032_v0 = vld [vmem:[#allocation2 + $0x18] sm:$0xff]  ;;  %v401_v33 = vadd.f32 %v398_v38, %v353_v6  ;;  %v413_v60 = vadd.f32 %v410_v37, %v365_v23  ;;  %v458_v36 = vmul.f32 %v1832_v58, %v2602_v52  ;;  %v470_v19 = vmul.f32 %v1836_v7, %v2621_v5  ;;  %v1860_v52 = vld [vmem:[%s4426_s0 + $0x3d0] sm:$0x3]  ;;  %v1864_v5 = vld [vmem:[%s4426_s0 + $0x3e8] sm:$0x3] }
  0xda   :  { %v1567_v61 = vmul.f32 %v2286_v3, %v4032_v0  ;;  %v425_v62 = vadd.f32 %v422_v50, %v377_v43  ;;  %v437_v22 = vadd.f32 %v434_v54, %v389_v14  ;;  %v482_v63 = vmul.f32 %v1840_v10, %v4792_v31  ;;  %v1872_v21 = vld [vmem:[%s4426_s0 + $0x418] sm:$0x3]  ;;  %v1880_v29 = vld [vmem:[%s4426_s0 + $0x448] sm:$0x3]  ;;  %v4797_v40 = vld [vmem:[#allocation21_spill] sm:$0xff] }
  0xdb   :  { %v449_v39 = vadd.f32 %v446_v51, %v401_v33  ;;  %v461_v16 = vadd.f32 %v458_v36, %v413_v60  ;;  %v494_v11 = vmul.f32 %v1844_v57, %v4793_v35  ;;  %v506_v44 = vmul.f32 %v1848_v27, %v4794_v17  ;;  %v4798_v41 = vld [vmem:[#allocation22_spill] sm:$0xff]  ;;  %v1884_v20 = vld [vmem:[%s4426_s0 + $0x460] sm:$0x3]  ;;  %v4800_v4 = vld [vmem:[#allocation24_spill] sm:$0xff] }
  0xdc   :  { %1580 = vrot.lane.b32.xlu0 %v1567_v61, %s2229_s27  ;;  %v473_v12 = vadd.f32 %v470_v19, %v425_v62  ;;  %v485_v13 = vadd.f32 %v482_v63, %v437_v22  ;;  %v518_v15 = vmul.f32 %v1852_v48, %v4795_v26  ;;  %v530_v1 = vmul.f32 %v1856_v49, %v4796_v8  ;;  %v1888_v45 = vld [vmem:[%s4426_s0 + $0x478] sm:$0x3]  ;;  %v4799_v55 = vld [vmem:[#allocation23_spill] sm:$0xff]  ;;  %v1892_v46 = vld [vmem:[%s4426_s0 + $0x490] sm:$0x3] }
  0xdd   :  { %v497_v32 = vadd.f32 %v494_v11, %v449_v39  ;;  %v509_v30 = vadd.f32 %v506_v44, %v461_v16  ;;  %v542_v47 = vmul.f32 %v1860_v52, %v4797_v40  ;;  %v554_v42 = vmul.f32 %v1864_v5, %v4798_v41  ;;  %v1896_v38 = vld [vmem:[%s4426_s0 + $0x4a8] sm:$0x3]  ;;  %v4801_v6 = vld [vmem:[#allocation25_spill] sm:$0xff]  ;;  %v4802_v37 = vld [vmem:[#allocation26_spill] sm:$0xff] }
  0xde   :  { %v521_v24 = vadd.f32 %v518_v15, %v473_v12  ;;  %v533_v53 = vadd.f32 %v530_v1, %v485_v13  ;;  %v566_v56 = vmul.f32 %v1868_v9, %v4799_v55  ;;  %v578_v34 = vmul.f32 %v1872_v21, %v4800_v4  ;;  %v1900_v10 = vld [vmem:[%s4426_s0 + $0x4c0] sm:$0x3]  ;;  %v1904_v43 = vld [vmem:[%s4426_s0 + $0x4d8] sm:$0x3]  ;;  %v4804_v27 = vld [vmem:[#allocation28_spill] sm:$0xff] }
  0xdf   :  { %v545_v58 = vadd.f32 %v542_v47, %v497_v32  ;;  %v557_v7 = vadd.f32 %v554_v42, %v509_v30  ;;  %v590_v23 = vmul.f32 %v1876_v28, %v4801_v6  ;;  %v602_v50 = vmul.f32 %v1880_v29, %v4802_v37  ;;  %v4803_v51 = vld [vmem:[#allocation27_spill] sm:$0xff]  ;;  %v1908_v60 = vld [vmem:[%s4426_s0 + $0x4f0] sm:$0x3]  ;;  %v1912_v36 = vld [vmem:[%s4426_s0 + $0x508] sm:$0x3] }
  0xe0   :  { %v569_v14 = vadd.f32 %v566_v56, %v521_v24  ;;  %v581_v54 = vadd.f32 %v578_v34, %v533_v53  ;;  %v614_v57 = vmul.f32 %v1884_v20, %v4803_v51  ;;  %v626_v33 = vmul.f32 %v1888_v45, %v4804_v27  ;;  %v4805_v49 = vld [vmem:[#allocation29_spill] sm:$0xff]  ;;  %v4806_v62 = vld [vmem:[#allocation30_spill] sm:$0xff]  ;;  %v1916_v31 = vld [vmem:[%s4426_s0 + $0x520] sm:$0x3] }
  0xe1   :  { %v593_v19 = vadd.f32 %v590_v23, %v545_v58  ;;  %v605_v48 = vadd.f32 %v602_v50, %v557_v7  ;;  %v638_v61 = vmul.f32 %v1892_v46, %v4805_v49  ;;  %v650_v22 = vmul.f32 %v1896_v38, %v4806_v62  ;;  %v1920_v63 = vld [vmem:[%s4426_s0 + $0x538] sm:$0x3]  ;;  %v4807_v39 = vld [vmem:[#allocation31_spill] sm:$0xff]  ;;  %v4808_v35 = vld [vmem:[#allocation32_spill] sm:$0xff] }
  0xe2   :  { %v617_v52 = vadd.f32 %v614_v57, %v569_v14  ;;  %v629_v5 = vadd.f32 %v626_v33, %v581_v54  ;;  %v662_v16 = vmul.f32 %v1900_v10, %v4807_v39  ;;  %v674_v11 = vmul.f32 %v1904_v43, %v4808_v35  ;;  %v1924_v17 = vld [vmem:[%s4426_s0 + $0x550] sm:$0x3]  ;;  %v1928_v44 = vld [vmem:[%s4426_s0 + $0x568] sm:$0x3]  ;;  %v4810_v26 = vld [vmem:[#allocation34_spill] sm:$0xff] }
  0xe3   :  { %v641_v9 = vadd.f32 %v638_v61, %v593_v19  ;;  %v653_v21 = vadd.f32 %v650_v22, %v605_v48  ;;  %v4809_v12 = vld [vmem:[#allocation33_spill] sm:$0xff]  ;;  %v698_v15 = vmul.f32 %v1912_v36, %v4810_v26  ;;  %v1932_v8 = vld [vmem:[%s4426_s0 + $0x580] sm:$0x3]  ;;  %v1936_v1 = vld [vmem:[%s4426_s0 + $0x598] sm:$0x3] }
  0xe4   :  { %v686_v13 = vmul.f32 %v1908_v60, %v4809_v12  ;;  %v665_v28 = vadd.f32 %v662_v16, %v617_v52  ;;  %v677_v29 = vadd.f32 %v674_v11, %v629_v5  ;;  %v4811_v32 = vld [vmem:[#allocation35_spill] sm:$0xff]  ;;  %v4812_v40 = vld [vmem:[#allocation36_spill] sm:$0xff]  ;;  %v1940_v41 = vld [vmem:[%s4426_s0 + $0x5b0] sm:$0x3] }
  0xe5   :  { %v710_v30 = vmul.f32 %v1916_v31, %v4811_v32  ;;  %v722_v47 = vmul.f32 %v1920_v63, %v4812_v40  ;;  %v1944_v42 = vld [vmem:[%s4426_s0 + $0x5c8] sm:$0x3]  ;;  %v701_v45 = vadd.f32 %v698_v15, %v653_v21  ;;  %v4813_v24 = vld [vmem:[#allocation37_spill] sm:$0xff]  ;;  %v4814_v55 = vld [vmem:[#allocation38_spill] sm:$0xff] }
  0xe6   :  { %v689_v20 = vadd.f32 %v686_v13, %v641_v9  ;;  %v734_v53 = vmul.f32 %v1924_v17, %v4813_v24  ;;  %v746_v56 = vmul.f32 %v1928_v44, %v4814_v55  ;;  %v1948_v4 = vld [vmem:[%s4426_s0 + $0x5e0] sm:$0x3]  ;;  %v1952_v34 = vld [vmem:[%s4426_s0 + $0x5f8] sm:$0x3]  ;;  %v4816_v6 = vld [vmem:[#allocation40_spill] sm:$0xff] }
  0xe7   :  { %v713_v46 = vadd.f32 %v710_v30, %v665_v28  ;;  %v725_v38 = vadd.f32 %v722_v47, %v677_v29  ;;  %v4815_v58 = vld [vmem:[#allocation39_spill] sm:$0xff]  ;;  %v770_v23 = vmul.f32 %v1936_v1, %v4816_v6  ;;  %v1956_v37 = vld [vmem:[%s4426_s0 + $0x610] sm:$0x3]  ;;  %v1960_v50 = vld [vmem:[%s4426_s0 + $0x628] sm:$0x3] }
  0xe8   :  { %v758_v7 = vmul.f32 %v1932_v8, %v4815_v58  ;;  %v737_v10 = vadd.f32 %v734_v53, %v689_v20  ;;  %v749_v43 = vadd.f32 %v746_v56, %v701_v45  ;;  %v4817_v14 = vld [vmem:[#allocation41_spill] sm:$0xff]  ;;  %v4818_v51 = vld [vmem:[#allocation42_spill] sm:$0xff]  ;;  %v1964_v27 = vld [vmem:[%s4426_s0 + $0x640] sm:$0x3] }
  0xe9   :  { %v782_v54 = vmul.f32 %v1940_v41, %v4817_v14  ;;  %v794_v57 = vmul.f32 %v1944_v42, %v4818_v51  ;;  %v1968_v33 = vld [vmem:[%s4426_s0 + $0x658] sm:$0x3]  ;;  %v773_v36 = vadd.f32 %v770_v23, %v725_v38  ;;  %v4819_v19 = vld [vmem:[#allocation43_spill] sm:$0xff]  ;;  %v4820_v49 = vld [vmem:[#allocation44_spill] sm:$0xff] }
  0xea   :  { %v761_v60 = vadd.f32 %v758_v7, %v713_v46  ;;  %v806_v48 = vmul.f32 %v1948_v4, %v4819_v19  ;;  %v818_v61 = vmul.f32 %v1952_v34, %v4820_v49  ;;  %v1972_v62 = vld [vmem:[%s4426_s0 + $0x670] sm:$0x3]  ;;  %v1976_v22 = vld [vmem:[%s4426_s0 + $0x688] sm:$0x3]  ;;  %v4822_v39 = vld [vmem:[#allocation46_spill] sm:$0xff] }
  0xeb   :  { %v785_v31 = vadd.f32 %v782_v54, %v737_v10  ;;  %v797_v63 = vadd.f32 %v794_v57, %v749_v43  ;;  %v4821_v52 = vld [vmem:[#allocation45_spill] sm:$0xff]  ;;  %v842_v16 = vmul.f32 %v1960_v50, %v4822_v39  ;;  %v1980_v35 = vld [vmem:[%s4426_s0 + $0x6a0] sm:$0x3]  ;;  %v1984_v11 = vld [vmem:[%s4426_s0 + $0x6b8] sm:$0x3] }
  0xec   :  { %v830_v5 = vmul.f32 %v1956_v37, %v4821_v52  ;;  %v809_v17 = vadd.f32 %v806_v48, %v761_v60  ;;  %v821_v44 = vadd.f32 %v818_v61, %v773_v36  ;;  %v4823_v9 = vld [vmem:[#allocation47_spill] sm:$0xff]  ;;  %v4824_v12 = vld [vmem:[#allocation48_spill] sm:$0xff]  ;;  %v1988_v26 = vld [vmem:[%s4426_s0 + $0x6d0] sm:$0x3] }
  0xed   :  { %v854_v21 = vmul.f32 %v1964_v27, %v4823_v9  ;;  %v866_v13 = vmul.f32 %v1968_v33, %v4824_v12  ;;  %v1992_v15 = vld [vmem:[%s4426_s0 + $0x6e8] sm:$0x3]  ;;  %v845_v1 = vadd.f32 %v842_v16, %v797_v63  ;;  %v4825_v28 = vld [vmem:[#allocation49_spill] sm:$0xff]  ;;  %v4826_v32 = vld [vmem:[#allocation50_spill] sm:$0xff] }
  0xee   :  { %v833_v8 = vadd.f32 %v830_v5, %v785_v31  ;;  %v878_v29 = vmul.f32 %v1972_v62, %v4825_v28  ;;  %v890_v30 = vmul.f32 %v1976_v22, %v4826_v32  ;;  %v1996_v40 = vld [vmem:[%s4426_s0 + $0x700] sm:$0x3]  ;;  %v2000_v47 = vld [vmem:[%s4426_s0 + $0x718] sm:$0x3]  ;;  %v4828_v24 = vld [vmem:[#allocation52_spill] sm:$0xff] }
  0xef   :  { %v857_v41 = vadd.f32 %v854_v21, %v809_v17  ;;  %v869_v42 = vadd.f32 %v866_v13, %v821_v44  ;;  %v4827_v20 = vld [vmem:[#allocation51_spill] sm:$0xff]  ;;  %v914_v53 = vmul.f32 %v1984_v11, %v4828_v24  ;;  %v2004_v55 = vld [vmem:[%s4426_s0 + $0x730] sm:$0x3]  ;;  %v2008_v56 = vld [vmem:[%s4426_s0 + $0x748] sm:$0x3] }
  0xf0   :  { %v902_v45 = vmul.f32 %v1980_v35, %v4827_v20  ;;  %v881_v4 = vadd.f32 %v878_v29, %v833_v8  ;;  %v893_v34 = vadd.f32 %v890_v30, %v845_v1  ;;  %v4829_v46 = vld [vmem:[#allocation53_spill] sm:$0xff]  ;;  %v4830_v58 = vld [vmem:[#allocation54_spill] sm:$0xff]  ;;  %v2012_v6 = vld [vmem:[%s4426_s0 + $0x760] sm:$0x3] }
  0xf1   :  { %v926_v38 = vmul.f32 %v1988_v26, %v4829_v46  ;;  %v938_v7 = vmul.f32 %v1992_v15, %v4830_v58  ;;  %v2016_v23 = vld [vmem:[%s4426_s0 + $0x778] sm:$0x3]  ;;  %v917_v50 = vadd.f32 %v914_v53, %v869_v42  ;;  %v4831_v10 = vld [vmem:[#allocation55_spill] sm:$0xff]  ;;  %v4832_v14 = vld [vmem:[#allocation56_spill] sm:$0xff] }
  0xf2   :  { %v905_v37 = vadd.f32 %v902_v45, %v857_v41  ;;  %v950_v43 = vmul.f32 %v1996_v40, %v4831_v10  ;;  %v962_v54 = vmul.f32 %v2000_v47, %v4832_v14  ;;  %v2020_v51 = vld [vmem:[%s4426_s0 + $0x790] sm:$0x3]  ;;  %v2024_v57 = vld [vmem:[%s4426_s0 + $0x7a8] sm:$0x3]  ;;  %v4834_v19 = vld [vmem:[#allocation58_spill] sm:$0xff] }
  0xf3   :  { %v929_v27 = vadd.f32 %v926_v38, %v881_v4  ;;  %v941_v33 = vadd.f32 %v938_v7, %v893_v34  ;;  %v4833_v60 = vld [vmem:[#allocation57_spill] sm:$0xff]  ;;  %v986_v48 = vmul.f32 %v2008_v56, %v4834_v19  ;;  %v2028_v49 = vld [vmem:[%s4426_s0 + $0x7c0] sm:$0x3]  ;;  %v2032_v61 = vld [vmem:[%s4426_s0 + $0x7d8] sm:$0x3] }
  0xf4   :  { %v974_v36 = vmul.f32 %v2004_v55, %v4833_v60  ;;  %v953_v62 = vadd.f32 %v950_v43, %v905_v37  ;;  %v965_v22 = vadd.f32 %v962_v54, %v917_v50  ;;  %v4835_v31 = vld [vmem:[#allocation59_spill] sm:$0xff]  ;;  %v4836_v52 = vld [vmem:[#allocation60_spill] sm:$0xff]  ;;  %v2036_v39 = vld [vmem:[%s4426_s0 + $0x7f0] sm:$0x3] }
  0xf5   :  { %v998_v63 = vmul.f32 %v2012_v6, %v4835_v31  ;;  %v1010_v5 = vmul.f32 %v2016_v23, %v4836_v52  ;;  %v2040_v16 = vld [vmem:[%s4426_s0 + $0x808] sm:$0x3]  ;;  %v989_v11 = vadd.f32 %v986_v48, %v941_v33  ;;  %v4837_v17 = vld [vmem:[#allocation61_spill] sm:$0xff]  ;;  %v4838_v9 = vld [vmem:[#allocation62_spill] sm:$0xff] }
  0xf6   :  { %v977_v35 = vadd.f32 %v974_v36, %v929_v27  ;;  %v1022_v44 = vmul.f32 %v2020_v51, %v4837_v17  ;;  %v1034_v21 = vmul.f32 %v2024_v57, %v4838_v9  ;;  %v2044_v12 = vld [vmem:[%s4426_s0 + $0x820] sm:$0x3]  ;;  %v2048_v13 = vld [vmem:[%s4426_s0 + $0x838] sm:$0x3]  ;;  %v4840_v28 = vld [vmem:[#allocation64_spill] sm:$0xff] }
  0xf7   :  { %v1001_v26 = vadd.f32 %v998_v63, %v953_v62  ;;  %v1013_v15 = vadd.f32 %v1010_v5, %v965_v22  ;;  %v4839_v8 = vld [vmem:[#allocation63_spill] sm:$0xff]  ;;  %v1058_v29 = vmul.f32 %v2032_v61, %v4840_v28  ;;  %v2052_v32 = vld [vmem:[%s4426_s0 + $0x850] sm:$0x3]  ;;  %v2056_v30 = vld [vmem:[%s4426_s0 + $0x868] sm:$0x3] }
  0xf8   :  { %v1046_v1 = vmul.f32 %v2028_v49, %v4839_v8  ;;  %v1025_v40 = vadd.f32 %v1022_v44, %v977_v35  ;;  %v1037_v47 = vadd.f32 %v1034_v21, %v989_v11  ;;  %v4841_v41 = vld [vmem:[#allocation65_spill] sm:$0xff]  ;;  %v4842_v20 = vld [vmem:[#allocation66_spill] sm:$0xff]  ;;  %v2060_v24 = vld [vmem:[%s4426_s0 + $0x880] sm:$0x3] }
  0xf9   :  { %v1070_v42 = vmul.f32 %v2036_v39, %v4841_v41  ;;  %v1082_v45 = vmul.f32 %v2040_v16, %v4842_v20  ;;  %v2064_v53 = vld [vmem:[%s4426_s0 + $0x898] sm:$0x3]  ;;  %v1061_v56 = vadd.f32 %v1058_v29, %v1013_v15  ;;  %v4843_v4 = vld [vmem:[#allocation67_spill] sm:$0xff]  ;;  %v4844_v46 = vld [vmem:[#allocation68_spill] sm:$0xff] }
  0xfa   :  { %v1049_v55 = vadd.f32 %v1046_v1, %v1001_v26  ;;  %v1094_v34 = vmul.f32 %v2044_v12, %v4843_v4  ;;  %v1106_v38 = vmul.f32 %v2048_v13, %v4844_v46  ;;  %v2068_v58 = vld [vmem:[%s4426_s0 + $0x8b0] sm:$0x3]  ;;  %v2072_v7 = vld [vmem:[%s4426_s0 + $0x8c8] sm:$0x3]  ;;  %v4846_v10 = vld [vmem:[#allocation70_spill] sm:$0xff] }
  0xfb   :  { %v1073_v6 = vadd.f32 %v1070_v42, %v1025_v40  ;;  %v1085_v23 = vadd.f32 %v1082_v45, %v1037_v47  ;;  %v4845_v37 = vld [vmem:[#allocation69_spill] sm:$0xff]  ;;  %v1130_v43 = vmul.f32 %v2056_v30, %v4846_v10  ;;  %v2076_v14 = vld [vmem:[%s4426_s0 + $0x8e0] sm:$0x3]  ;;  %v2080_v54 = vld [vmem:[%s4426_s0 + $0x8f8] sm:$0x3] }
  0xfc   :  { %v1118_v50 = vmul.f32 %v2052_v32, %v4845_v37  ;;  %v1097_v51 = vadd.f32 %v1094_v34, %v1049_v55  ;;  %v1109_v57 = vadd.f32 %v1106_v38, %v1061_v56  ;;  %v4847_v27 = vld [vmem:[#allocation71_spill] sm:$0xff]  ;;  %v4848_v60 = vld [vmem:[#allocation72_spill] sm:$0xff]  ;;  %v2084_v19 = vld [vmem:[%s4426_s0 + $0x910] sm:$0x3] }
  0xfd   :  { %v1142_v33 = vmul.f32 %v2060_v24, %v4847_v27  ;;  %v1154_v36 = vmul.f32 %v2064_v53, %v4848_v60  ;;  %v2088_v48 = vld [vmem:[%s4426_s0 + $0x928] sm:$0x3]  ;;  %v1133_v61 = vadd.f32 %v1130_v43, %v1085_v23  ;;  %v4849_v62 = vld [vmem:[#allocation73_spill] sm:$0xff]  ;;  %v4850_v31 = vld [vmem:[#allocation74_spill] sm:$0xff] }
  0xfe   :  { %v1121_v49 = vadd.f32 %v1118_v50, %v1073_v6  ;;  %v1166_v22 = vmul.f32 %v2068_v58, %v4849_v62  ;;  %v1178_v63 = vmul.f32 %v2072_v7, %v4850_v31  ;;  %v2092_v52 = vld [vmem:[%s4426_s0 + $0x940] sm:$0x3]  ;;  %v2096_v5 = vld [vmem:[%s4426_s0 + $0x958] sm:$0x3]  ;;  %v4852_v17 = vld [vmem:[#allocation76_spill] sm:$0xff] }
  0xff   :  { %v1145_v39 = vadd.f32 %v1142_v33, %v1097_v51  ;;  %v1157_v16 = vadd.f32 %v1154_v36, %v1109_v57  ;;  %v4851_v35 = vld [vmem:[#allocation75_spill] sm:$0xff]  ;;  %v1202_v44 = vmul.f32 %v2080_v54, %v4852_v17  ;;  %v2100_v9 = vld [vmem:[%s4426_s0 + $0x970] sm:$0x3]  ;;  %v2104_v21 = vld [vmem:[%s4426_s0 + $0x988] sm:$0x3] }
 0x100   :  { %v1190_v11 = vmul.f32 %v2076_v14, %v4851_v35  ;;  %v1169_v12 = vadd.f32 %v1166_v22, %v1121_v49  ;;  %v1181_v13 = vadd.f32 %v1178_v63, %v1133_v61  ;;  %v4853_v26 = vld [vmem:[#allocation77_spill] sm:$0xff]  ;;  %v4854_v8 = vld [vmem:[#allocation78_spill] sm:$0xff]  ;;  %v2108_v28 = vld [vmem:[%s4426_s0 + $0x9a0] sm:$0x3] }
 0x101   :  { %v1214_v15 = vmul.f32 %v2084_v19, %v4853_v26  ;;  %v1226_v1 = vmul.f32 %v2088_v48, %v4854_v8  ;;  %v2112_v29 = vld [vmem:[%s4426_s0 + $0x9b8] sm:$0x3]  ;;  %v1205_v30 = vadd.f32 %v1202_v44, %v1157_v16  ;;  %v4855_v40 = vld [vmem:[#allocation79_spill] sm:$0xff]  ;;  %v4856_v41 = vld [vmem:[#allocation80_spill] sm:$0xff] }
 0x102   :  { %v1193_v32 = vadd.f32 %v1190_v11, %v1145_v39  ;;  %v1238_v47 = vmul.f32 %v2092_v52, %v4855_v40  ;;  %v1250_v42 = vmul.f32 %v2096_v5, %v4856_v41  ;;  %v2116_v20 = vld [vmem:[%s4426_s0 + $0x9d0] sm:$0x3]  ;;  %v2120_v45 = vld [vmem:[%s4426_s0 + $0x9e8] sm:$0x3]  ;;  %v4858_v4 = vld [vmem:[#allocation82_spill] sm:$0xff] }
 0x103   :  { %v1217_v24 = vadd.f32 %v1214_v15, %v1169_v12  ;;  %v1229_v53 = vadd.f32 %v1226_v1, %v1181_v13  ;;  %v4857_v55 = vld [vmem:[#allocation81_spill] sm:$0xff]  ;;  %v1274_v34 = vmul.f32 %v2104_v21, %v4858_v4  ;;  %v2124_v46 = vld [vmem:[%s4426_s0 + $0xa00] sm:$0x3]  ;;  %v2128_v38 = vld [vmem:[%s4426_s0 + $0xa18] sm:$0x3] }
 0x104   :  { %v1262_v56 = vmul.f32 %v2100_v9, %v4857_v55  ;;  %v1241_v58 = vadd.f32 %v1238_v47, %v1193_v32  ;;  %v1253_v7 = vadd.f32 %v1250_v42, %v1205_v30  ;;  %v4859_v6 = vld [vmem:[#allocation83_spill] sm:$0xff]  ;;  %v4860_v37 = vld [vmem:[#allocation84_spill] sm:$0xff]  ;;  %v2132_v10 = vld [vmem:[%s4426_s0 + $0xa30] sm:$0x3] }
 0x105   :  { %v1286_v23 = vmul.f32 %v2108_v28, %v4859_v6  ;;  %v1298_v50 = vmul.f32 %v2112_v29, %v4860_v37  ;;  %v2136_v43 = vld [vmem:[%s4426_s0 + $0xa48] sm:$0x3]  ;;  %v1277_v54 = vadd.f32 %v1274_v34, %v1229_v53  ;;  %v4861_v51 = vld [vmem:[#allocation85_spill] sm:$0xff]  ;;  %v4862_v27 = vld [vmem:[#allocation86_spill] sm:$0xff] }
 0x106   :  { %v1265_v14 = vadd.f32 %v1262_v56, %v1217_v24  ;;  %v1310_v57 = vmul.f32 %v2116_v20, %v4861_v51  ;;  %v1322_v33 = vmul.f32 %v2120_v45, %v4862_v27  ;;  %v2140_v60 = vld [vmem:[%s4426_s0 + $0xa60] sm:$0x3]  ;;  %v2144_v36 = vld [vmem:[%s4426_s0 + $0xa78] sm:$0x3]  ;;  %v4864_v62 = vld [vmem:[#allocation88_spill] sm:$0xff] }
 0x107   :  { %v1289_v19 = vadd.f32 %v1286_v23, %v1241_v58  ;;  %v1301_v48 = vadd.f32 %v1298_v50, %v1253_v7  ;;  %v4863_v49 = vld [vmem:[#allocation87_spill] sm:$0xff]  ;;  %v1346_v22 = vmul.f32 %v2128_v38, %v4864_v62  ;;  %v2148_v31 = vld [vmem:[%s4426_s0 + $0xa90] sm:$0x3]  ;;  %v2152_v63 = vld [vmem:[%s4426_s0 + $0xaa8] sm:$0x3] }
 0x108   :  { %v1334_v61 = vmul.f32 %v2124_v46, %v4863_v49  ;;  %v1313_v52 = vadd.f32 %v1310_v57, %v1265_v14  ;;  %v1325_v5 = vadd.f32 %v1322_v33, %v1277_v54  ;;  %v4865_v39 = vld [vmem:[#allocation89_spill] sm:$0xff]  ;;  %v4866_v35 = vld [vmem:[#allocation90_spill] sm:$0xff]  ;;  %v2156_v17 = vld [vmem:[%s4426_s0 + $0xac0] sm:$0x3] }
 0x109   :  { %v1358_v16 = vmul.f32 %v2132_v10, %v4865_v39  ;;  %v1370_v11 = vmul.f32 %v2136_v43, %v4866_v35  ;;  %v2160_v44 = vld [vmem:[%s4426_s0 + $0xad8] sm:$0x3]  ;;  %v1349_v21 = vadd.f32 %v1346_v22, %v1301_v48  ;;  %v4867_v12 = vld [vmem:[#allocation91_spill] sm:$0xff]  ;;  %v4868_v26 = vld [vmem:[#allocation92_spill] sm:$0xff] }
 0x10a   :  { %v1337_v9 = vadd.f32 %v1334_v61, %v1289_v19  ;;  %v1382_v13 = vmul.f32 %v2140_v60, %v4867_v12  ;;  %v1394_v15 = vmul.f32 %v2144_v36, %v4868_v26  ;;  %v2164_v8 = vld [vmem:[%s4426_s0 + $0xaf0] sm:$0x3]  ;;  %v2168_v1 = vld [vmem:[%s4426_s0 + $0xb08] sm:$0x3]  ;;  %v4870_v40 = vld [vmem:[#allocation94_spill] sm:$0xff] }
 0x10b   :  { %v1361_v28 = vadd.f32 %v1358_v16, %v1313_v52  ;;  %v1373_v29 = vadd.f32 %v1370_v11, %v1325_v5  ;;  %v4869_v32 = vld [vmem:[#allocation93_spill] sm:$0xff]  ;;  %v1418_v47 = vmul.f32 %v2152_v63, %v4870_v40  ;;  %v2172_v41 = vld [vmem:[%s4426_s0 + $0xb20] sm:$0x3]  ;;  %v2176_v42 = vld [vmem:[%s4426_s0 + $0xb38] sm:$0x3] }
 0x10c   :  { %v1406_v30 = vmul.f32 %v2148_v31, %v4869_v32  ;;  %v1385_v20 = vadd.f32 %v1382_v13, %v1337_v9  ;;  %v1397_v45 = vadd.f32 %v1394_v15, %v1349_v21  ;;  %v4871_v24 = vld [vmem:[#allocation95_spill] sm:$0xff]  ;;  %v4872_v55 = vld [vmem:[#allocation96_spill] sm:$0xff]  ;;  %v2180_v4 = vld [vmem:[%s4426_s0 + $0xb50] sm:$0x3]  ;;  %v1478_v43 = vmul.f32 %v2172_v41, %v4785_v25 }
 0x10d   :  { %v1430_v53 = vmul.f32 %v2156_v17, %v4871_v24  ;;  %v1442_v56 = vmul.f32 %v2160_v44, %v4872_v55  ;;  %v2184_v34 = vld [vmem:[%s4426_s0 + $0xb68] sm:$0x3]  ;;  %v1421_v38 = vadd.f32 %v1418_v47, %v1373_v29  ;;  %v4873_v58 = vld [vmem:[#allocation97_spill] sm:$0xff]  ;;  %v4874_v6 = vld [vmem:[#allocation98_spill] sm:$0xff]  ;;  %v1490_v14 = vmul.f32 %v2176_v42, %v4786_v18 }
 0x10e   :  { %v1409_v46 = vadd.f32 %v1406_v30, %v1361_v28  ;;  %v1454_v7 = vmul.f32 %v2164_v8, %v4873_v58  ;;  %v1466_v23 = vmul.f32 %v2168_v1, %v4874_v6  ;;  %v2188_v37 = vld [vmem:[%s4426_s0 + $0xb80] sm:$0x3]  ;;  %v1502_v57 = vmul.f32 %v2180_v4, %v4787_v59  ;;  %v4875_v27 = vld [vmem:[#allocation102_spill] sm:$0xff]  ;;  %v1558_v49 = vld [vmem:[#allocation2 + $0x30] sm:$0x3]  ;;  %s1559_s0 = sld [smem:[#allocation7]]  ;;  %v1583_v58 = vpop.permute.xlu1 %1582 }
 0x10f   :  { %v1433_v50 = vadd.f32 %v1430_v53, %v1385_v20  ;;  %v1445_v10 = vadd.f32 %v1442_v56, %v1397_v45  ;;  %v1514_v33 = vmul.f32 %v2184_v34, %v4875_v27  ;;  %v4876_v19 = vld [vmem:[#allocation103_spill] sm:$0xff]  ;;  %v1555_v22 = vld [vmem:[#allocation2 + $0x8] sm:$0x80]  ;;  %v1601_v31 = vstv %s4348_s3  ;;  %v4878_v17 = vld [vmem:[#allocation13_spill] sm:$0xff] }
 0x110   :  { %v1457_v54 = vadd.f32 %v1454_v7, %v1409_v46  ;;  %v1469_v51 = vadd.f32 %v1466_v23, %v1421_v38  ;;  %v1526_v48 = vmul.f32 %v2188_v37, %v4876_v19  ;;  %v1602_v52 = vmul.f32 %v1601_v31, %v1555_v22  ;;  %v4877_v5 = vld [vmem:[#allocation11_spill] sm:$0xff]  ;;  %v2197_v28 = vld [vmem:[#allocation2 + $0x28] sm:$0xff] }
 0x111   :  { %v1481_v60 = vadd.f32 %v1478_v43, %v1433_v50  ;;  %v1493_v36 = vadd.f32 %v1490_v14, %v1445_v10  ;;  %v1632_v18 = vmul.f32 %v4877_v5, %v1558_v49  ;;  %v1603_v11 = vmul.f32 %v1601_v31, %v4032_v0 }
 0x112   :  { %v1505_v61 = vadd.f32 %v1502_v57, %v1457_v54  ;;  %v1517_v62 = vadd.f32 %v1514_v33, %v1469_v51  ;;  %v1611_v59 = vrot.slane %v1602_v52, 7  ;;  %v1627_v13 = vmul.f32 %v4877_v5, %v1555_v22  ;;  %v1585_v6 = vpop.permute.xlu1 %1584 }
 0x113   :  { %v1529_v63 = vadd.f32 %v1526_v48, %v1481_v60  ;;  %v1652_v16 = vrot.slane %v1632_v18, 7  ;;  %v1612_v21 = vrot.slane %v1603_v11, 7  ;;  %v1629_v26 = vmul.f32 %v4877_v5, %v4032_v0 }
 0x114   :  { %v1532_v25 = vadd.f32 %v1517_v62, %v1505_v61  ;;  %v1645_v8 = vrot.slane %v1627_v13, 7  ;;  %v1631_v29 = vmul.f32 %v2197_v28, %v4877_v5  ;;  %v1560_v55 = vstv %s1559_s0 }
 0x115   :  { %v1535_v39 = vadd.f32 %v1529_v63, %v1493_v36  ;;  %v1653_v44 = vsel %vm1610_vm0, %v4878_v17, %v1652_v16  ;;  %v1613_v12 = vsel %vm1610_vm0, %v1611_v59, %v1612_v21  ;;  %v1646_v1 = vrot.slane %v1629_v26, 7 }
 0x116   :  { %1664 = vrot.lane.b32.xlu0 %v1653_v44, %s2229_s27  ;;  %v1650_v40 = vrot.slane %v1631_v29, 7  ;;  %v1561_v56 = vmul.f32 %v1560_v55, %v4032_v0  ;;  %v1604_v23 = vmul.f32 %v2197_v28, %v1601_v31  ;;  %v1562_v43 = vmul.f32 %v2197_v28, %v1560_v55 }
 0x117   :  { %v1538_v35 = vadd.f32 %v1535_v39, %v1532_v25  ;;  %v1647_v30 = vsel %vm1610_vm0, %v1645_v8, %v1646_v1  ;;  %v1592_v54 = vsel %vm1590_vm3, %v1583_v58, %v1585_v6  ;;  %v1678_v36 = vstv %s4430_s4 }
 0x118   :  { %v1651_v41 = vsel %vm1610_vm0, %v1646_v1, %v1650_v40  ;;  %v1614_v10 = vrot.slane %v1604_v23, 7  ;;  %v1598_v27 = vadd.f32 %v1592_v54, %v1562_v43 }
 0x119   :  { %v1543_v9 = vadd.f32 %v2284_v2, %v1538_v35 }
 0x11a   :  { %v1615_v48 = vsel %vm1610_vm0, %v1612_v21, %v1614_v10 }
 0x11b   :  { %1548 = vst.msk [vmem:[#allocation2 + $0x38] sm:$0x3] %vm1547_vm2, %v1543_v9  ;;  %v1622_v62 = vadd.f32 %v1615_v48, %v1598_v27 }
 0x122   :  { %v1551_v15 = vld [vmem:[#allocation2 + $0x38] sm:$0x7] }
 0x123   :  { %v1571_v32 = vmul.f32 %v2286_v3, %v1551_v15  ;;  %v1556_v2 = vld [vmem:[#allocation2 + $0x38] sm:$0x3]  ;;  %v1579_v3 = vpop.permute.xlu0 %1578  ;;  %v1563_v50 = vmul.f32 %v1560_v55, %v1551_v15 }
 0x124   :  { %v1633_v47 = vmul.f32 %v4877_v5, %v1556_v2  ;;  %v1605_v7 = vmul.f32 %v1601_v31, %v1556_v2 }
 0x125   :  { %1588 = vrot.lane.b32.xlu1 %v1571_v32, %s2229_s27 }
 0x126   :  { %v1654_v42 = vrot.slane %v1633_v47, 7  ;;  %v1616_v37 = vrot.slane %v1605_v7, 7 }
 0x127   :  { %v1587_v45 = vpop.permute.xlu0 %1586 }
 0x128   :  { %v1655_v20 = vsel %vm1610_vm0, %v1650_v40, %v1654_v42  ;;  %v1617_v0 = vsel %vm1610_vm0, %v1614_v10, %v1616_v37 }
 0x129   :  { %1658 = vrot.lane.b32.xlu1 %v1647_v30, %s2229_s27 }
 0x12b   :  { %v1657_v24 = vpop.permute.xlu0 %1656 }
 0x12d   :  { %1662 = vrot.lane.b32.xlu1 %v1651_v41, %s2229_s27 }
 0x12f   :  { %v1661_v53 = vpop.permute.xlu0 %1660 }
 0x131   :  { %1666 = vrot.lane.b32.xlu1 %v1655_v20, %s2229_s27 }
 0x14e   :  { %v1581_v4 = vpop.permute.xlu0 %1580 }
 0x14f   :  { %v1591_v34 = vsel %vm1590_vm3, %v1579_v3, %v1581_v4 }
 0x150   :  { %v1597_v46 = vadd.f32 %v1591_v34, %v1561_v56 }
 0x152   :  { %v1621_v38 = vadd.f32 %v1613_v12, %v1597_v46 }
 0x188   :  { %v1665_v25 = vpop.permute.xlu0 %1664 }
 0x197   :  { %v1589_v14 = vpop.permute.xlu1 %1588 }
 0x198   :  { %v1593_v51 = vsel %vm1590_vm3, %v1587_v45, %v1589_v14 }
 0x199   :  { %v1599_v57 = vadd.f32 %v1593_v51, %v1563_v50 }
 0x19b   :  { %v1659_v33 = vpop.permute.xlu1 %1658  ;;  %v1623_v60 = vadd.f32 %v1617_v0, %v1599_v57 }
 0x19c   :  { %v1668_v19 = vsel %vm1590_vm3, %v1657_v24, %v1659_v33 }
 0x19d   :  { %v1674_v49 = vadd.f32 %v1668_v19, %v1621_v38 }
 0x19f   :  { %v1679_v61 = vadd.f32 %v1678_v36, %v1674_v49  ;;  %v1663_v22 = vpop.permute.xlu1 %1662 }
 0x1a0   :  { %v1669_v31 = vsel %vm1590_vm3, %v1661_v53, %v1663_v22 }
 0x1a1   :  { %vm1682_vm5 = vcmp.ge.f32.partialorder %v1679_v61, 0.0  ;;  %v1685_v63 = vmul.f32 0.01, %v1679_v61  ;;  %v1675_v52 = vadd.f32 %v1669_v31, %v1622_v62 }
 0x1a3   :  { %v1688_v5 = vsel %vm1682_vm5, %v1679_v61, %v1685_v63  ;;  %v1680_v18 = vadd.f32 %v1678_v36, %v1675_v52  ;;  %v1667_v39 = vpop.permute.xlu1 %1666 }
 0x1a4   :  { %1692 = vst.msk [vmem:[%s4431_s5] sm:$0xff] %vm1691_vm4, %v1688_v5  ;;  %v1670_v16 = vsel %vm1590_vm3, %v1665_v25, %v1667_v39 }
 0x1a5   :  { %vm1683_vm6 = vcmp.ge.f32.partialorder %v1680_v18, 0.0  ;;  %v1686_v35 = vmul.f32 0.01, %v1680_v18  ;;  %v1676_v59 = vadd.f32 %v1670_v16, %v1623_v60 }
 0x1a7   :  { %v1689_v11 = vsel %vm1683_vm6, %v1680_v18, %v1686_v35  ;;  %v1681_v17 = vadd.f32 %v1678_v36, %v1676_v59 }
 0x1a8   :  { %1693 = vst.msk [vmem:[%s4431_s5 + $0x8] sm:$0xff] %vm1691_vm4, %v1689_v11 }
 0x1a9   :  { %vm1684_vm8 = vcmp.ge.f32.partialorder %v1681_v17, 0.0  ;;  %v1687_v44 = vmul.f32 0.01, %v1681_v17 }
 0x1ab   :  { %v1690_v9 = vsel %vm1684_vm8, %v1681_v17, %v1687_v44 }
 0x1ac   :  { %1695 = vst.msk [vmem:[%s4431_s5 + $0x10] sm:$0x7] %vm1694_vm7, %v1690_v9 }
 0x1ad   :  { %1700 = vsyncpa [#allocation6], 1 }
 0x1ae   :  { %1701 = vsyncpa [#allocation8], 1 }

</bundles_post_ra>
